<compile_context>
chip_gen: v5e
topology: v5e:2x2
jax: 0.10.0
libtpu: 0.0.40
codegen_flags: <defaults>
</compile_context>

<pallas_src>
import functools

import jax
import jax.numpy as jnp
from jax import lax
from jax.experimental import pallas as pl
from jax.experimental.pallas import tpu as pltpu


# -----------------------------------------------------------------------------
# Pallas kernel: one grid step == one batch element, full CondRCUBlock forward.
# -----------------------------------------------------------------------------
def _cond_rcu_kernel(x_ref, gab_ref, w_ref, o_ref, xp_ref, *,
                     H, W, C, n_blocks, n_stages):
    # x_ref  : (1, C, H*W)              one sample, channels on sublanes
    # gab_ref: (1, 3C, NB*NS)           per-sample (gamma|alpha|beta) per stage
    # w_ref  : (NB*NS, C, 9C)  bf16     stage weights, [s, cout, (kh*3+kw)*C+cin]
    # o_ref  : (1, C, H*W)
    # xp_ref : (C, H*W + 2*(W+1)) bf16  flat zero-padded activation scratch
    eps = 1e-5
    HW = H * W
    P = W + 1                                         # flat halo on each side

    # Zero the scratch once per grid step; only the interior is rewritten
    # below, so the halo stays zero for every stage.
    xp_ref[...] = jnp.zeros_like(xp_ref)

    # Column masks for the horizontally-shifted taps (they wrap across rows in
    # the flattened layout).  dw == 0 taps need no mask; vertical out-of-range
    # is handled by the zero halo.
    col = lax.broadcasted_iota(jnp.int32, (1, HW), 1) % W
    ok_left = col >= 1                                # valid source for dw = -1
    ok_right = col < (W - 1)                          # valid source for dw = +1

    gab = gab_ref[0].astype(jnp.float32)              # (3C, NB*NS)
    x = x_ref[0].astype(jnp.float32)                  # (C, HW)

    for i in range(n_blocks):
        residual = x
        for j in range(n_stages):
            s = i * n_stages + j
            gamma = gab[0 * C:1 * C, s:s + 1]         # (C, 1)
            alpha = gab[1 * C:2 * C, s:s + 1]
            beta = gab[2 * C:3 * C, s:s + 1]

            # --- ConditionalInstanceNorm2d++ (class-conditional normalizer) ---
            mu = jnp.mean(x, axis=1, keepdims=True)                   # (C,1) spatial mean
            m = jnp.mean(mu, axis=0, keepdims=True)                   # (1,1)
            v = jnp.sum((mu - m) ** 2, axis=0, keepdims=True) / (C - 1)   # unbiased (torch.var)
            means_n = (mu - m) * lax.rsqrt(v + eps)                   # (C,1)
            var = jnp.mean((x - mu) ** 2, axis=1, keepdims=True)      # biased (InstanceNorm2d)
            h = (x - mu) * lax.rsqrt(var + eps)
            h = h + means_n * alpha
            xn = gamma * h + beta

            # --- ReLU, written (bf16) into the padded-scratch interior ---
            xa = jnp.maximum(xn, 0.0)
            xp_ref[:, P:P + HW] = xa.astype(jnp.bfloat16)

            # --- 3x3 conv (stride 1, pad 1, no bias): one K=9C bf16 matmul ---
            taps = []
            for kh in range(3):
                for kw in range(3):
                    off = (kh - 1) * W + (kw - 1)
                    sl = xp_ref[:, P + off:P + off + HW]              # (C, HW) bf16
                    if kw == 0:
                        sl = jnp.where(ok_left, sl, jnp.zeros_like(sl))
                    elif kw == 2:
                        sl = jnp.where(ok_right, sl, jnp.zeros_like(sl))
                    taps.append(sl)
            im2col = jnp.concatenate(taps, axis=0)                    # (9C, HW) bf16
            x = jnp.dot(w_ref[s], im2col,
                        preferred_element_type=jnp.float32)           # (C, HW) f32
        x = x + residual

    o_ref[...] = x.reshape(1, C, HW).astype(o_ref.dtype)


# -----------------------------------------------------------------------------
# Weight re-layout (do once and cache if weights are reused across calls).
# -----------------------------------------------------------------------------
def prepare_weights(conv_w):
    """(NB, NS, O, I, 3, 3) -> (NB*NS, O, 9*I) bf16, tap-major contraction."""
    NB, NS, O, I, KH, KW = conv_w.shape
    w = conv_w.reshape(NB * NS, O, I, KH, KW)
    w = jnp.transpose(w, (0, 1, 3, 4, 2)).reshape(NB * NS, O, KH * KW * I)
    return w.astype(jnp.bfloat16)


# -----------------------------------------------------------------------------
# Wrapper: reshape-only boundary (stays NCHW), embedding gather, pallas_call.
# -----------------------------------------------------------------------------
@functools.partial(jax.jit, static_argnames=("n_blocks", "n_stages"))
def cond_rcu_block(x_nchw, y, embed_w, conv_w, *, n_blocks, n_stages):
    N, C, H, W = x_nchw.shape
    assert C > 1, "unbiased channel variance needs C > 1"
    HW = H * W
    NBNS = n_blocks * n_stages

    x = x_nchw.reshape(N, C, HW).astype(jnp.float32)

    # class-embedding gather (gamma|alpha|beta) -> (N, 3C, NB*NS) column layout
    gab = embed_w[:, :, y, :]                                        # (NB, NS, N, 3C)
    gab = jnp.transpose(gab, (2, 3, 0, 1)).reshape(N, 3 * C, NBNS).astype(jnp.float32)

    w = prepare_weights(conv_w)                                      # (NBNS, C, 9C) bf16

    kernel = functools.partial(_cond_rcu_kernel, H=H, W=W, C=C,
                               n_blocks=n_blocks, n_stages=n_stages)

    out = pl.pallas_call(
        kernel,
        out_shape=jax.ShapeDtypeStruct((N, C, HW), jnp.float32),
        grid_spec=pltpu.PrefetchScalarGridSpec(
            num_scalar_prefetch=0,
            grid=(N,),
            in_specs=[
                pl.BlockSpec((1, C, HW), lambda n: (n, 0, 0)),
                pl.BlockSpec((1, 3 * C, NBNS), lambda n: (n, 0, 0)),
                pl.BlockSpec((NBNS, C, 9 * C), lambda n: (0, 0, 0)),
            ],
            out_specs=pl.BlockSpec((1, C, HW), lambda n: (n, 0, 0)),
            scratch_shapes=[pltpu.VMEM((C, HW + 2 * (W + 1)), jnp.bfloat16)],
        ),
        compiler_params=pltpu.CompilerParams(dimension_semantics=("parallel",)),
    )(x, gab, w)

    return out.reshape(N, C, H, W)


# -----------------------------------------------------------------------------
# Deterministic parameter init (matches the module's __init__ shapes).
# -----------------------------------------------------------------------------
def init_params(key, features, n_blocks, n_stages, num_classes):
    k1, k2 = jax.random.split(key)
    # ConditionalInstanceNorm2dPlus embedding: first 2C ~ N(1, 0.02), last C zeros.
    emb = jnp.concatenate(
        [1.0 + 0.02 * jax.random.normal(k1, (n_blocks, n_stages, num_classes, 2 * features)),
         jnp.zeros((n_blocks, n_stages, num_classes, features))],
        axis=-1).astype(jnp.float32)
    # conv3x3, bias=False; deterministic small normal init.
    conv_w = (0.05 * jax.random.normal(
        k2, (n_blocks, n_stages, features, features, 3, 3))).astype(jnp.float32)
    return emb, conv_w


# -----------------------------------------------------------------------------
# Pure-JAX reference (for correctness check only).
# -----------------------------------------------------------------------------
def ref_forward(x, y, embed_w, conv_w, *, n_blocks, n_stages):
    N, C, H, W = x.shape
    eps = 1e-5
    out = x.astype(jnp.float32)
    for i in range(n_blocks):
        residual = out
        for j in range(n_stages):
            gab = embed_w[i, j][y]                                    # (N, 3C)
            gamma, alpha, beta = gab[:, :C], gab[:, C:2 * C], gab[:, 2 * C:]
            mu = out.mean(axis=(2, 3))                                # (N, C)
            m = mu.mean(axis=-1, keepdims=True)
            v = jnp.var(mu, axis=-1, keepdims=True, ddof=1)
            means_n = (mu - m) / jnp.sqrt(v + eps)
            var = jnp.var(out, axis=(2, 3))                           # biased
            h = (out - mu[:, :, None, None]) / jnp.sqrt(var[:, :, None, None] + eps)
            h = h + (means_n * alpha)[:, :, None, None]
            xn = gamma[:, :, None, None] * h + beta[:, :, None, None]
            xa = jnp.maximum(xn, 0.0)
            out = lax.conv_general_dilated(
                xa, conv_w[i, j], window_strides=(1, 1), padding="SAME",
                dimension_numbers=("NCHW", "OIHW", "NCHW"))
        out = out + residual
    return out


if __name__ == "__main__":
    N, C, H, W = 2, 32, 16, 16
    n_blocks, n_stages, num_classes = 2, 2, 25

    key = jax.random.PRNGKey(0)
    kx, ky, kp = jax.random.split(key, 3)
    x = jax.random.normal(kx, (N, C, H, W), dtype=jnp.float32)
    y = jax.random.randint(ky, (N,), 0, num_classes, dtype=jnp.int32)
    embed_w, conv_w = init_params(kp, C, n_blocks, n_stages, num_classes)

    out = cond_rcu_block(x, y, embed_w, conv_w, n_blocks=n_blocks, n_stages=n_stages)
    out = jax.block_until_ready(out)

    ref = jax.block_until_ready(
        ref_forward(x, y, embed_w, conv_w, n_blocks=n_blocks, n_stages=n_stages))

    assert out.shape == (N, C, H, W)
    # Conv matmuls run in bf16 on the MXU (f32 accumulation), so allow a
    # slightly looser absolute tolerance than the all-f32 reference.
    assert jnp.allclose(out, ref, rtol=2e-2, atol=2.5e-2), (
        float(jnp.max(jnp.abs(out - ref))))
    print("KERNEL_OK")
</pallas_src>

<mosaic_0001>
module attributes {stable_mosaic.version = 11 : i64} {
  func.func @_cond_rcu_kernel(%arg0: i32, %arg1: memref<1x32x256xf32, #tpu.memory_space<vmem>>, %arg2: memref<1x96x4xf32, #tpu.memory_space<vmem>>, %arg3: memref<4x32x288xbf16, #tpu.memory_space<vmem>>, %arg4: memref<1x32x256xf32, #tpu.memory_space<vmem>>, %arg5: memref<32x290xbf16, #tpu.memory_space<vmem>>) attributes {dimension_semantics = [#tpu.dimension_semantics<parallel>], iteration_bounds = array<i64: 2>, scalar_prefetch = 0 : i64, scratch_operands = 1 : i64, tpu.core_type = #tpu.core_type<tc>, window_params = [{transform_indices = @transform_0, window_bounds = array<i64: 1, 32, 256>}, {transform_indices = @transform_1, window_bounds = array<i64: 1, 96, 4>}, {pipeline_mode = #tpu.pipeline_mode<synchronous>, transform_indices = @transform_2, window_bounds = array<i64: 4, 32, 288>}, {transform_indices = @transform_3, window_bounds = array<i64: 1, 32, 256>}]} {
    %cst = arith.constant 0.000000e+00 : bf16
    %0 = vector.broadcast %cst : bf16 to vector<32x290xbf16>
    %c0 = arith.constant 0 : index
    %c0_0 = arith.constant 0 : index
    %1 = vector.load %arg5[%c0, %c0_0] : memref<32x290xbf16, #tpu.memory_space<vmem>>, vector<32x290xbf16>
    tpu.vector_store %arg5[%c0, %c0_0], %0 {strides = array<i32>} : memref<32x290xbf16, #tpu.memory_space<vmem>>, vector<32x290xbf16>,
    %2 = tpu.iota {dimensions = array<i32: 1>} : vector<1x256xi32>
    %c16_i32 = arith.constant 16 : i32
    %c0_i32 = arith.constant 0 : i32
    %3 = arith.cmpi eq, %c16_i32, %c0_i32 : i32
    %c1_i32 = arith.constant 1 : i32
    %4 = arith.select %3, %c1_i32, %c16_i32 : i32
    %5 = vector.broadcast %4 : i32 to vector<1x256xi32>
    %6 = arith.remsi %2, %5 : vector<1x256xi32>
    %c0_i32_1 = arith.constant 0 : i32
    %7 = vector.broadcast %c0_i32_1 : i32 to vector<1x256xi32>
    %8 = arith.cmpi ne, %6, %7 : vector<1x256xi32>
    %c0_i32_2 = arith.constant 0 : i32
    %9 = vector.broadcast %c0_i32_2 : i32 to vector<1x256xi32>
    %10 = arith.cmpi slt, %6, %9 : vector<1x256xi32>
    %c0_i32_3 = arith.constant 0 : i32
    %11 = arith.cmpi slt, %4, %c0_i32_3 : i32
    %12 = vector.broadcast %11 : i1 to vector<1x256xi1>
    %13 = vector.broadcast %12 : vector<1x256xi1> to vector<1x256xi1>
    %14 = arith.xori %10, %13 : vector<1x256xi1>
    %15 = arith.andi %14, %8 : vector<1x256xi1>
    %16 = vector.broadcast %4 : i32 to vector<1x256xi32>
    %17 = arith.addi %6, %16 : vector<1x256xi32>
    %18 = arith.select %15, %17, %6 : vector<1x256xi1>, vector<1x256xi32>
    %c1_i32_4 = arith.constant 1 : i32
    %19 = vector.broadcast %c1_i32_4 : i32 to vector<1x256xi32>
    %20 = arith.cmpi sge, %18, %19 : vector<1x256xi32>
    %c15_i32 = arith.constant 15 : i32
    %21 = vector.broadcast %c15_i32 : i32 to vector<1x256xi32>
    %22 = arith.cmpi slt, %18, %21 : vector<1x256xi32>
    %c0_5 = arith.constant 0 : index
    %c0_6 = arith.constant 0 : index
    %c0_7 = arith.constant 0 : index
    %23 = vector.load %arg2[%c0_5, %c0_6, %c0_7] : memref<1x96x4xf32, #tpu.memory_space<vmem>>, vector<1x96x4xf32>
    %24 = vector.shape_cast %23 : vector<1x96x4xf32> to vector<96x4xf32>
    %c0_8 = arith.constant 0 : index
    %c0_9 = arith.constant 0 : index
    %c0_10 = arith.constant 0 : index
    %25 = vector.load %arg1[%c0_8, %c0_9, %c0_10] : memref<1x32x256xf32, #tpu.memory_space<vmem>>, vector<1x32x256xf32>
    %26 = vector.shape_cast %25 : vector<1x32x256xf32> to vector<32x256xf32>
    %27 = vector.extract_strided_slice %24 {offsets = [0, 0], sizes = [32, 1], strides = [1, 1]} : vector<96x4xf32> to vector<32x1xf32>
    %28 = vector.extract_strided_slice %24 {offsets = [32, 0], sizes = [32, 1], strides = [1, 1]} : vector<96x4xf32> to vector<32x1xf32>
    %29 = vector.extract_strided_slice %24 {offsets = [64, 0], sizes = [32, 1], strides = [1, 1]} : vector<96x4xf32> to vector<32x1xf32>
    %cst_11 = arith.constant dense<0.000000e+00> : vector<32xf32>
    %30 = vector.multi_reduction <add>, %26, %cst_11 [1] : vector<32x256xf32> to vector<32xf32>
    %31 = vector.shape_cast %30 : vector<32xf32> to vector<32x1xf32>
    %cst_12 = arith.constant 2.560000e+02 : f32
    %32 = vector.broadcast %cst_12 : f32 to vector<32x1xf32>
    %33 = arith.divf %31, %32 : vector<32x1xf32>
    %cst_13 = arith.constant dense<0.000000e+00> : vector<1xf32>
    %34 = vector.multi_reduction <add>, %33, %cst_13 [0] : vector<32x1xf32> to vector<1xf32>
    %35 = vector.shape_cast %34 : vector<1xf32> to vector<1x1xf32>
    %cst_14 = arith.constant 3.200000e+01 : f32
    %36 = vector.broadcast %cst_14 : f32 to vector<1x1xf32>
    %37 = arith.divf %35, %36 : vector<1x1xf32>
    %38 = vector.broadcast %37 : vector<1x1xf32> to vector<32x1xf32>
    %39 = arith.subf %33, %38 : vector<32x1xf32>
    %40 = arith.mulf %39, %39 : vector<32x1xf32>
    %cst_15 = arith.constant dense<0.000000e+00> : vector<1xf32>
    %41 = vector.multi_reduction <add>, %40, %cst_15 [0] : vector<32x1xf32> to vector<1xf32>
    %42 = vector.shape_cast %41 : vector<1xf32> to vector<1x1xf32>
    %cst_16 = arith.constant 3.100000e+01 : f32
    %43 = vector.broadcast %cst_16 : f32 to vector<1x1xf32>
    %44 = arith.divf %42, %43 : vector<1x1xf32>
    %45 = vector.broadcast %37 : vector<1x1xf32> to vector<32x1xf32>
    %46 = arith.subf %33, %45 : vector<32x1xf32>
    %cst_17 = arith.constant 9.99999974E-6 : f32
    %47 = vector.broadcast %cst_17 : f32 to vector<1x1xf32>
    %48 = arith.addf %44, %47 : vector<1x1xf32>
    %49 = math.rsqrt %48 : vector<1x1xf32>
    %50 = vector.broadcast %49 : vector<1x1xf32> to vector<32x1xf32>
    %51 = arith.mulf %46, %50 : vector<32x1xf32>
    %52 = vector.broadcast %33 : vector<32x1xf32> to vector<32x256xf32>
    %53 = arith.subf %26, %52 : vector<32x256xf32>
    %54 = arith.mulf %53, %53 : vector<32x256xf32>
    %cst_18 = arith.constant dense<0.000000e+00> : vector<32xf32>
    %55 = vector.multi_reduction <add>, %54, %cst_18 [1] : vector<32x256xf32> to vector<32xf32>
    %56 = vector.shape_cast %55 : vector<32xf32> to vector<32x1xf32>
    %cst_19 = arith.constant 2.560000e+02 : f32
    %57 = vector.broadcast %cst_19 : f32 to vector<32x1xf32>
    %58 = arith.divf %56, %57 : vector<32x1xf32>
    %59 = vector.broadcast %33 : vector<32x1xf32> to vector<32x256xf32>
    %60 = arith.subf %26, %59 : vector<32x256xf32>
    %cst_20 = arith.constant 9.99999974E-6 : f32
    %61 = vector.broadcast %cst_20 : f32 to vector<32x1xf32>
    %62 = arith.addf %58, %61 : vector<32x1xf32>
    %63 = math.rsqrt %62 : vector<32x1xf32>
    %64 = vector.broadcast %63 : vector<32x1xf32> to vector<32x256xf32>
    %65 = arith.mulf %60, %64 : vector<32x256xf32>
    %66 = arith.mulf %51, %28 : vector<32x1xf32>
    %67 = vector.broadcast %66 : vector<32x1xf32> to vector<32x256xf32>
    %68 = arith.addf %65, %67 : vector<32x256xf32>
    %69 = vector.broadcast %27 : vector<32x1xf32> to vector<32x256xf32>
    %70 = arith.mulf %69, %68 : vector<32x256xf32>
    %71 = vector.broadcast %29 : vector<32x1xf32> to vector<32x256xf32>
    %72 = arith.addf %70, %71 : vector<32x256xf32>
    %cst_21 = arith.constant 0.000000e+00 : f32
    %73 = vector.broadcast %cst_21 : f32 to vector<32x256xf32>
    %74 = arith.maximumf %72, %73 : vector<32x256xf32>
    %75 = arith.truncf %74 : vector<32x256xf32> to vector<32x256xbf16>
    %c0_22 = arith.constant 0 : index
    %c17 = arith.constant 17 : index
    %76 = vector.load %arg5[%c0_22, %c17] : memref<32x290xbf16, #tpu.memory_space<vmem>>, vector<32x256xbf16>
    tpu.vector_store %arg5[%c0_22, %c17], %75 {strides = array<i32>} : memref<32x290xbf16, #tpu.memory_space<vmem>>, vector<32x256xbf16>,
    %c0_23 = arith.constant 0 : index
    %c0_24 = arith.constant 0 : index
    %77 = vector.load %arg5[%c0_23, %c0_24] : memref<32x290xbf16, #tpu.memory_space<vmem>>, vector<32x256xbf16>
    %cst_25 = arith.constant 0.000000e+00 : bf16
    %78 = vector.broadcast %cst_25 : bf16 to vector<32x256xbf16>
    %79 = vector.shape_cast %20 : vector<1x256xi1> to vector<1x256xi1>
    %80 = vector.broadcast %79 : vector<1x256xi1> to vector<32x256xi1>
    %81 = arith.select %80, %77, %78 : vector<32x256xi1>, vector<32x256xbf16>
    %c0_26 = arith.constant 0 : index
    %c1 = arith.constant 1 : index
    %82 = vector.load %arg5[%c0_26, %c1] : memref<32x290xbf16, #tpu.memory_space<vmem>>, vector<32x256xbf16>
    %c0_27 = arith.constant 0 : index
    %c2 = arith.constant 2 : index
    %83 = vector.load %arg5[%c0_27, %c2] : memref<32x290xbf16, #tpu.memory_space<vmem>>, vector<32x256xbf16>
    %cst_28 = arith.constant 0.000000e+00 : bf16
    %84 = vector.broadcast %cst_28 : bf16 to vector<32x256xbf16>
    %85 = vector.shape_cast %22 : vector<1x256xi1> to vector<1x256xi1>
    %86 = vector.broadcast %85 : vector<1x256xi1> to vector<32x256xi1>
    %87 = arith.select %86, %83, %84 : vector<32x256xi1>, vector<32x256xbf16>
    %c0_29 = arith.constant 0 : index
    %c16 = arith.constant 16 : index
    %88 = vector.load %arg5[%c0_29, %c16] : memref<32x290xbf16, #tpu.memory_space<vmem>>, vector<32x256xbf16>
    %cst_30 = arith.constant 0.000000e+00 : bf16
    %89 = vector.broadcast %cst_30 : bf16 to vector<32x256xbf16>
    %90 = vector.shape_cast %20 : vector<1x256xi1> to vector<1x256xi1>
    %91 = vector.broadcast %90 : vector<1x256xi1> to vector<32x256xi1>
    %92 = arith.select %91, %88, %89 : vector<32x256xi1>, vector<32x256xbf16>
    %c0_31 = arith.constant 0 : index
    %c17_32 = arith.constant 17 : index
    %93 = vector.load %arg5[%c0_31, %c17_32] : memref<32x290xbf16, #tpu.memory_space<vmem>>, vector<32x256xbf16>
    %c0_33 = arith.constant 0 : index
    %c18 = arith.constant 18 : index
    %94 = vector.load %arg5[%c0_33, %c18] : memref<32x290xbf16, #tpu.memory_space<vmem>>, vector<32x256xbf16>
    %cst_34 = arith.constant 0.000000e+00 : bf16
    %95 = vector.broadcast %cst_34 : bf16 to vector<32x256xbf16>
    %96 = vector.shape_cast %22 : vector<1x256xi1> to vector<1x256xi1>
    %97 = vector.broadcast %96 : vector<1x256xi1> to vector<32x256xi1>
    %98 = arith.select %97, %94, %95 : vector<32x256xi1>, vector<32x256xbf16>
    %c0_35 = arith.constant 0 : index
    %c32 = arith.constant 32 : index
    %99 = vector.load %arg5[%c0_35, %c32] : memref<32x290xbf16, #tpu.memory_space<vmem>>, vector<32x256xbf16>
    %cst_36 = arith.constant 0.000000e+00 : bf16
    %100 = vector.broadcast %cst_36 : bf16 to vector<32x256xbf16>
    %101 = vector.shape_cast %20 : vector<1x256xi1> to vector<1x256xi1>
    %102 = vector.broadcast %101 : vector<1x256xi1> to vector<32x256xi1>
    %103 = arith.select %102, %99, %100 : vector<32x256xi1>, vector<32x256xbf16>
    %c0_37 = arith.constant 0 : index
    %c33 = arith.constant 33 : index
    %104 = vector.load %arg5[%c0_37, %c33] : memref<32x290xbf16, #tpu.memory_space<vmem>>, vector<32x256xbf16>
    %c0_38 = arith.constant 0 : index
    %c34 = arith.constant 34 : index
    %105 = vector.load %arg5[%c0_38, %c34] : memref<32x290xbf16, #tpu.memory_space<vmem>>, vector<32x256xbf16>
    %cst_39 = arith.constant 0.000000e+00 : bf16
    %106 = vector.broadcast %cst_39 : bf16 to vector<32x256xbf16>
    %107 = vector.shape_cast %22 : vector<1x256xi1> to vector<1x256xi1>
    %108 = vector.broadcast %107 : vector<1x256xi1> to vector<32x256xi1>
    %109 = arith.select %108, %105, %106 : vector<32x256xi1>, vector<32x256xbf16>
    %110 = tpu.concatenate %81, %82, %87, %92, %93, %98, %103, %104, %109 in 0 : vector<32x256xbf16>, vector<32x256xbf16>, vector<32x256xbf16>, vector<32x256xbf16>, vector<32x256xbf16>, vector<32x256xbf16>, vector<32x256xbf16>, vector<32x256xbf16>, vector<32x256xbf16> -> vector<288x256xbf16>
    %c0_40 = arith.constant 0 : index
    %c0_41 = arith.constant 0 : index
    %c0_42 = arith.constant 0 : index
    %111 = vector.load %arg3[%c0_40, %c0_41, %c0_42] : memref<4x32x288xbf16, #tpu.memory_space<vmem>>, vector<1x32x288xbf16>
    %112 = vector.shape_cast %111 : vector<1x32x288xbf16> to vector<32x288xbf16>
    %cst_43 = arith.constant dense<0.000000e+00> : vector<32x256xf32>
    %113 = tpu.matmul %112, %110, %cst_43 {dimension_numbers = #tpu.dot_dimension_numbers<[1], [0], [0], [1], [0, 0, 1, 1], [], []>} : vector<32x288xbf16>, vector<288x256xbf16>, vector<32x256xf32> -> vector<32x256xf32>
    %114 = vector.extract_strided_slice %24 {offsets = [0, 1], sizes = [32, 1], strides = [1, 1]} : vector<96x4xf32> to vector<32x1xf32>
    %115 = vector.extract_strided_slice %24 {offsets = [32, 1], sizes = [32, 1], strides = [1, 1]} : vector<96x4xf32> to vector<32x1xf32>
    %116 = vector.extract_strided_slice %24 {offsets = [64, 1], sizes = [32, 1], strides = [1, 1]} : vector<96x4xf32> to vector<32x1xf32>
    %cst_44 = arith.constant dense<0.000000e+00> : vector<32xf32>
    %117 = vector.multi_reduction <add>, %113, %cst_44 [1] : vector<32x256xf32> to vector<32xf32>
    %118 = vector.shape_cast %117 : vector<32xf32> to vector<32x1xf32>
    %cst_45 = arith.constant 2.560000e+02 : f32
    %119 = vector.broadcast %cst_45 : f32 to vector<32x1xf32>
    %120 = arith.divf %118, %119 : vector<32x1xf32>
    %cst_46 = arith.constant dense<0.000000e+00> : vector<1xf32>
    %121 = vector.multi_reduction <add>, %120, %cst_46 [0] : vector<32x1xf32> to vector<1xf32>
    %122 = vector.shape_cast %121 : vector<1xf32> to vector<1x1xf32>
    %cst_47 = arith.constant 3.200000e+01 : f32
    %123 = vector.broadcast %cst_47 : f32 to vector<1x1xf32>
    %124 = arith.divf %122, %123 : vector<1x1xf32>
    %125 = vector.broadcast %124 : vector<1x1xf32> to vector<32x1xf32>
    %126 = arith.subf %120, %125 : vector<32x1xf32>
    %127 = arith.mulf %126, %126 : vector<32x1xf32>
    %cst_48 = arith.constant dense<0.000000e+00> : vector<1xf32>
    %128 = vector.multi_reduction <add>, %127, %cst_48 [0] : vector<32x1xf32> to vector<1xf32>
    %129 = vector.shape_cast %128 : vector<1xf32> to vector<1x1xf32>
    %cst_49 = arith.constant 3.100000e+01 : f32
    %130 = vector.broadcast %cst_49 : f32 to vector<1x1xf32>
    %131 = arith.divf %129, %130 : vector<1x1xf32>
    %132 = vector.broadcast %124 : vector<1x1xf32> to vector<32x1xf32>
    %133 = arith.subf %120, %132 : vector<32x1xf32>
    %cst_50 = arith.constant 9.99999974E-6 : f32
    %134 = vector.broadcast %cst_50 : f32 to vector<1x1xf32>
    %135 = arith.addf %131, %134 : vector<1x1xf32>
    %136 = math.rsqrt %135 : vector<1x1xf32>
    %137 = vector.broadcast %136 : vector<1x1xf32> to vector<32x1xf32>
    %138 = arith.mulf %133, %137 : vector<32x1xf32>
    %139 = vector.broadcast %120 : vector<32x1xf32> to vector<32x256xf32>
    %140 = arith.subf %113, %139 : vector<32x256xf32>
    %141 = arith.mulf %140, %140 : vector<32x256xf32>
    %cst_51 = arith.constant dense<0.000000e+00> : vector<32xf32>
    %142 = vector.multi_reduction <add>, %141, %cst_51 [1] : vector<32x256xf32> to vector<32xf32>
    %143 = vector.shape_cast %142 : vector<32xf32> to vector<32x1xf32>
    %cst_52 = arith.constant 2.560000e+02 : f32
    %144 = vector.broadcast %cst_52 : f32 to vector<32x1xf32>
    %145 = arith.divf %143, %144 : vector<32x1xf32>
    %146 = vector.broadcast %120 : vector<32x1xf32> to vector<32x256xf32>
    %147 = arith.subf %113, %146 : vector<32x256xf32>
    %cst_53 = arith.constant 9.99999974E-6 : f32
    %148 = vector.broadcast %cst_53 : f32 to vector<32x1xf32>
    %149 = arith.addf %145, %148 : vector<32x1xf32>
    %150 = math.rsqrt %149 : vector<32x1xf32>
    %151 = vector.broadcast %150 : vector<32x1xf32> to vector<32x256xf32>
    %152 = arith.mulf %147, %151 : vector<32x256xf32>
    %153 = arith.mulf %138, %115 : vector<32x1xf32>
    %154 = vector.broadcast %153 : vector<32x1xf32> to vector<32x256xf32>
    %155 = arith.addf %152, %154 : vector<32x256xf32>
    %156 = vector.broadcast %114 : vector<32x1xf32> to vector<32x256xf32>
    %157 = arith.mulf %156, %155 : vector<32x256xf32>
    %158 = vector.broadcast %116 : vector<32x1xf32> to vector<32x256xf32>
    %159 = arith.addf %157, %158 : vector<32x256xf32>
    %cst_54 = arith.constant 0.000000e+00 : f32
    %160 = vector.broadcast %cst_54 : f32 to vector<32x256xf32>
    %161 = arith.maximumf %159, %160 : vector<32x256xf32>
    %162 = arith.truncf %161 : vector<32x256xf32> to vector<32x256xbf16>
    %c0_55 = arith.constant 0 : index
    %c17_56 = arith.constant 17 : index
    %163 = vector.load %arg5[%c0_55, %c17_56] : memref<32x290xbf16, #tpu.memory_space<vmem>>, vector<32x256xbf16>
    tpu.vector_store %arg5[%c0_55, %c17_56], %162 {strides = array<i32>} : memref<32x290xbf16, #tpu.memory_space<vmem>>, vector<32x256xbf16>,
    %c0_57 = arith.constant 0 : index
    %c0_58 = arith.constant 0 : index
    %164 = vector.load %arg5[%c0_57, %c0_58] : memref<32x290xbf16, #tpu.memory_space<vmem>>, vector<32x256xbf16>
    %cst_59 = arith.constant 0.000000e+00 : bf16
    %165 = vector.broadcast %cst_59 : bf16 to vector<32x256xbf16>
    %166 = vector.shape_cast %20 : vector<1x256xi1> to vector<1x256xi1>
    %167 = vector.broadcast %166 : vector<1x256xi1> to vector<32x256xi1>
    %168 = arith.select %167, %164, %165 : vector<32x256xi1>, vector<32x256xbf16>
    %c0_60 = arith.constant 0 : index
    %c1_61 = arith.constant 1 : index
    %169 = vector.load %arg5[%c0_60, %c1_61] : memref<32x290xbf16, #tpu.memory_space<vmem>>, vector<32x256xbf16>
    %c0_62 = arith.constant 0 : index
    %c2_63 = arith.constant 2 : index
    %170 = vector.load %arg5[%c0_62, %c2_63] : memref<32x290xbf16, #tpu.memory_space<vmem>>, vector<32x256xbf16>
    %cst_64 = arith.constant 0.000000e+00 : bf16
    %171 = vector.broadcast %cst_64 : bf16 to vector<32x256xbf16>
    %172 = vector.shape_cast %22 : vector<1x256xi1> to vector<1x256xi1>
    %173 = vector.broadcast %172 : vector<1x256xi1> to vector<32x256xi1>
    %174 = arith.select %173, %170, %171 : vector<32x256xi1>, vector<32x256xbf16>
    %c0_65 = arith.constant 0 : index
    %c16_66 = arith.constant 16 : index
    %175 = vector.load %arg5[%c0_65, %c16_66] : memref<32x290xbf16, #tpu.memory_space<vmem>>, vector<32x256xbf16>
    %cst_67 = arith.constant 0.000000e+00 : bf16
    %176 = vector.broadcast %cst_67 : bf16 to vector<32x256xbf16>
    %177 = vector.shape_cast %20 : vector<1x256xi1> to vector<1x256xi1>
    %178 = vector.broadcast %177 : vector<1x256xi1> to vector<32x256xi1>
    %179 = arith.select %178, %175, %176 : vector<32x256xi1>, vector<32x256xbf16>
    %c0_68 = arith.constant 0 : index
    %c17_69 = arith.constant 17 : index
    %180 = vector.load %arg5[%c0_68, %c17_69] : memref<32x290xbf16, #tpu.memory_space<vmem>>, vector<32x256xbf16>
    %c0_70 = arith.constant 0 : index
    %c18_71 = arith.constant 18 : index
    %181 = vector.load %arg5[%c0_70, %c18_71] : memref<32x290xbf16, #tpu.memory_space<vmem>>, vector<32x256xbf16>
    %cst_72 = arith.constant 0.000000e+00 : bf16
    %182 = vector.broadcast %cst_72 : bf16 to vector<32x256xbf16>
    %183 = vector.shape_cast %22 : vector<1x256xi1> to vector<1x256xi1>
    %184 = vector.broadcast %183 : vector<1x256xi1> to vector<32x256xi1>
    %185 = arith.select %184, %181, %182 : vector<32x256xi1>, vector<32x256xbf16>
    %c0_73 = arith.constant 0 : index
    %c32_74 = arith.constant 32 : index
    %186 = vector.load %arg5[%c0_73, %c32_74] : memref<32x290xbf16, #tpu.memory_space<vmem>>, vector<32x256xbf16>
    %cst_75 = arith.constant 0.000000e+00 : bf16
    %187 = vector.broadcast %cst_75 : bf16 to vector<32x256xbf16>
    %188 = vector.shape_cast %20 : vector<1x256xi1> to vector<1x256xi1>
    %189 = vector.broadcast %188 : vector<1x256xi1> to vector<32x256xi1>
    %190 = arith.select %189, %186, %187 : vector<32x256xi1>, vector<32x256xbf16>
    %c0_76 = arith.constant 0 : index
    %c33_77 = arith.constant 33 : index
    %191 = vector.load %arg5[%c0_76, %c33_77] : memref<32x290xbf16, #tpu.memory_space<vmem>>, vector<32x256xbf16>
    %c0_78 = arith.constant 0 : index
    %c34_79 = arith.constant 34 : index
    %192 = vector.load %arg5[%c0_78, %c34_79] : memref<32x290xbf16, #tpu.memory_space<vmem>>, vector<32x256xbf16>
    %cst_80 = arith.constant 0.000000e+00 : bf16
    %193 = vector.broadcast %cst_80 : bf16 to vector<32x256xbf16>
    %194 = vector.shape_cast %22 : vector<1x256xi1> to vector<1x256xi1>
    %195 = vector.broadcast %194 : vector<1x256xi1> to vector<32x256xi1>
    %196 = arith.select %195, %192, %193 : vector<32x256xi1>, vector<32x256xbf16>
    %197 = tpu.concatenate %168, %169, %174, %179, %180, %185, %190, %191, %196 in 0 : vector<32x256xbf16>, vector<32x256xbf16>, vector<32x256xbf16>, vector<32x256xbf16>, vector<32x256xbf16>, vector<32x256xbf16>, vector<32x256xbf16>, vector<32x256xbf16>, vector<32x256xbf16> -> vector<288x256xbf16>
    %c1_81 = arith.constant 1 : index
    %c0_82 = arith.constant 0 : index
    %c0_83 = arith.constant 0 : index
    %198 = vector.load %arg3[%c1_81, %c0_82, %c0_83] : memref<4x32x288xbf16, #tpu.memory_space<vmem>>, vector<1x32x288xbf16>
    %199 = vector.shape_cast %198 : vector<1x32x288xbf16> to vector<32x288xbf16>
    %cst_84 = arith.constant dense<0.000000e+00> : vector<32x256xf32>
    %200 = tpu.matmul %199, %197, %cst_84 {dimension_numbers = #tpu.dot_dimension_numbers<[1], [0], [0], [1], [0, 0, 1, 1], [], []>} : vector<32x288xbf16>, vector<288x256xbf16>, vector<32x256xf32> -> vector<32x256xf32>
    %201 = arith.addf %200, %26 : vector<32x256xf32>
    %202 = vector.extract_strided_slice %24 {offsets = [0, 2], sizes = [32, 1], strides = [1, 1]} : vector<96x4xf32> to vector<32x1xf32>
    %203 = vector.extract_strided_slice %24 {offsets = [32, 2], sizes = [32, 1], strides = [1, 1]} : vector<96x4xf32> to vector<32x1xf32>
    %204 = vector.extract_strided_slice %24 {offsets = [64, 2], sizes = [32, 1], strides = [1, 1]} : vector<96x4xf32> to vector<32x1xf32>
    %cst_85 = arith.constant dense<0.000000e+00> : vector<32xf32>
    %205 = vector.multi_reduction <add>, %201, %cst_85 [1] : vector<32x256xf32> to vector<32xf32>
    %206 = vector.shape_cast %205 : vector<32xf32> to vector<32x1xf32>
    %cst_86 = arith.constant 2.560000e+02 : f32
    %207 = vector.broadcast %cst_86 : f32 to vector<32x1xf32>
    %208 = arith.divf %206, %207 : vector<32x1xf32>
    %cst_87 = arith.constant dense<0.000000e+00> : vector<1xf32>
    %209 = vector.multi_reduction <add>, %208, %cst_87 [0] : vector<32x1xf32> to vector<1xf32>
    %210 = vector.shape_cast %209 : vector<1xf32> to vector<1x1xf32>
    %cst_88 = arith.constant 3.200000e+01 : f32
    %211 = vector.broadcast %cst_88 : f32 to vector<1x1xf32>
    %212 = arith.divf %210, %211 : vector<1x1xf32>
    %213 = vector.broadcast %212 : vector<1x1xf32> to vector<32x1xf32>
    %214 = arith.subf %208, %213 : vector<32x1xf32>
    %215 = arith.mulf %214, %214 : vector<32x1xf32>
    %cst_89 = arith.constant dense<0.000000e+00> : vector<1xf32>
    %216 = vector.multi_reduction <add>, %215, %cst_89 [0] : vector<32x1xf32> to vector<1xf32>
    %217 = vector.shape_cast %216 : vector<1xf32> to vector<1x1xf32>
    %cst_90 = arith.constant 3.100000e+01 : f32
    %218 = vector.broadcast %cst_90 : f32 to vector<1x1xf32>
    %219 = arith.divf %217, %218 : vector<1x1xf32>
    %220 = vector.broadcast %212 : vector<1x1xf32> to vector<32x1xf32>
    %221 = arith.subf %208, %220 : vector<32x1xf32>
    %cst_91 = arith.constant 9.99999974E-6 : f32
    %222 = vector.broadcast %cst_91 : f32 to vector<1x1xf32>
    %223 = arith.addf %219, %222 : vector<1x1xf32>
    %224 = math.rsqrt %223 : vector<1x1xf32>
    %225 = vector.broadcast %224 : vector<1x1xf32> to vector<32x1xf32>
    %226 = arith.mulf %221, %225 : vector<32x1xf32>
    %227 = vector.broadcast %208 : vector<32x1xf32> to vector<32x256xf32>
    %228 = arith.subf %201, %227 : vector<32x256xf32>
    %229 = arith.mulf %228, %228 : vector<32x256xf32>
    %cst_92 = arith.constant dense<0.000000e+00> : vector<32xf32>
    %230 = vector.multi_reduction <add>, %229, %cst_92 [1] : vector<32x256xf32> to vector<32xf32>
    %231 = vector.shape_cast %230 : vector<32xf32> to vector<32x1xf32>
    %cst_93 = arith.constant 2.560000e+02 : f32
    %232 = vector.broadcast %cst_93 : f32 to vector<32x1xf32>
    %233 = arith.divf %231, %232 : vector<32x1xf32>
    %234 = vector.broadcast %208 : vector<32x1xf32> to vector<32x256xf32>
    %235 = arith.subf %201, %234 : vector<32x256xf32>
    %cst_94 = arith.constant 9.99999974E-6 : f32
    %236 = vector.broadcast %cst_94 : f32 to vector<32x1xf32>
    %237 = arith.addf %233, %236 : vector<32x1xf32>
    %238 = math.rsqrt %237 : vector<32x1xf32>
    %239 = vector.broadcast %238 : vector<32x1xf32> to vector<32x256xf32>
    %240 = arith.mulf %235, %239 : vector<32x256xf32>
    %241 = arith.mulf %226, %203 : vector<32x1xf32>
    %242 = vector.broadcast %241 : vector<32x1xf32> to vector<32x256xf32>
    %243 = arith.addf %240, %242 : vector<32x256xf32>
    %244 = vector.broadcast %202 : vector<32x1xf32> to vector<32x256xf32>
    %245 = arith.mulf %244, %243 : vector<32x256xf32>
    %246 = vector.broadcast %204 : vector<32x1xf32> to vector<32x256xf32>
    %247 = arith.addf %245, %246 : vector<32x256xf32>
    %cst_95 = arith.constant 0.000000e+00 : f32
    %248 = vector.broadcast %cst_95 : f32 to vector<32x256xf32>
    %249 = arith.maximumf %247, %248 : vector<32x256xf32>
    %250 = arith.truncf %249 : vector<32x256xf32> to vector<32x256xbf16>
    %c0_96 = arith.constant 0 : index
    %c17_97 = arith.constant 17 : index
    %251 = vector.load %arg5[%c0_96, %c17_97] : memref<32x290xbf16, #tpu.memory_space<vmem>>, vector<32x256xbf16>
    tpu.vector_store %arg5[%c0_96, %c17_97], %250 {strides = array<i32>} : memref<32x290xbf16, #tpu.memory_space<vmem>>, vector<32x256xbf16>,
    %c0_98 = arith.constant 0 : index
    %c0_99 = arith.constant 0 : index
    %252 = vector.load %arg5[%c0_98, %c0_99] : memref<32x290xbf16, #tpu.memory_space<vmem>>, vector<32x256xbf16>
    %cst_100 = arith.constant 0.000000e+00 : bf16
    %253 = vector.broadcast %cst_100 : bf16 to vector<32x256xbf16>
    %254 = vector.shape_cast %20 : vector<1x256xi1> to vector<1x256xi1>
    %255 = vector.broadcast %254 : vector<1x256xi1> to vector<32x256xi1>
    %256 = arith.select %255, %252, %253 : vector<32x256xi1>, vector<32x256xbf16>
    %c0_101 = arith.constant 0 : index
    %c1_102 = arith.constant 1 : index
    %257 = vector.load %arg5[%c0_101, %c1_102] : memref<32x290xbf16, #tpu.memory_space<vmem>>, vector<32x256xbf16>
    %c0_103 = arith.constant 0 : index
    %c2_104 = arith.constant 2 : index
    %258 = vector.load %arg5[%c0_103, %c2_104] : memref<32x290xbf16, #tpu.memory_space<vmem>>, vector<32x256xbf16>
    %cst_105 = arith.constant 0.000000e+00 : bf16
    %259 = vector.broadcast %cst_105 : bf16 to vector<32x256xbf16>
    %260 = vector.shape_cast %22 : vector<1x256xi1> to vector<1x256xi1>
    %261 = vector.broadcast %260 : vector<1x256xi1> to vector<32x256xi1>
    %262 = arith.select %261, %258, %259 : vector<32x256xi1>, vector<32x256xbf16>
    %c0_106 = arith.constant 0 : index
    %c16_107 = arith.constant 16 : index
    %263 = vector.load %arg5[%c0_106, %c16_107] : memref<32x290xbf16, #tpu.memory_space<vmem>>, vector<32x256xbf16>
    %cst_108 = arith.constant 0.000000e+00 : bf16
    %264 = vector.broadcast %cst_108 : bf16 to vector<32x256xbf16>
    %265 = vector.shape_cast %20 : vector<1x256xi1> to vector<1x256xi1>
    %266 = vector.broadcast %265 : vector<1x256xi1> to vector<32x256xi1>
    %267 = arith.select %266, %263, %264 : vector<32x256xi1>, vector<32x256xbf16>
    %c0_109 = arith.constant 0 : index
    %c17_110 = arith.constant 17 : index
    %268 = vector.load %arg5[%c0_109, %c17_110] : memref<32x290xbf16, #tpu.memory_space<vmem>>, vector<32x256xbf16>
    %c0_111 = arith.constant 0 : index
    %c18_112 = arith.constant 18 : index
    %269 = vector.load %arg5[%c0_111, %c18_112] : memref<32x290xbf16, #tpu.memory_space<vmem>>, vector<32x256xbf16>
    %cst_113 = arith.constant 0.000000e+00 : bf16
    %270 = vector.broadcast %cst_113 : bf16 to vector<32x256xbf16>
    %271 = vector.shape_cast %22 : vector<1x256xi1> to vector<1x256xi1>
    %272 = vector.broadcast %271 : vector<1x256xi1> to vector<32x256xi1>
    %273 = arith.select %272, %269, %270 : vector<32x256xi1>, vector<32x256xbf16>
    %c0_114 = arith.constant 0 : index
    %c32_115 = arith.constant 32 : index
    %274 = vector.load %arg5[%c0_114, %c32_115] : memref<32x290xbf16, #tpu.memory_space<vmem>>, vector<32x256xbf16>
    %cst_116 = arith.constant 0.000000e+00 : bf16
    %275 = vector.broadcast %cst_116 : bf16 to vector<32x256xbf16>
    %276 = vector.shape_cast %20 : vector<1x256xi1> to vector<1x256xi1>
    %277 = vector.broadcast %276 : vector<1x256xi1> to vector<32x256xi1>
    %278 = arith.select %277, %274, %275 : vector<32x256xi1>, vector<32x256xbf16>
    %c0_117 = arith.constant 0 : index
    %c33_118 = arith.constant 33 : index
    %279 = vector.load %arg5[%c0_117, %c33_118] : memref<32x290xbf16, #tpu.memory_space<vmem>>, vector<32x256xbf16>
    %c0_119 = arith.constant 0 : index
    %c34_120 = arith.constant 34 : index
    %280 = vector.load %arg5[%c0_119, %c34_120] : memref<32x290xbf16, #tpu.memory_space<vmem>>, vector<32x256xbf16>
    %cst_121 = arith.constant 0.000000e+00 : bf16
    %281 = vector.broadcast %cst_121 : bf16 to vector<32x256xbf16>
    %282 = vector.shape_cast %22 : vector<1x256xi1> to vector<1x256xi1>
    %283 = vector.broadcast %282 : vector<1x256xi1> to vector<32x256xi1>
    %284 = arith.select %283, %280, %281 : vector<32x256xi1>, vector<32x256xbf16>
    %285 = tpu.concatenate %256, %257, %262, %267, %268, %273, %278, %279, %284 in 0 : vector<32x256xbf16>, vector<32x256xbf16>, vector<32x256xbf16>, vector<32x256xbf16>, vector<32x256xbf16>, vector<32x256xbf16>, vector<32x256xbf16>, vector<32x256xbf16>, vector<32x256xbf16> -> vector<288x256xbf16>
    %c2_122 = arith.constant 2 : index
    %c0_123 = arith.constant 0 : index
    %c0_124 = arith.constant 0 : index
    %286 = vector.load %arg3[%c2_122, %c0_123, %c0_124] : memref<4x32x288xbf16, #tpu.memory_space<vmem>>, vector<1x32x288xbf16>
    %287 = vector.shape_cast %286 : vector<1x32x288xbf16> to vector<32x288xbf16>
    %cst_125 = arith.constant dense<0.000000e+00> : vector<32x256xf32>
    %288 = tpu.matmul %287, %285, %cst_125 {dimension_numbers = #tpu.dot_dimension_numbers<[1], [0], [0], [1], [0, 0, 1, 1], [], []>} : vector<32x288xbf16>, vector<288x256xbf16>, vector<32x256xf32> -> vector<32x256xf32>
    %289 = vector.extract_strided_slice %24 {offsets = [0, 3], sizes = [32, 1], strides = [1, 1]} : vector<96x4xf32> to vector<32x1xf32>
    %290 = vector.extract_strided_slice %24 {offsets = [32, 3], sizes = [32, 1], strides = [1, 1]} : vector<96x4xf32> to vector<32x1xf32>
    %291 = vector.extract_strided_slice %24 {offsets = [64, 3], sizes = [32, 1], strides = [1, 1]} : vector<96x4xf32> to vector<32x1xf32>
    %cst_126 = arith.constant dense<0.000000e+00> : vector<32xf32>
    %292 = vector.multi_reduction <add>, %288, %cst_126 [1] : vector<32x256xf32> to vector<32xf32>
    %293 = vector.shape_cast %292 : vector<32xf32> to vector<32x1xf32>
    %cst_127 = arith.constant 2.560000e+02 : f32
    %294 = vector.broadcast %cst_127 : f32 to vector<32x1xf32>
    %295 = arith.divf %293, %294 : vector<32x1xf32>
    %cst_128 = arith.constant dense<0.000000e+00> : vector<1xf32>
    %296 = vector.multi_reduction <add>, %295, %cst_128 [0] : vector<32x1xf32> to vector<1xf32>
    %297 = vector.shape_cast %296 : vector<1xf32> to vector<1x1xf32>
    %cst_129 = arith.constant 3.200000e+01 : f32
    %298 = vector.broadcast %cst_129 : f32 to vector<1x1xf32>
    %299 = arith.divf %297, %298 : vector<1x1xf32>
    %300 = vector.broadcast %299 : vector<1x1xf32> to vector<32x1xf32>
    %301 = arith.subf %295, %300 : vector<32x1xf32>
    %302 = arith.mulf %301, %301 : vector<32x1xf32>
    %cst_130 = arith.constant dense<0.000000e+00> : vector<1xf32>
    %303 = vector.multi_reduction <add>, %302, %cst_130 [0] : vector<32x1xf32> to vector<1xf32>
    %304 = vector.shape_cast %303 : vector<1xf32> to vector<1x1xf32>
    %cst_131 = arith.constant 3.100000e+01 : f32
    %305 = vector.broadcast %cst_131 : f32 to vector<1x1xf32>
    %306 = arith.divf %304, %305 : vector<1x1xf32>
    %307 = vector.broadcast %299 : vector<1x1xf32> to vector<32x1xf32>
    %308 = arith.subf %295, %307 : vector<32x1xf32>
    %cst_132 = arith.constant 9.99999974E-6 : f32
    %309 = vector.broadcast %cst_132 : f32 to vector<1x1xf32>
    %310 = arith.addf %306, %309 : vector<1x1xf32>
    %311 = math.rsqrt %310 : vector<1x1xf32>
    %312 = vector.broadcast %311 : vector<1x1xf32> to vector<32x1xf32>
    %313 = arith.mulf %308, %312 : vector<32x1xf32>
    %314 = vector.broadcast %295 : vector<32x1xf32> to vector<32x256xf32>
    %315 = arith.subf %288, %314 : vector<32x256xf32>
    %316 = arith.mulf %315, %315 : vector<32x256xf32>
    %cst_133 = arith.constant dense<0.000000e+00> : vector<32xf32>
    %317 = vector.multi_reduction <add>, %316, %cst_133 [1] : vector<32x256xf32> to vector<32xf32>
    %318 = vector.shape_cast %317 : vector<32xf32> to vector<32x1xf32>
    %cst_134 = arith.constant 2.560000e+02 : f32
    %319 = vector.broadcast %cst_134 : f32 to vector<32x1xf32>
    %320 = arith.divf %318, %319 : vector<32x1xf32>
    %321 = vector.broadcast %295 : vector<32x1xf32> to vector<32x256xf32>
    %322 = arith.subf %288, %321 : vector<32x256xf32>
    %cst_135 = arith.constant 9.99999974E-6 : f32
    %323 = vector.broadcast %cst_135 : f32 to vector<32x1xf32>
    %324 = arith.addf %320, %323 : vector<32x1xf32>
    %325 = math.rsqrt %324 : vector<32x1xf32>
    %326 = vector.broadcast %325 : vector<32x1xf32> to vector<32x256xf32>
    %327 = arith.mulf %322, %326 : vector<32x256xf32>
    %328 = arith.mulf %313, %290 : vector<32x1xf32>
    %329 = vector.broadcast %328 : vector<32x1xf32> to vector<32x256xf32>
    %330 = arith.addf %327, %329 : vector<32x256xf32>
    %331 = vector.broadcast %289 : vector<32x1xf32> to vector<32x256xf32>
    %332 = arith.mulf %331, %330 : vector<32x256xf32>
    %333 = vector.broadcast %291 : vector<32x1xf32> to vector<32x256xf32>
    %334 = arith.addf %332, %333 : vector<32x256xf32>
    %cst_136 = arith.constant 0.000000e+00 : f32
    %335 = vector.broadcast %cst_136 : f32 to vector<32x256xf32>
    %336 = arith.maximumf %334, %335 : vector<32x256xf32>
    %337 = arith.truncf %336 : vector<32x256xf32> to vector<32x256xbf16>
    %c0_137 = arith.constant 0 : index
    %c17_138 = arith.constant 17 : index
    %338 = vector.load %arg5[%c0_137, %c17_138] : memref<32x290xbf16, #tpu.memory_space<vmem>>, vector<32x256xbf16>
    tpu.vector_store %arg5[%c0_137, %c17_138], %337 {strides = array<i32>} : memref<32x290xbf16, #tpu.memory_space<vmem>>, vector<32x256xbf16>,
    %c0_139 = arith.constant 0 : index
    %c0_140 = arith.constant 0 : index
    %339 = vector.load %arg5[%c0_139, %c0_140] : memref<32x290xbf16, #tpu.memory_space<vmem>>, vector<32x256xbf16>
    %cst_141 = arith.constant 0.000000e+00 : bf16
    %340 = vector.broadcast %cst_141 : bf16 to vector<32x256xbf16>
    %341 = vector.shape_cast %20 : vector<1x256xi1> to vector<1x256xi1>
    %342 = vector.broadcast %341 : vector<1x256xi1> to vector<32x256xi1>
    %343 = arith.select %342, %339, %340 : vector<32x256xi1>, vector<32x256xbf16>
    %c0_142 = arith.constant 0 : index
    %c1_143 = arith.constant 1 : index
    %344 = vector.load %arg5[%c0_142, %c1_143] : memref<32x290xbf16, #tpu.memory_space<vmem>>, vector<32x256xbf16>
    %c0_144 = arith.constant 0 : index
    %c2_145 = arith.constant 2 : index
    %345 = vector.load %arg5[%c0_144, %c2_145] : memref<32x290xbf16, #tpu.memory_space<vmem>>, vector<32x256xbf16>
    %cst_146 = arith.constant 0.000000e+00 : bf16
    %346 = vector.broadcast %cst_146 : bf16 to vector<32x256xbf16>
    %347 = vector.shape_cast %22 : vector<1x256xi1> to vector<1x256xi1>
    %348 = vector.broadcast %347 : vector<1x256xi1> to vector<32x256xi1>
    %349 = arith.select %348, %345, %346 : vector<32x256xi1>, vector<32x256xbf16>
    %c0_147 = arith.constant 0 : index
    %c16_148 = arith.constant 16 : index
    %350 = vector.load %arg5[%c0_147, %c16_148] : memref<32x290xbf16, #tpu.memory_space<vmem>>, vector<32x256xbf16>
    %cst_149 = arith.constant 0.000000e+00 : bf16
    %351 = vector.broadcast %cst_149 : bf16 to vector<32x256xbf16>
    %352 = vector.shape_cast %20 : vector<1x256xi1> to vector<1x256xi1>
    %353 = vector.broadcast %352 : vector<1x256xi1> to vector<32x256xi1>
    %354 = arith.select %353, %350, %351 : vector<32x256xi1>, vector<32x256xbf16>
    %c0_150 = arith.constant 0 : index
    %c17_151 = arith.constant 17 : index
    %355 = vector.load %arg5[%c0_150, %c17_151] : memref<32x290xbf16, #tpu.memory_space<vmem>>, vector<32x256xbf16>
    %c0_152 = arith.constant 0 : index
    %c18_153 = arith.constant 18 : index
    %356 = vector.load %arg5[%c0_152, %c18_153] : memref<32x290xbf16, #tpu.memory_space<vmem>>, vector<32x256xbf16>
    %cst_154 = arith.constant 0.000000e+00 : bf16
    %357 = vector.broadcast %cst_154 : bf16 to vector<32x256xbf16>
    %358 = vector.shape_cast %22 : vector<1x256xi1> to vector<1x256xi1>
    %359 = vector.broadcast %358 : vector<1x256xi1> to vector<32x256xi1>
    %360 = arith.select %359, %356, %357 : vector<32x256xi1>, vector<32x256xbf16>
    %c0_155 = arith.constant 0 : index
    %c32_156 = arith.constant 32 : index
    %361 = vector.load %arg5[%c0_155, %c32_156] : memref<32x290xbf16, #tpu.memory_space<vmem>>, vector<32x256xbf16>
    %cst_157 = arith.constant 0.000000e+00 : bf16
    %362 = vector.broadcast %cst_157 : bf16 to vector<32x256xbf16>
    %363 = vector.shape_cast %20 : vector<1x256xi1> to vector<1x256xi1>
    %364 = vector.broadcast %363 : vector<1x256xi1> to vector<32x256xi1>
    %365 = arith.select %364, %361, %362 : vector<32x256xi1>, vector<32x256xbf16>
    %c0_158 = arith.constant 0 : index
    %c33_159 = arith.constant 33 : index
    %366 = vector.load %arg5[%c0_158, %c33_159] : memref<32x290xbf16, #tpu.memory_space<vmem>>, vector<32x256xbf16>
    %c0_160 = arith.constant 0 : index
    %c34_161 = arith.constant 34 : index
    %367 = vector.load %arg5[%c0_160, %c34_161] : memref<32x290xbf16, #tpu.memory_space<vmem>>, vector<32x256xbf16>
    %cst_162 = arith.constant 0.000000e+00 : bf16
    %368 = vector.broadcast %cst_162 : bf16 to vector<32x256xbf16>
    %369 = vector.shape_cast %22 : vector<1x256xi1> to vector<1x256xi1>
    %370 = vector.broadcast %369 : vector<1x256xi1> to vector<32x256xi1>
    %371 = arith.select %370, %367, %368 : vector<32x256xi1>, vector<32x256xbf16>
    %372 = tpu.concatenate %343, %344, %349, %354, %355, %360, %365, %366, %371 in 0 : vector<32x256xbf16>, vector<32x256xbf16>, vector<32x256xbf16>, vector<32x256xbf16>, vector<32x256xbf16>, vector<32x256xbf16>, vector<32x256xbf16>, vector<32x256xbf16>, vector<32x256xbf16> -> vector<288x256xbf16>
    %c3 = arith.constant 3 : index
    %c0_163 = arith.constant 0 : index
    %c0_164 = arith.constant 0 : index
    %373 = vector.load %arg3[%c3, %c0_163, %c0_164] : memref<4x32x288xbf16, #tpu.memory_space<vmem>>, vector<1x32x288xbf16>
    %374 = vector.shape_cast %373 : vector<1x32x288xbf16> to vector<32x288xbf16>
    %cst_165 = arith.constant dense<0.000000e+00> : vector<32x256xf32>
    %375 = tpu.matmul %374, %372, %cst_165 {dimension_numbers = #tpu.dot_dimension_numbers<[1], [0], [0], [1], [0, 0, 1, 1], [], []>} : vector<32x288xbf16>, vector<288x256xbf16>, vector<32x256xf32> -> vector<32x256xf32>
    %376 = arith.addf %375, %201 : vector<32x256xf32>
    %377 = vector.shape_cast %376 : vector<32x256xf32> to vector<1x32x256xf32>
    %c0_166 = arith.constant 0 : index
    %c0_167 = arith.constant 0 : index
    %c0_168 = arith.constant 0 : index
    %378 = vector.load %arg4[%c0_166, %c0_167, %c0_168] : memref<1x32x256xf32, #tpu.memory_space<vmem>>, vector<1x32x256xf32>
    tpu.vector_store %arg4[%c0_166, %c0_167, %c0_168], %377 {strides = array<i32>} : memref<1x32x256xf32, #tpu.memory_space<vmem>>, vector<1x32x256xf32>,
    return
  }
  func.func @transform_0(%arg0: i32) -> (i32, i32, i32) {
    %c0_i32 = arith.constant 0 : i32
    %c0_i32_0 = arith.constant 0 : i32
    %c0_i32_1 = arith.constant 0 : i32
    return %arg0, %c0_i32, %c0_i32_0 : i32, i32, i32
  }
  func.func @transform_1(%arg0: i32) -> (i32, i32, i32) {
    %c0_i32 = arith.constant 0 : i32
    %c0_i32_0 = arith.constant 0 : i32
    %c0_i32_1 = arith.constant 0 : i32
    return %arg0, %c0_i32, %c0_i32_0 : i32, i32, i32
  }
  func.func @transform_2(%arg0: i32) -> (i32, i32, i32) {
    %c0_i32 = arith.constant 0 : i32
    %c0_i32_0 = arith.constant 0 : i32
    %c0_i32_1 = arith.constant 0 : i32
    %c0_i32_2 = arith.constant 0 : i32
    return %c0_i32, %c0_i32_0, %c0_i32_1 : i32, i32, i32
  }
  func.func @transform_3(%arg0: i32) -> (i32, i32, i32) {
    %c0_i32 = arith.constant 0 : i32
    %c0_i32_0 = arith.constant 0 : i32
    %c0_i32_1 = arith.constant 0 : i32
    return %arg0, %c0_i32, %c0_i32_0 : i32, i32, i32
  }
}

</mosaic_0001>

<bundles_post_ra>
// kernel: cond_rcu_block.1
= control target key start
LH: loop header
LB: loop body
LE: loop exit
PB: predicated region body
PF: predicated region fallthrough
CT: control target
= control target key end

     0   :  { %s4233_s12 = smov 0   ;;  %s6237_s0 = inlined_call_operand.vmem [shape: f32[2,32,256], index: 0, kind: input, shape index: {}]   ;;  %s6238_s1 = inlined_call_operand.vmem [shape: f32[2,96,4], index: 1, kind: input, shape index: {}]   ;;  %s6239_s2 = inlined_call_operand.vmem [shape: bf16[4,32,288], index: 2, kind: input, shape index: {}]   ;;  %s6240_s3 = inlined_call_operand.vmem [shape: f32[2,32,256], index: 3, kind: output, shape index: {}]  }
   0x1 LB: > { %s3750_s13 = sadd.s32 4294967295, %s4190_s12   ;;  %p3754_p0 = scmp.ge.s32.totalorder %s4190_s12, 1  ;;  %s4190_s12 = sphi %s4233_s12, %s13_s12  }
   0x2   : > { %p147_p1 = scmp.lt.s32.totalorder %s4190_s12, 3 }
   0x4   : > { %p148_p2 = pnand %p3754_p0, %p147_p1 }
   0x5   : > { %p176_p3 = scmp.lt.s32.totalorder (!%p148_p2), %s3750_s13, 1  ;;  %s4196_s22 = smov (!%p148_p2), 16  }
   0x6   : > { %151 = sbr.rel (%p148_p2) target bundleno = 3490 (0xda2), region = 32  ;;  %s4197_s23 = smov (!%p148_p2), 2  }
   0x7   : > { %s4198_s24 = smov (!%p148_p2), 34   ;;  %s4199_s25 = smov (!%p148_p2), 32  }
   0x8   : > { %s4200_s26 = smov (!%p148_p2), 18   ;;  %s4201_s27 = smov (!%p148_p2), 17  }
   0x9   : > { %s4202_s28 = smov (!%p148_p2), 127   ;;  %s4203_s29 = smov (!%p148_p2), 95  }
   0xa   : > { %s4204_s30 = smov (!%p148_p2), 112   ;;  %s4205_s4 = smov (!%p148_p2), 126  }
   0xb   : > { %v4192_v0 = vmov 0   ;;  %s6436_s13 = smov (!%p176_p3, %s3750_s13), 1  ;;  %v4193_v18 = vmov 256.0   ;;  %v4194_v29 = vmov 32.0   ;;  %s4206_s5 = smov 110  }
   0xc   : > { %4083 = vset.pattern.permute.xlu2 %v4192_v0  ;;  %194 = vst [vmem:[#allocation2] sm:$0xff] %v4192_v0  ;;  %4084 = vset.pattern.permute.xlu0 %v4192_v0  ;;  %s3994_s14 = sshll.u32 %s6436_s13, 6  ;;  %s4052_s15 = smul.u32 96, %s6436_s13  ;;  %4094 = vrcp.f32 %v4193_v18 }
   0xd   : > { %197 = vst [vmem:[#allocation2 + $0xc] sm:$0xff] %v4192_v0  ;;  %4082 = vset.pattern.permute.xlu1 %v4192_v0  ;;  %s4257_s18 = scalar_lea.vmem %s6237_s0, %s3994_s14  ;;  %4096 = vrcp.f32 %v4194_v29  ;;  %s4207_s6 = smov 96  }
   0xe   : > { %199 = vst [vmem:[#allocation2 + $0x18] sm:$0xff] %v4192_v0  ;;  %s4262_s21 = scalar_lea.vmem %s6238_s1, %s4052_s15  ;;  %v250_v1 = vld [vmem:[%s4257_s18 + $0x20] sm:$0xff]  ;;  %v251_v2 = vld [vmem:[%s4257_s18 + $0x28] sm:$0xff]  ;;  %v252_v8 = vld [vmem:[%s4257_s18 + $0x30] sm:$0xff]  ;;  %s4208_s7 = smov 94  }
   0xf   : > { %201 = vst [vmem:[#allocation2 + $0x24] sm:$0xff] %v4192_v0  ;;  %v246_v3 = vld [vmem:[%s4257_s18] sm:$0xff]  ;;  %v260_v4 = vadd.f32 %v251_v2, %v250_v1  ;;  %v247_v5 = vld [vmem:[%s4257_s18 + $0x8] sm:$0xff]  ;;  %v237_v7 = vld [vmem:[%s4262_s21 + $0x18] sm:$0xff]  ;;  %s4209_s8 = smov 111  }
  0x10   : > { %v254_v6 = vadd.f32 %v247_v5, %v246_v3  ;;  %467 = vperm.xlu2 %4083, %v237_v7   ;;  %v253_v9 = vld [vmem:[%s4257_s18 + $0x38] sm:$0xff]  ;;  %v248_v10 = vld [vmem:[%s4257_s18 + $0x10] sm:$0xff]  ;;  %v234_v15 = vld [vmem:[%s4262_s21] sm:$0xff] }
  0x11   : > { %261 = vadd.xlane.f32.xlu1 %v260_v4  ;;  %v249_v11 = vld [vmem:[%s4257_s18 + $0x18] sm:$0xff]  ;;  %v263_v12 = vadd.f32 %v253_v9, %v252_v8  ;;  %v244_v14 = vld [vmem:[%s4262_s21 + $0x50] sm:$0xff]  ;;  %v4195_v4 = vmov 31.0  }
  0x12   : > { %255 = vadd.xlane.f32.xlu0 %v254_v6  ;;  %v257_v13 = vadd.f32 %v249_v11, %v248_v10  ;;  %v236_v16 = vld [vmem:[%s4262_s21 + $0x10] sm:$0xff]  ;;  %v245_v17 = vld [vmem:[%s4262_s21 + $0x58] sm:$0xff]  ;;  %v4095_v19 = vpop.eup %4094  ;;  %4098 = vrcp.f32 %v4195_v4 }
  0x13   : > { %v267_v20 = vmul.f32 256.0, %v4095_v19  ;;  %vm271_vm0 = vweird.f32 %v4095_v19  ;;  %v4097_v39 = vpop.eup %4096 }
  0x14   : > { %v287_v45 = vmul.f32 32.0, %v4097_v39  ;;  %vm291_vm1 = vweird.f32 %v4097_v39 }
  0x15   : > { %v268_v21 = vsub.f32 1.0, %v267_v20 }
  0x16   : > { %v288_v56 = vsub.f32 1.0, %v287_v45 }
  0x17   : > { %v269_v22 = vmul.f32 %v4095_v19, %v268_v21 }
  0x18   : > { %490 = vperm.xlu2 %4083, %v244_v14   ;;  %v289_v61 = vmul.f32 %v4097_v39, %v288_v56 }
  0x19   : > { %264 = vadd.xlane.f32.xlu1 %v263_v12  ;;  %v270_v23 = vadd.f32 %v4095_v19, %v269_v22 }
  0x1a   : > { %258 = vadd.xlane.f32.xlu0 %v257_v13 }
  0x1b   : > { %v4277_v24 = vsel %vm271_vm0, %v4095_v19, %v270_v23 }
  0x2e   : > { %452 = vperm.xlu0 %4084, %v234_v15  }
  0x32   : > { %462 = vperm.xlu1 %4082, %v236_v16  }
  0x3a   : > { %495 = vperm.xlu1 %4082, %v245_v17  }
  0x84   : > { %v262_v25 = vpop.xlane.xlu1 %261 }
  0x85   : > { %v275_v26 = vmul.f32 %v4277_v24, %v262_v25  ;;  %v256_v27 = vpop.xlane.xlu0 %255 }
  0x86   : > { %v273_v28 = vmul.f32 %v4277_v24, %v256_v27 }
  0x87   : > { %v4281_v30 = vsub.f32 %v250_v1, %v275_v26  ;;  %v4283_v31 = vsub.f32 %v251_v2, %v275_v26  ;;  %v290_v1 = vadd.f32 %v4097_v39, %v289_v61  ;;  %v242_v61 = vld [vmem:[%s4262_s21 + $0x40] sm:$0xff] }
  0x88   : > { %v4285_v32 = vsub.f32 %v246_v3, %v273_v28  ;;  %v4287_v33 = vsub.f32 %v247_v5, %v273_v28 }
  0x89   : > { %v346_v34 = vmul.f32 %v4281_v30, %v4281_v30  ;;  %v347_v35 = vmul.f32 %v4283_v31, %v4283_v31  ;;  %v4315_v5 = vsel %vm291_vm1, %v4097_v39, %v290_v1  ;;  %v4328_v1 = vpop.permute.xlu2 %467 }
  0x8a   : > { %v342_v36 = vmul.f32 %v4285_v32, %v4285_v32  ;;  %v343_v37 = vmul.f32 %v4287_v33, %v4287_v33 }
  0x8b   : > { %v356_v38 = vadd.f32 %v347_v35, %v346_v34 }
  0x8c   : > { %v265_v40 = vpop.xlane.xlu1 %264  ;;  %v350_v41 = vadd.f32 %v343_v37, %v342_v36 }
  0x8d   : > { %v276_v42 = vmul.f32 %v4277_v24, %v265_v40  ;;  %v259_v43 = vpop.xlane.xlu0 %258  ;;  %357 = vadd.xlane.f32.xlu2 %v356_v38 }
  0x8e   : > { %v274_v44 = vmul.f32 %v4277_v24, %v259_v43  ;;  %351 = vadd.xlane.f32.xlu0 %v350_v41 }
  0x8f   : > { %v4299_v46 = vsub.f32 %v252_v8, %v276_v42  ;;  %v4301_v47 = vsub.f32 %v253_v9, %v276_v42  ;;  %v4099_v8 = vpop.eup %4098 }
  0x90   : > { %v277_v48 = vadd.f32 %v274_v44, %v273_v28  ;;  %v4303_v49 = vsub.f32 %v248_v10, %v274_v44  ;;  %v4305_v50 = vsub.f32 %v249_v11, %v274_v44  ;;  %v312_v15 = vmul.f32 31.0, %v4099_v8 }
  0x91   : > { %v348_v51 = vmul.f32 %v4299_v46, %v4299_v46  ;;  %v349_v52 = vmul.f32 %v4301_v47, %v4301_v47  ;;  %vm316_vm2 = vweird.f32 %v4099_v8 }
  0x92   : > { %v278_v53 = vadd.f32 %v277_v48, %v275_v26  ;;  %v344_v54 = vmul.f32 %v4303_v49, %v4303_v49  ;;  %v345_v55 = vmul.f32 %v4305_v50, %v4305_v50  ;;  %v313_v20 = vsub.f32 1.0, %v312_v15  ;;  %v240_v48 = vld [vmem:[%s4262_s21 + $0x30] sm:$0xff] }
  0x93   : > { %v359_v57 = vadd.f32 %v349_v52, %v348_v51  ;;  %v239_v51 = vld [vmem:[%s4262_s21 + $0x28] sm:$0xff] }
  0x94   : > { %v279_v58 = vadd.f32 %v278_v53, %v276_v42  ;;  %v353_v59 = vadd.f32 %v345_v55, %v344_v54  ;;  %v314_v23 = vmul.f32 %v4099_v8, %v313_v20 }
  0x95   : > { %360 = vadd.xlane.f32.xlu2 %v359_v57 }
  0x96   : > { %v280_v60 = vrot.slane %v279_v58, 4  ;;  %354 = vadd.xlane.f32.xlu1 %v353_v59  ;;  %v315_v29 = vadd.f32 %v4099_v8, %v314_v23  ;;  %v238_v59 = vld [vmem:[%s4262_s21 + $0x20] sm:$0xff] }
  0x98   : > { %v281_v62 = vadd.f32 %v280_v60, %v279_v58  ;;  %v243_v60 = vld [vmem:[%s4262_s21 + $0x48] sm:$0xff] }
  0x9a   : > { %v282_v63 = vrot.slane %v281_v62, 2 }
  0x9c   : > { %v283_v2 = vadd.f32 %v282_v63, %v281_v62  ;;  %v235_v63 = vld [vmem:[%s4262_s21 + $0x8] sm:$0xff] }
  0x9e   : > { %v284_v3 = vrot.slane %v283_v2, 1 }
  0xa0   : > { %v285_v6 = vadd.f32 %v284_v3, %v283_v2  ;;  %v203_v2 = vlaneseq }
  0xa2   : > { %v293_v7 = vmul.f32 %v4315_v5, %v285_v6  ;;  %v204_v3 = vand.u32 127, %v203_v2 }
  0xa4   : > { %v294_v9 = vsub.f32 %v273_v28, %v293_v7  ;;  %v295_v10 = vsub.f32 %v274_v44, %v293_v7  ;;  %v296_v11 = vsub.f32 %v275_v26, %v293_v7  ;;  %v297_v14 = vsub.f32 %v276_v42, %v293_v7  ;;  %v241_v44 = vld [vmem:[%s4262_s21 + $0x38] sm:$0xff]  ;;  %v463_v15 = vpop.permute.xlu1 %462 }
  0xa5   : > { %v4318_v26 = vsel %vm316_vm2, %v4099_v8, %v315_v29  ;;  %v205_v4 = vadd.s32 128, %v204_v3  ;;  %v210_v6 = vand.u32 15, %v204_v3  ;;  %v4330_v8 = vpop.permute.xlu2 %490 }
  0xa6   : > { %v298_v12 = vmul.f32 %v294_v9, %v294_v9  ;;  %v299_v13 = vmul.f32 %v295_v10, %v295_v10  ;;  %v300_v17 = vmul.f32 %v296_v11, %v296_v11  ;;  %v301_v18 = vmul.f32 %v297_v14, %v297_v14 }
  0xa7   : > { %v217_v7 = vand.u32 15, %v205_v4  ;;  %vm230_vm6 = vcmp.ge.s32.totalorder %v210_v6, 1  ;;  %vm232_vm8 = vcmp.lt.s32.totalorder %v210_v6, 15 }
  0xa8   : > { %v302_v16 = vadd.f32 %v299_v13, %v298_v12 }
  0xa9   : > { %vm231_vm7 = vcmp.ge.s32.totalorder %v217_v7, 1  ;;  %vm233_vm9 = vcmp.lt.s32.totalorder %v217_v7, 15 }
  0xaa   : > { %v303_v19 = vadd.f32 %v302_v16, %v300_v17  ;;  %vm4332_vm10 = vmpackc.low %vm231_vm7, %vm230_vm6  ;;  %v4341_v17 = vpop.permute.xlu0 %452 }
  0xab   : > { %vm580_vm11 = vmpackc.low %vm233_vm9, %vm232_vm8  ;;  %vm195_vm8 = vcmask 273408  }
  0xac   : > { %v304_v21 = vadd.f32 %v303_v19, %v301_v18  ;;  %v4343_v18 = vpop.permute.xlu1 %495  ;;  %200 = vst.msk [vmem:[#allocation2 + $0x20] sm:$0xf] %vm195_vm8, %v4192_v0 }
  0xad   : > { %196 = vst.msk [vmem:[#allocation2 + $0x8] sm:$0xf] %vm195_vm8, %v4192_v0 }
  0xae   : > { %v305_v22 = vrot.slane %v304_v21, 4  ;;  %198 = vst.msk [vmem:[#allocation2 + $0x14] sm:$0xf] %vm195_vm8, %v4192_v0 }
  0xaf   : > { %202 = vst.msk [vmem:[#allocation2 + $0x2c] sm:$0xf] %vm195_vm8, %v4192_v0  ;;  %vm6241_vm8 = vcmask 134144  }
  0xb0   : > { %v306_v25 = vadd.f32 %v305_v22, %v304_v21 }
  0xb2   : > { %v307_v27 = vrot.slane %v306_v25, 2 }
  0xb4   : > { %v308_v34 = vadd.f32 %v307_v27, %v306_v25 }
  0xb6   : > { %v309_v28 = vrot.slane %v308_v34, 1 }
  0xb8   : > { %v310_v35 = vadd.f32 %v309_v28, %v308_v34 }
  0xba   : > { %v318_v36 = vmul.f32 %v4318_v26, %v310_v35 }
  0xbc   : > { %v319_v37 = vadd.f32 1e-05, %v318_v36 }
  0xbe   : > { %4100 = vrsqrt.f32 %v319_v37  ;;  %vm326_vm4 = vweird.f32 %v319_v37 }
  0xc4   : > { %v4101_v38 = vpop.eup %4100 }
  0xc5   : > { %v321_v39 = vmul.f32 %v4101_v38, %v319_v37  ;;  %vm327_vm3 = vweird.f32 %v4101_v38 }
  0xc6   : > { %vm328_vm5 = vmor %vm326_vm4, %vm327_vm3 }
  0xc7   : > { %v322_v40 = vmul.f32 %v4101_v38, %v321_v39 }
  0xc9   : > { %v323_v41 = vmul.f32 0.5, %v322_v40 }
  0xcb   : > { %v324_v42 = vsub.f32 1.5, %v323_v41 }
  0xcd   : > { %v325_v43 = vmul.f32 %v4101_v38, %v324_v42 }
  0xcf   : > { %v329_v45 = vsel %vm328_vm5, %v4101_v38, %v325_v43 }
  0xd0   : > { %v333_v52 = vmul.f32 %v329_v45, %v297_v14  ;;  %v332_v53 = vmul.f32 %v329_v45, %v296_v11  ;;  %v331_v54 = vmul.f32 %v329_v45, %v295_v10  ;;  %v330_v58 = vmul.f32 %v329_v45, %v294_v9 }
  0xd1   : > { %v6271_v9 = vmov 0  ;;  %v609_v10 = vsel %vm4332_vm10, 65537, %v4192_v0  ;;  %v581_v11 = vsel %vm580_vm11, 65537, %v4192_v0 }
  0xd2   : > { %v421_v55 = vmul.f32 %v333_v52, %v241_v44  ;;  %v420_v56 = vmul.f32 %v332_v53, %v240_v48  ;;  %v419_v57 = vmul.f32 %v331_v54, %v239_v51  ;;  %v418_v62 = vmul.f32 %v330_v58, %v238_v59 }
  0xd3   : > { %v6272_v9 = vsel %vm4332_vm10, 4294967295, %v6271_v9 }
  0xd4   : > { %439 = vperm.xlu0 %4084, %v421_v55   ;;  %434 = vperm.xlu2 %4083, %v420_v56  }
  0xd5   : > { %429 = vperm.xlu1 %4082, %v419_v57  }
  0xdc   : > { %485 = vperm.xlu0 %4084, %v243_v60   ;;  %424 = vperm.xlu2 %4083, %v418_v62  }
  0xdd   : > { %480 = vperm.xlu1 %4082, %v242_v61  }
  0xe4   : > { %457 = vperm.xlu2 %4083, %v235_v63   ;;  %582 = vrot.lane.b32.xlu0 %v581_v11, %s4197_s23 }
  0xe5   : > { %610 = vrot.lane.b32.xlu1 %v609_v10, %s4196_s22 }
  0xec   : > { %691 = vrot.lane.b32.xlu2 %v581_v11, %s4198_s24  ;;  %637 = vrot.lane.b32.xlu0 %v581_v11, %s4200_s26 }
  0xed   : > { %664 = vrot.lane.b32.xlu1 %v609_v10, %s4199_s25 }
 0x100   : > { %v358_v12 = vpop.xlane.xlu2 %357 }
 0x101   : > { %v364_v13 = vmul.f32 %v358_v12, %v4277_v24  ;;  %v352_v23 = vpop.xlane.xlu0 %351 }
 0x102   : > { %v362_v34 = vmul.f32 %v352_v23, %v4277_v24 }
 0x103   : > { %v368_v14 = vadd.f32 1e-05, %v364_v13 }
 0x104   : > { %v366_v37 = vadd.f32 1e-05, %v362_v34 }
 0x105   : > { %4102 = vrsqrt.f32 %v368_v14  ;;  %vm396_vm13 = vweird.f32 %v368_v14 }
 0x106   : > { %vm376_vm5 = vweird.f32 %v366_v37 }
 0x108   : > { %v361_v21 = vpop.xlane.xlu2 %360 }
 0x109   : > { %v355_v22 = vpop.xlane.xlu1 %354  ;;  %v365_v25 = vmul.f32 %v361_v21, %v4277_v24 }
 0x10a   : > { %v363_v29 = vmul.f32 %v355_v22, %v4277_v24 }
 0x10b   : > { %v4103_v16 = vpop.eup %4102  ;;  %v369_v28 = vadd.f32 1e-05, %v365_v25 }
 0x10c   : > { %v391_v19 = vmul.f32 %v4103_v16, %v368_v14  ;;  %v367_v36 = vadd.f32 1e-05, %v363_v29  ;;  %vm397_vm12 = vweird.f32 %v4103_v16 }
 0x10d   : > { %4104 = vrsqrt.f32 %v369_v28  ;;  %vm398_vm14 = vmor %vm396_vm13, %vm397_vm12  ;;  %vm406_vm0 = vweird.f32 %v369_v28  ;;  %vm6243_vm13 = vcmask 261120  }
 0x10e   : > { %v392_v20 = vmul.f32 %v4103_v16, %v391_v19  ;;  %4106 = vrsqrt.f32 %v367_v36  ;;  %vm386_vm4 = vweird.f32 %v367_v36 }
 0x10f   : > { %4108 = vrsqrt.f32 %v366_v37 }
 0x110   : > { %v393_v27 = vmul.f32 0.5, %v392_v20 }
 0x112   : > { %v394_v35 = vsub.f32 1.5, %v393_v27 }
 0x113   : > { %v4105_v40 = vpop.eup %4104 }
 0x114   : > { %v395_v38 = vmul.f32 %v4103_v16, %v394_v35  ;;  %v4107_v41 = vpop.eup %4106  ;;  %v401_v45 = vmul.f32 %v4105_v40, %v369_v28  ;;  %vm407_vm15 = vweird.f32 %v4105_v40 }
 0x115   : > { %v4109_v44 = vpop.eup %4108  ;;  %v381_v53 = vmul.f32 %v4107_v41, %v367_v36  ;;  %vm387_vm1 = vweird.f32 %v4107_v41  ;;  %vm408_vm3 = vmor %vm406_vm0, %vm407_vm15 }
 0x116   : > { %v399_v39 = vsel %vm398_vm14, %v4103_v16, %v395_v38  ;;  %v371_v54 = vmul.f32 %v4109_v44, %v366_v37  ;;  %v402_v57 = vmul.f32 %v4105_v40, %v401_v45  ;;  %vm377_vm2 = vweird.f32 %v4109_v44  ;;  %vm388_vm6 = vmor %vm386_vm4, %vm387_vm1 }
 0x117   : > { %v414_v42 = vmul.f32 %v399_v39, %v4281_v30  ;;  %v415_v43 = vmul.f32 %v399_v39, %v4283_v31  ;;  %v382_v60 = vmul.f32 %v4107_v41, %v381_v53  ;;  %vm378_vm7 = vmor %vm376_vm5, %vm377_vm2  ;;  %vm640_vm14 = vcmask 146432  }
 0x118   : > { %v372_v61 = vmul.f32 %v4109_v44, %v371_v54  ;;  %v403_v63 = vmul.f32 0.5, %v402_v57  ;;  %vm547_vm5 = vcmask 1043592  }
 0x119   : > { %v383_v2 = vmul.f32 0.5, %v382_v60 }
 0x11a   : > { %v373_v3 = vmul.f32 0.5, %v372_v61  ;;  %v404_v4 = vsub.f32 1.5, %v403_v63 }
 0x11b   : > { %v384_v6 = vsub.f32 1.5, %v383_v2 }
 0x11c   : > { %v374_v7 = vsub.f32 1.5, %v373_v3  ;;  %v405_v10 = vmul.f32 %v4105_v40, %v404_v4 }
 0x11d   : > { %v385_v11 = vmul.f32 %v4107_v41, %v384_v6 }
 0x11e   : > { %v409_v13 = vsel %vm408_vm3, %v4105_v40, %v405_v10 }
 0x11f   : > { %v389_v14 = vsel %vm388_vm6, %v4107_v41, %v385_v11  ;;  %v416_v16 = vmul.f32 %v409_v13, %v4299_v46  ;;  %v417_v19 = vmul.f32 %v409_v13, %v4301_v47  ;;  %vm548_vm6 = vcmask 1047556  }
 0x120   : > { %v412_v21 = vmul.f32 %v389_v14, %v4303_v49  ;;  %v413_v22 = vmul.f32 %v389_v14, %v4305_v50 }
 0x12e   : > { %v435_v48 = vpop.permute.xlu2 %434 }
 0x12f   : > { %v446_v51 = vadd.f32 %v435_v48, %v414_v42  ;;  %v447_v52 = vadd.f32 %v435_v48, %v415_v43 }
 0x131   : > { %v474_v55 = vmul.f32 %v463_v15, %v446_v51  ;;  %v475_v56 = vmul.f32 %v463_v15, %v447_v52 }
 0x133   : > { %v502_v58 = vadd.f32 %v4330_v8, %v474_v55  ;;  %v503_v59 = vadd.f32 %v4330_v8, %v475_v56  ;;  %v375_v8 = vmul.f32 %v4109_v44, %v374_v7 }
 0x135   : > { %v510_v62 = vmax.f32 %v502_v58, 0.0  ;;  %v511_v30 = vmax.f32 %v503_v59, 0.0  ;;  %v379_v15 = vsel %vm378_vm7, %v4109_v44, %v375_v8  ;;  %v4371_v58 = vunpack.c.l.b16 %v4192_v0 }
 0x136   : > { %v425_v12 = vpop.permute.xlu2 %424  ;;  %v410_v29 = vmul.f32 %v379_v15, %v4285_v32  ;;  %v411_v34 = vmul.f32 %v379_v15, %v4287_v33  ;;  %v4374_v59 = vunpack.c.h.b16 %v4192_v0  ;;  %vm6242_vm7 = vcmask 138240  }
 0x137   : > { %v516_v31 = vpack.c.bf16 %v511_v30, %v510_v62  ;;  %v6273_v30 = vmov 0 }
 0x138   : > { %v442_v37 = vadd.f32 %v425_v12, %v410_v29  ;;  %v443_v47 = vadd.f32 %v425_v12, %v411_v34 }
 0x139   : > { %526 = vrot.lane.b32.xlu2 %v516_v31, %s4201_s27 }
 0x13a   : > { %v470_v32 = vmul.f32 %v4341_v17, %v442_v37  ;;  %v471_v33 = vmul.f32 %v4341_v17, %v443_v47 }
 0x13e   : > { %v458_v50 = vpop.permute.xlu2 %457 }
 0x146   : > { %v440_v20 = vpop.permute.xlu0 %439  ;;  %v4368_v17 = vpop.permute.xlu2 %691 }
 0x147   : > { %v430_v23 = vpop.permute.xlu1 %429  ;;  %v448_v25 = vadd.f32 %v440_v20, %v416_v16  ;;  %v449_v27 = vadd.f32 %v440_v20, %v417_v19  ;;  %v4377_v60 = vrot.slane %v4368_v17, 4 }
 0x148   : > { %v444_v28 = vadd.f32 %v430_v23, %v412_v21  ;;  %v445_v35 = vadd.f32 %v430_v23, %v413_v22 }
 0x149   : > { %v476_v36 = vmul.f32 %v4328_v1, %v448_v25  ;;  %v477_v46 = vmul.f32 %v4328_v1, %v449_v27  ;;  %v703_v61 = vunpack.c.l.b16 %v4377_v60  ;;  %v704_v62 = vunpack.c.h.b16 %v4377_v60 }
 0x14a   : > { %v472_v39 = vmul.f32 %v458_v50, %v444_v28  ;;  %v473_v40 = vmul.f32 %v458_v50, %v445_v35 }
 0x14b   : > { %v504_v38 = vadd.f32 %v4343_v18, %v476_v36  ;;  %v505_v49 = vadd.f32 %v4343_v18, %v477_v46  ;;  %vm707_vm9 = vcmp.ne.s32.totalorder %v703_v61, %v4371_v58  ;;  %vm708_vm11 = vcmp.ne.s32.totalorder %v704_v62, %v4374_v59 }
 0x14c   : > { %vm4387_vm12 = vmpackc.low %vm708_vm11, %vm707_vm9 }
 0x14d   : > { %v512_v41 = vmax.f32 %v504_v38, 0.0  ;;  %v513_v42 = vmax.f32 %v505_v49, 0.0  ;;  %v6274_v30 = vsel %vm4387_vm12, 4294967295, %v6273_v30  ;;  %vm4414_vm9 = vmor %vm548_vm6, %vm547_vm5  ;;  %vm613_vm5 = vcmask 130048  }
 0x14e   : > { %v486_v43 = vpop.permute.xlu0 %485 }
 0x14f   : > { %v481_v44 = vpop.permute.xlu1 %480  ;;  %v500_v45 = vadd.f32 %v486_v43, %v472_v39  ;;  %v501_v48 = vadd.f32 %v486_v43, %v473_v40  ;;  %v517_v1 = vpack.c.bf16 %v513_v42, %v512_v41 }
 0x150   : > { %v498_v51 = vadd.f32 %v481_v44, %v470_v32  ;;  %v499_v52 = vadd.f32 %v481_v44, %v471_v33 }
 0x151   : > { %v508_v53 = vmax.f32 %v500_v45, 0.0  ;;  %v509_v54 = vmax.f32 %v501_v48, 0.0  ;;  %528 = vrot.lane.b32.xlu1 %v517_v1, %s4201_s27 }
 0x152   : > { %v506_v18 = vmax.f32 %v498_v51, 0.0  ;;  %v507_v55 = vmax.f32 %v499_v52, 0.0  ;;  %v6281_v52 = vmov 0 }
 0x153   : > { %v515_v56 = vpack.c.bf16 %v509_v54, %v508_v53 }
 0x154   : > { %v514_v57 = vpack.c.bf16 %v507_v55, %v506_v18 }
 0x155   : > { %524 = vrot.lane.b32.xlu2 %v515_v56, %s4201_s27 }
 0x156   : > { %522 = vrot.lane.b32.xlu0 %v514_v57, %s4201_s27  ;;  %v4393_v31 = vpop.permute.xlu0 %582 }
 0x157   : > { %v4391_v63 = vpop.permute.xlu1 %610  ;;  %v4454_v44 = vrot.slane %v4393_v31, 4 }
 0x158   : > { %v612_v49 = vrot.slane %v4391_v63, 4 }
 0x159   : > { %v594_v18 = vunpack.c.l.b16 %v4454_v44  ;;  %v595_v55 = vunpack.c.h.b16 %v4454_v44 }
 0x15a   : > { %v622_v42 = vunpack.c.l.b16 %v612_v49  ;;  %v623_v32 = vunpack.c.h.b16 %v612_v49 }
 0x15c   : > { %vm626_vm11 = vcmp.ne.s32.totalorder %v622_v42, %v4371_v58 }
 0x15e   : > { %v638_v4 = vpop.permute.xlu0 %637 }
 0x15f   : > { %v665_v2 = vpop.permute.xlu1 %664  ;;  %v4397_v6 = vrot.slane %v638_v4, 4 }
 0x160   : > { %v4395_v3 = vrot.slane %v665_v2, 4 }
 0x161   : > { %v641_v11 = vsel %vm640_vm14, %v4397_v6, %v638_v4  ;;  %vm627_vm14 = vcmp.ne.s32.totalorder %v623_v32, %v4374_v59 }
 0x162   : > { %v668_v0 = vsel %vm6243_vm13, %v4395_v3, %v665_v2  ;;  %v642_v8 = vunpack.c.l.b16 %v641_v11  ;;  %v643_v12 = vunpack.c.h.b16 %v641_v11  ;;  %v677_v11 = vunpack.c.h.b16 %v4395_v3 }
 0x163   : > { %v669_v7 = vunpack.c.l.b16 %v668_v0  ;;  %v670_v10 = vunpack.c.h.b16 %v668_v0  ;;  %vm6251_vm13 = vcmask 785408  }
 0x164   : > { %vm646_vm2 = vcmp.ne.s32.totalorder %v642_v8, %v4371_v58  ;;  %vm647_vm3 = vcmp.ne.s32.totalorder %v643_v12, %v4374_v59 }
 0x165   : > { %vm673_vm15 = vcmp.ne.s32.totalorder %v669_v7, %v4371_v58  ;;  %vm674_vm0 = vcmp.ne.s32.totalorder %v670_v10, %v4374_v59  ;;  %vm4410_vm4 = vmpackc.low %vm647_vm3, %vm646_vm2  ;;  %vm599_vm2 = vcmp.ne.s32.totalorder %v595_v55, %v4374_v59  ;;  %v6283_v7 = vmov 0 }
 0x166   : > { %vm4404_vm1 = vmpackc.low %vm674_vm0, %vm673_vm15  ;;  %vm598_vm0 = vcmp.ne.s32.totalorder %v594_v18, %v4371_v58  ;;  %v676_v10 = vunpack.c.l.b16 %v4395_v3 }
 0x167   : > { %vm4462_vm15 = vmpackc.low %vm627_vm14, %vm626_vm11  ;;  %vm681_vm11 = vcmp.ne.s32.totalorder %v677_v11, %v4374_v59 }
 0x168   : > { %v6282_v52 = vsel %vm4462_vm15, 4294967295, %v6281_v52  ;;  %vm4488_vm3 = vmpackc.low %vm599_vm2, %vm598_vm0  ;;  %vm680_vm6 = vcmp.ne.s32.totalorder %v676_v10, %v4371_v58 }
 0x169   : > { %v6284_v7 = vsel %vm4488_vm3, 4294967295, %v6283_v7  ;;  %vm4520_vm2 = vmpackc.low %vm681_vm11, %vm680_vm6 }
 0x193   : > { %v527_v15 = vpop.permute.xlu2 %526 }
 0x194   : > { %v532_v19 = vrot.slane %v527_v15, 4 }
 0x196   : > { %v537_v20 = vsel %vm6242_vm7, %v532_v19, %v527_v15  ;;  %556 = vst.msk [vmem:[#allocation2 + $0x20] sm:$0xf] %vm6241_vm8, %v532_v19  ;;  %v649_v19 = vunpack.c.l.b16 %v4397_v6 }
 0x197   : > { %555 = vst.msk [vmem:[#allocation2 + $0x18] sm:$0xff] %vm4414_vm9, %v537_v20  ;;  %v650_v20 = vunpack.c.h.b16 %v4397_v6 }
 0x198   : > { %vm653_vm14 = vcmp.ne.s32.totalorder %v649_v19, %v4371_v58 }
 0x199   : > { %vm654_vm0 = vcmp.ne.s32.totalorder %v650_v20, %v4374_v59 }
 0x19d   : > { %v3782_v36 = vld [vmem:[#allocation2 + $0x20] sm:$0xf] }
 0x19e   : > { %v3774_v43 = vld [vmem:[#allocation2 + $0x18] sm:$0xf]  ;;  %v3998_v51 = vld [vmem:[#allocation2 + $0x1c] sm:$0xf]  ;;  %v4468_v54 = vld [vmem:[#allocation2 + $0x20] sm:$0xf] }
 0x19f   : > { %v634_v57 = vsel %vm4462_vm15, %v4468_v54, 0 }
 0x1a0   : > { %v848_v2 = vunpack.c.l.b16 %v634_v57 }
 0x1af   : > { %v525_v21 = vpop.permute.xlu2 %524 }
 0x1b0   : > { %v531_v22 = vrot.slane %v525_v21, 4 }
 0x1b2   : > { %v536_v23 = vsel %vm6242_vm7, %v531_v22, %v525_v21  ;;  %554 = vst.msk [vmem:[#allocation2 + $0x14] sm:$0xf] %vm6241_vm8, %v531_v22 }
 0x1b3   : > { %553 = vst.msk [vmem:[#allocation2 + $0xc] sm:$0xff] %vm4414_vm9, %v536_v23 }
 0x1b9   : > { %v4000_v38 = vld [vmem:[#allocation2 + $0x10] sm:$0xf0] }
 0x1ba   : > { %v3764_v40 = vld [vmem:[#allocation2 + $0xc] sm:$0xf0]  ;;  %v3997_v0 = vld [vmem:[#allocation2 + $0x8] sm:$0xf0]  ;;  %v4496_v15 = vld [vmem:[#allocation2 + $0x14] sm:$0xf] }
 0x1bb   : > { %v604_v3 = vsel %vm4488_vm3, %v4496_v15, 0  ;;  %v632_v6 = vsel %vm4462_vm15, %v4496_v15, 0 }
 0x1c3   : > { %v529_v25 = vpop.permute.xlu1 %528 }
 0x1c4   : > { %v533_v27 = vrot.slane %v529_v25, 4 }
 0x1c6   : > { %v538_v29 = vsel %vm6242_vm7, %v533_v27, %v529_v25  ;;  %558 = vst.msk [vmem:[#allocation2 + $0x2c] sm:$0xf] %vm6241_vm8, %v533_v27  ;;  %v614_v27 = vsel %vm613_vm5, %v612_v49, %v4391_v63  ;;  %vm585_vm5 = vcmask 15360  }
 0x1c7   : > { %557 = vst.msk [vmem:[#allocation2 + $0x24] sm:$0xff] %vm4414_vm9, %v538_v29  ;;  %v798_v29 = vunpack.c.l.b16 %v604_v3 }
 0x1c8   : > { %v523_v34 = vpop.permute.xlu0 %522 }
 0x1c9   : > { %v530_v28 = vrot.slane %v523_v34, 4 }
 0x1cb   : > { %v535_v35 = vsel %vm6242_vm7, %v530_v28, %v523_v34  ;;  %552 = vst.msk [vmem:[#allocation2 + $0x8] sm:$0xf] %vm6241_vm8, %v530_v28  ;;  %v845_v34 = vunpack.c.l.b16 %v632_v6  ;;  %vm4526_vm8 = vmpackc.low %vm654_vm0, %vm653_vm14  ;;  %vm6247_vm7 = vcmask 1031168  }
 0x1cc   : > { %550 = vst.msk [vmem:[#allocation2] sm:$0xff] %vm4414_vm9, %v535_v35  ;;  %v6287_v35 = vmov 0 }
 0x1cd   : > { %v4001_v46 = vld [vmem:[#allocation2 + $0x28] sm:$0xf0]  ;;  %v6288_v35 = vsel %vm4526_vm8, 4294967295, %v6287_v35 }
 0x1ce   : > { %v4434_v37 = vor.u32 %v4001_v46, %v3782_v36  ;;  %v3999_v33 = vld [vmem:[#allocation2 + $0x20] sm:$0xf0]  ;;  %v3776_v48 = vld [vmem:[#allocation2 + $0x24] sm:$0xf0]  ;;  %v4458_v1 = vld [vmem:[#allocation2 + $0x2c] sm:$0xf] }
 0x1cf   : > { %v4456_v45 = vor.u32 %v3999_v33, %v3774_v43  ;;  %v4466_v53 = vor.u32 %v3998_v51, %v3776_v48  ;;  %v636_v56 = vsel %vm4462_vm15, %v4458_v1, 0  ;;  %v663_v63 = vsel %vm4526_vm8, %v4458_v1, 0  ;;  %v4551_v18 = vld [vmem:[#allocation2 + $0x24] sm:$0xff] }
 0x1d0   : > { %774 = vrot.lane.b32.xlu1 %v4434_v37, %s4202_s28  ;;  %1004 = vrot.lane.b32.xlu2 %v4434_v37, %s4203_s29  ;;  %v851_v61 = vunpack.c.l.b16 %v636_v56  ;;  %v690_v49 = vsel %vm4520_vm2, %v4458_v1, 0  ;;  %v919_v42 = vunpack.c.l.b16 %v663_v63  ;;  %v586_v33 = vsel %vm585_vm5, %v4454_v44, %v4393_v31  ;;  %v4562_v44 = vld [vmem:[#allocation2 + $0x18] sm:$0xff] }
 0x1d1   : > { %v966_v32 = vunpack.c.l.b16 %v690_v49  ;;  %v608_v51 = vsel %vm4488_vm3, %v4458_v1, 0  ;;  %v606_v31 = vsel %vm4488_vm3, %v4468_v54, 0 }
 0x1d2   : > { %v3770_v47 = vld [vmem:[#allocation2 + $0x8] sm:$0xf]  ;;  %v857_v12 = vpack.c.b16 %v851_v61, %v848_v2  ;;  %v587_v61 = vunpack.c.l.b16 %v586_v33  ;;  %v804_v2 = vunpack.c.l.b16 %v608_v51  ;;  %v801_v10 = vunpack.c.l.b16 %v606_v31 }
 0x1d3   : > { %v4441_v50 = vor.u32 %v4000_v38, %v3770_v47  ;;  %v3996_v39 = vld [vmem:[#allocation2 + $0x4] sm:$0xf]  ;;  %v3762_v62 = vld [vmem:[#allocation2] sm:$0xf]  ;;  %v4484_v4 = vld [vmem:[#allocation2 + $0x8] sm:$0xf]  ;;  %v615_v47 = vunpack.c.l.b16 %v614_v27  ;;  %v616_v38 = vunpack.c.h.b16 %v614_v27 }
 0x1d4   : > { %v4445_v41 = vor.u32 %v3996_v39, %v3764_v40  ;;  %v4494_v8 = vor.u32 %v3997_v0, %v3762_v62  ;;  %v602_v21 = vsel %vm4488_vm3, %v4484_v4, 0  ;;  %v630_v22 = vsel %vm4462_vm15, %v4484_v4, 0  ;;  %v4577_v6 = vld [vmem:[#allocation2] sm:$0xff] }
 0x1d5   : > { %768 = vrot.lane.b32.xlu0 %v4441_v50, %s4202_s28  ;;  %v795_v23 = vunpack.c.l.b16 %v602_v21  ;;  %v842_v25 = vunpack.c.l.b16 %v630_v22  ;;  %v661_v39 = vsel %vm4526_vm8, %v4468_v54, 0  ;;  %v688_v40 = vsel %vm4520_vm2, %v4468_v54, 0 }
 0x1d6   : > { %vm619_vm6 = vcmp.ne.s32.totalorder %v615_v47, %v4371_v58  ;;  %vm620_vm11 = vcmp.ne.s32.totalorder %v616_v38, %v4374_v59  ;;  %v916_v43 = vunpack.c.l.b16 %v661_v39  ;;  %v963_v48 = vunpack.c.l.b16 %v688_v40 }
 0x1d7   : > { %v807_v36 = vpack.c.b16 %v798_v29, %v795_v23  ;;  %v854_v46 = vpack.c.b16 %v845_v34, %v842_v25  ;;  %vm4555_vm14 = vmpackc.low %vm620_vm11, %vm619_vm6  ;;  %v588_v62 = vunpack.c.h.b16 %v586_v33  ;;  %vm591_vm0 = vcmp.ne.s32.totalorder %v587_v61, %v4371_v58  ;;  %v4587_v34 = vld [vmem:[#allocation2 + $0xc] sm:$0xff] }
 0x1d8   : > { %998 = vrot.lane.b32.xlu2 %v4441_v50, %s4203_s29  ;;  %766 = vrot.lane.b32.xlu1 %v4445_v41, %s4202_s28  ;;  %v925_v56 = vpack.c.b16 %v919_v42, %v916_v43  ;;  %v972_v57 = vpack.c.b16 %v966_v32, %v963_v48  ;;  %v635_v0 = vsel %vm4555_vm14, %v4551_v18, 0  ;;  %v633_v11 = vsel %vm4555_vm14, %v4562_v44, 0 }
 0x1d9   : > { %v850_v19 = vunpack.c.h.b16 %v635_v0  ;;  %vm592_vm5 = vcmp.ne.s32.totalorder %v588_v62, %v4374_v59  ;;  %v810_v20 = vpack.c.b16 %v804_v2, %v801_v10  ;;  %v846_v21 = vunpack.c.l.b16 %v633_v11 }
 0x1da   : > { %v847_v22 = vunpack.c.h.b16 %v633_v11  ;;  %v684_v3 = vsel %vm4520_vm2, %v4484_v4, 0  ;;  %vm4580_vm6 = vmpackc.low %vm592_vm5, %vm591_vm0  ;;  %v686_v29 = vsel %vm4520_vm2, %v4496_v15, 0  ;;  %v629_v47 = vsel %vm4555_vm14, %v4577_v6, 0 }
 0x1db   : > { %vm694_vm11 = vcmask 277504   ;;  %v960_v38 = vunpack.c.l.b16 %v686_v29  ;;  %v605_v63 = vsel %vm4580_vm6, %v4562_v44, 0  ;;  %v631_v49 = vsel %vm4555_vm14, %v4587_v34, 0 }
 0x1dc   : > { %v856_v27 = vpack.c.b16 %v850_v19, %v847_v22  ;;  %v841_v40 = vunpack.c.h.b16 %v629_v47  ;;  %v695_v32 = vsel %vm694_vm11, %v4377_v60, %v4368_v17  ;;  %v799_v33 = vunpack.c.l.b16 %v605_v63 }
 0x1dd   : > { %770 = vrot.lane.b32.xlu0 %v4456_v45, %s4202_s28  ;;  %v844_v43 = vunpack.c.h.b16 %v631_v49  ;;  %v840_v31 = vunpack.c.l.b16 %v629_v47  ;;  %v601_v61 = vsel %vm4580_vm6, %v4577_v6, 0  ;;  %v843_v62 = vunpack.c.l.b16 %v631_v49 }
 0x1de   : > { %v603_v17 = vsel %vm4580_vm6, %v4587_v34, 0  ;;  %v794_v60 = vunpack.c.h.b16 %v601_v61  ;;  %v793_v2 = vunpack.c.l.b16 %v601_v61 }
 0x1df   : > { %v853_v51 = vpack.c.b16 %v844_v43, %v841_v40  ;;  %v797_v10 = vunpack.c.h.b16 %v603_v17  ;;  %v796_v11 = vunpack.c.l.b16 %v603_v17  ;;  %v662_v17 = vsel %vm4410_vm4, %v4551_v18, 0 }
 0x1e0   : > { %772 = vrot.lane.b32.xlu2 %v4466_v53, %s4202_s28  ;;  %1000 = vrot.lane.b32.xlu1 %v4456_v45, %s4203_s29 }
 0x1e1   : > { %v806_v19 = vpack.c.b16 %v797_v10, %v794_v60  ;;  %v683_v10 = vsel %vm4404_vm1, %v4577_v6, 0 }
 0x1e5   : > { %1002 = vrot.lane.b32.xlu0 %v4466_v53, %s4203_s29 }
 0x1e8   : > { %764 = vrot.lane.b32.xlu2 %v4494_v8, %s4202_s28  ;;  %868 = vrot.lane.b32.xlu1 %v857_v12, %s4204_s30  ;;  %v849_v12 = vunpack.c.l.b16 %v635_v0  ;;  %v852_v0 = vpack.c.b16 %v843_v62, %v840_v31 }
 0x1ea   : > { %v855_v25 = vpack.c.b16 %v849_v12, %v846_v21  ;;  %v6293_v12 = vmov 0 }
 0x1ed   : > { %996 = vrot.lane.b32.xlu0 %v4445_v41, %s4203_s29 }
 0x1f0   : > { %815 = vrot.lane.b32.xlu2 %v807_v36, %s4205_s4  ;;  %862 = vrot.lane.b32.xlu1 %v854_v46, %s4204_s30  ;;  %v957_v36 = vunpack.c.l.b16 %v684_v3  ;;  %v607_v46 = vsel %vm4580_vm6, %v4551_v18, 0 }
 0x1f1   : > { %v802_v39 = vunpack.c.l.b16 %v607_v46  ;;  %v803_v21 = vunpack.c.h.b16 %v607_v46  ;;  %v657_v46 = vsel %vm4526_vm8, %v4484_v4, 0 }
 0x1f2   : > { %v969_v42 = vpack.c.b16 %v960_v38, %v957_v36 }
 0x1f3   : > { %v808_v48 = vpack.c.b16 %v802_v39, %v799_v33  ;;  %v910_v39 = vunpack.c.l.b16 %v657_v46  ;;  %v658_v46 = vsel %vm4410_vm4, %v4587_v34, 0 }
 0x1f5   : > { %994 = vrot.lane.b32.xlu0 %v4494_v8, %s4203_s29 }
 0x1f8   : > { %936 = vrot.lane.b32.xlu2 %v925_v56, %s4206_s5  ;;  %983 = vrot.lane.b32.xlu1 %v972_v57, %s4207_s6  ;;  %v696_v56 = vunpack.c.l.b16 %v695_v32  ;;  %v697_v57 = vunpack.c.h.b16 %v695_v32 }
 0x1fa   : > { %vm700_vm0 = vcmp.ne.s32.totalorder %v696_v56, %v4371_v58  ;;  %vm701_vm5 = vcmp.ne.s32.totalorder %v697_v57, %v4374_v59  ;;  %v800_v58 = vunpack.c.h.b16 %v605_v63  ;;  %v659_v63 = vsel %vm4526_vm8, %v4496_v15, 0 }
 0x1fb   : > { %vm4617_vm11 = vmpackc.low %vm701_vm5, %vm700_vm0  ;;  %v913_v32 = vunpack.c.l.b16 %v659_v63  ;;  %v687_v57 = vsel %vm4404_vm1, %v4562_v44, 0  ;;  %vm6245_vm0 = vcmask 777216   ;;  %vm6244_vm5 = vcmask 916480  }
 0x1fc   : > { %v6294_v12 = vsel %vm4617_vm11, 4294967295, %v6293_v12  ;;  %v716_v22 = vsel %vm4617_vm11, %v4551_v18, 0  ;;  %v714_v59 = vsel %vm4617_vm11, %v4562_v44, 0  ;;  %v710_v47 = vsel %vm4617_vm11, %v4577_v6, 0 }
 0x1fd   : > { %821 = vrot.lane.b32.xlu0 %v810_v20, %s4205_s4  ;;  %v805_v20 = vpack.c.b16 %v796_v11, %v793_v2  ;;  %v1032_v3 = vunpack.c.l.b16 %v716_v22  ;;  %v1033_v36 = vunpack.c.h.b16 %v716_v22  ;;  %v1030_v38 = vunpack.c.h.b16 %v714_v59 }
 0x1fe   : > { %v712_v49 = vsel %vm4617_vm11, %v4587_v34, 0  ;;  %v1024_v40 = vunpack.c.h.b16 %v710_v47  ;;  %v922_v43 = vpack.c.b16 %v913_v32, %v910_v39  ;;  %v962_v62 = vunpack.c.h.b16 %v687_v57 }
 0x1ff   : > { %v1027_v33 = vunpack.c.h.b16 %v712_v49  ;;  %v1026_v56 = vunpack.c.l.b16 %v712_v49  ;;  %v660_v2 = vsel %vm4410_vm4, %v4562_v44, 0 }
 0x200   : > { %864 = vrot.lane.b32.xlu2 %v855_v25, %s4204_s30  ;;  %866 = vrot.lane.b32.xlu1 %v856_v27, %s4204_s30  ;;  %v809_v25 = vpack.c.b16 %v803_v21, %v800_v58  ;;  %v1029_v27 = vunpack.c.l.b16 %v714_v59  ;;  %v915_v11 = vunpack.c.h.b16 %v660_v2  ;;  %v956_v21 = vunpack.c.h.b16 %v683_v10 }
 0x202   : > { %v1038_v29 = vpack.c.b16 %v1032_v3, %v1029_v27  ;;  %v961_v3 = vunpack.c.l.b16 %v687_v57 }
 0x205   : > { %977 = vrot.lane.b32.xlu0 %v969_v42, %s4207_s6  ;;  %v1039_v42 = vpack.c.b16 %v1033_v36, %v1030_v38  ;;  %v914_v36 = vunpack.c.l.b16 %v660_v2  ;;  %v955_v38 = vunpack.c.l.b16 %v683_v10 }
 0x208   : > { %817 = vrot.lane.b32.xlu1 %v808_v48, %s4205_s4  ;;  %860 = vrot.lane.b32.xlu2 %v853_v51, %s4204_s30  ;;  %v1036_v48 = vpack.c.b16 %v1027_v33, %v1024_v40  ;;  %v1023_v51 = vunpack.c.l.b16 %v710_v47  ;;  %v912_v40 = vunpack.c.h.b16 %v658_v46 }
 0x20a   : > { %v1035_v61 = vpack.c.b16 %v1026_v56, %v1023_v51  ;;  %v715_v56 = vsel %vm4387_vm12, %v4468_v54, 0 }
 0x20d   : > { %858 = vrot.lane.b32.xlu0 %v852_v0, %s4204_s30  ;;  %v918_v0 = vunpack.c.h.b16 %v662_v17 }
 0x20f   : > { %v924_v58 = vpack.c.b16 %v918_v0, %v915_v11 }
 0x210   : > { %813 = vrot.lane.b32.xlu1 %v806_v19, %s4205_s4  ;;  %811 = vrot.lane.b32.xlu2 %v805_v20, %s4205_s4  ;;  %v685_v19 = vsel %vm4404_vm1, %v4587_v34, 0 }
 0x211   : > { %v959_v59 = vunpack.c.h.b16 %v685_v19  ;;  %v958_v39 = vunpack.c.l.b16 %v685_v19 }
 0x215   : > { %819 = vrot.lane.b32.xlu0 %v809_v25, %s4205_s4  ;;  %v968_v25 = vpack.c.b16 %v959_v59, %v956_v21 }
 0x218   : > { %1047 = vrot.lane.b32.xlu1 %v1038_v29, %s4208_s7  ;;  %887 = vrot.lane.b32.xlu2 %v4466_v53, %s4209_s8  ;;  %v689_v53 = vsel %vm4404_vm1, %v4551_v18, 0  ;;  %v917_v29 = vunpack.c.l.b16 %v662_v17 }
 0x219   : > { %v965_v31 = vunpack.c.h.b16 %v689_v53  ;;  %v964_v22 = vunpack.c.l.b16 %v689_v53  ;;  %v717_v53 = vsel %vm4387_vm12, %v4458_v1, 0  ;;  %v711_v1 = vsel %vm4387_vm12, %v4484_v4, 0 }
 0x21a   : > { %v923_v49 = vpack.c.b16 %v917_v29, %v914_v36  ;;  %v1025_v54 = vunpack.c.l.b16 %v711_v1 }
 0x21b   : > { %v971_v60 = vpack.c.b16 %v965_v31, %v962_v62  ;;  %v970_v27 = vpack.c.b16 %v964_v22, %v961_v3  ;;  %v1031_v62 = vunpack.c.l.b16 %v715_v56 }
 0x21d   : > { %1049 = vrot.lane.b32.xlu0 %v1039_v42, %s4208_s7  ;;  %v967_v42 = vpack.c.b16 %v958_v39, %v955_v38 }
 0x220   : > { %930 = vrot.lane.b32.xlu1 %v922_v43, %s4206_s5  ;;  %1043 = vrot.lane.b32.xlu2 %v1036_v48, %s4208_s7  ;;  %v911_v43 = vunpack.c.l.b16 %v658_v46 }
 0x225   : > { %1041 = vrot.lane.b32.xlu0 %v1035_v61, %s4208_s7  ;;  %v1034_v61 = vunpack.c.l.b16 %v717_v53 }
 0x228   : > { %889 = vrot.lane.b32.xlu1 %v4434_v37, %s4209_s8  ;;  %981 = vrot.lane.b32.xlu2 %v971_v60, %s4207_s6  ;;  %v656_v37 = vsel %vm4410_vm4, %v4577_v6, 0 }
 0x229   : > { %v909_v63 = vunpack.c.h.b16 %v656_v37  ;;  %v908_v33 = vunpack.c.l.b16 %v656_v37 }
 0x22a   : > { %v4670_v20 = vpop.permute.xlu2 %1004 }
 0x22b   : > { %v921_v32 = vpack.c.b16 %v912_v40, %v909_v63  ;;  %v920_v51 = vpack.c.b16 %v911_v43, %v908_v33 }
 0x22d   : > { %934 = vrot.lane.b32.xlu0 %v924_v58, %s4206_s5 }
 0x230   : > { %975 = vrot.lane.b32.xlu1 %v968_v25, %s4207_s6  ;;  %979 = vrot.lane.b32.xlu2 %v970_v27, %s4207_s6 }
 0x232   : > { %v4681_v47 = vpop.permute.xlu2 %998 }
 0x235   : > { %932 = vrot.lane.b32.xlu0 %v923_v49, %s4206_s5 }
 0x238   : > { %973 = vrot.lane.b32.xlu1 %v967_v42, %s4207_s6  ;;  %928 = vrot.lane.b32.xlu2 %v921_v32, %s4206_s5 }
 0x23a   : > { %v4686_v48 = vpop.permute.xlu2 %772 }
 0x23d   : > { %926 = vrot.lane.b32.xlu0 %v920_v51, %s4206_s5 }
 0x240   : > { %883 = vrot.lane.b32.xlu1 %v4441_v50, %s4209_s8  ;;  %881 = vrot.lane.b32.xlu2 %v4445_v41, %s4209_s8  ;;  %v1040_v50 = vpack.c.b16 %v1034_v61, %v1031_v62  ;;  %v713_v41 = vsel %vm4387_vm12, %v4496_v15, 0 }
 0x241   : > { %v1028_v60 = vunpack.c.l.b16 %v713_v41 }
 0x242   : > { %v4699_v57 = vpop.permute.xlu1 %774  ;;  %v4701_v31 = vpop.permute.xlu2 %764 }
 0x243   : > { %v1037_v4 = vpack.c.b16 %v1028_v60, %v1025_v54 }
 0x245   : > { %885 = vrot.lane.b32.xlu0 %v4456_v45, %s4209_s8 }
 0x247   : > { %v4711_v17 = vpop.permute.xlu0 %768 }
 0x248   : > { %879 = vrot.lane.b32.xlu1 %v4494_v8, %s4209_s8  ;;  %1051 = vrot.lane.b32.xlu2 %v1040_v50, %s4208_s7 }
 0x24a   : > { %v816_v2 = vpop.permute.xlu2 %815  ;;  %v4716_v0 = vpop.permute.xlu1 %766 }
 0x24d   : > { %1045 = vrot.lane.b32.xlu0 %v1037_v4, %s4208_s7 }
 0x24f   : > { %v771_v45 = vpop.permute.xlu0 %770 }
 0x252   : > { %v4719_v10 = vpop.permute.xlu2 %936  ;;  %v1001_v11 = vpop.permute.xlu1 %1000 }
 0x257   : > { %v4721_v15 = vpop.permute.xlu0 %1002 }
 0x258   : > { %v1009_v19 = vsel %vm6245_vm0, %v1001_v11, %v4721_v15 }
 0x259   : > { %1126 = vmatpush.bf16.msra.mxu1 %v1009_v19  ;;  %v571_v19 = vsel %vm4332_vm10, %v4551_v18, 0 }
 0x25a   : > { %v865_v8 = vpop.permute.xlu2 %864  ;;  %v869_v21 = vpop.permute.xlu1 %868 }
 0x25f   : > { %v4725_v22 = vpop.permute.xlu0 %996 }
 0x262   : > { %v863_v58 = vpop.permute.xlu1 %862  ;;  %v861_v59 = vpop.permute.xlu2 %860 }
 0x263   : > { %v872_v39 = vsel %vm6244_vm5, %v861_v59, %v863_v58  ;;  %v728_v58 = vunpack.c.l.b16 %v571_v19 }
 0x267   : > { %v995_v3 = vpop.permute.xlu0 %994 }
 0x268   : > { %v1007_v25 = vsel %vm6245_vm0, %v995_v3, %v4725_v22  ;;  %vm6246_vm0 = vcmask 1039360   ;;  %v568_v3 = vsel %vm4332_vm10, %v4577_v6, 0  ;;  %v569_v6 = vsel %vm4332_vm10, %v4587_v34, 0  ;;  %v3786_v34 = vld [vmem:[%s6239_s2] sm:$0xf] }
 0x269   : > { %1127 = vmatpush.bf16.msra.mxu1 %v1007_v25  ;;  %v779_v4 = vsel %vm6246_vm0, %v771_v45, %v4686_v48  ;;  %v570_v45 = vsel %vm4332_vm10, %v4562_v44, 0  ;;  %v777_v18 = vsel %vm6246_vm0, %v4701_v31, %v4716_v0  ;;  %v3794_v44 = vld [vmem:[%s6239_s2 + $0x8] sm:$0xf]  ;;  %v4004_v25 = vld [vmem:[%s6239_s2 + $0x10] sm:$0xf0] }
 0x26a   : > { %v4729_v27 = vpop.permute.xlu1 %983  ;;  %v812_v29 = vpop.permute.xlu2 %811  ;;  %v727_v31 = vunpack.c.h.b16 %v570_v45 }
 0x26f   : > { %v822_v37 = vpop.permute.xlu0 %821 }
 0x272   : > { %v867_v36 = vpop.permute.xlu1 %866  ;;  %v4731_v46 = vpop.permute.xlu2 %887 }
 0x273   : > { %v873_v38 = vsel %vm6244_vm5, %v865_v8, %v867_v36  ;;  %v874_v63 = vsel %vm6244_vm5, %v867_v36, %v869_v21  ;;  %v722_v36 = vunpack.c.l.b16 %v568_v3 }
 0x274   : > { %1107 = vmatpush.bf16.msra.mxu0 %v873_v38  ;;  %1164 = vmatpush.bf16.msra.mxu3 %v874_v63  ;;  %v4785_v38 = vor.u32 %v4004_v25, %v3794_v44  ;;  %v723_v63 = vunpack.c.h.b16 %v568_v3  ;;  %v3788_v44 = vld [vmem:[%s6239_s2 + $0xc] sm:$0xf0] }
 0x277   : > { %v4735_v49 = vpop.permute.xlu0 %977 }
 0x278   : > { %1165 = vmatpush.bf16.msra.mxu3 %v872_v39 }
 0x27a   : > { %v818_v40 = vpop.permute.xlu1 %817  ;;  %v4738_v42 = vpop.permute.xlu2 %1043 }
 0x27f   : > { %v859_v32 = vpop.permute.xlu0 %858 }
 0x280   : > { %v871_v33 = vsel %vm6244_vm5, %v859_v32, %v861_v59  ;;  %vm6248_vm5 = vcmask 769024   ;;  %v729_v59 = vunpack.c.h.b16 %v571_v19  ;;  %v4003_v32 = vld [vmem:[%s6239_s2 + $0x8] sm:$0xf0] }
 0x281   : > { %1108 = vmatpush.bf16.msra.mxu0 %v871_v33 }
 0x282   : > { %v814_v43 = vpop.permute.xlu1 %813  ;;  %v4741_v51 = vpop.permute.xlu2 %981 }
 0x283   : > { %v824_v41 = vsel %vm6247_vm7, %v812_v29, %v814_v43  ;;  %v825_v54 = vsel %vm6247_vm7, %v814_v43, %v816_v2  ;;  %v780_v2 = vsel %vm6246_vm0, %v4686_v48, %v4699_v57  ;;  %v778_v48 = vsel %vm6246_vm0, %v4716_v0, %v4711_v17 }
 0x284   : > { %v726_v57 = vunpack.c.l.b16 %v570_v45  ;;  %v733_v0 = vpack.c.b16 %v729_v59, %v727_v31  ;;  %vm6295_vm0 = vcmask 777216  }
 0x285   : > { %v1010_v39 = vsel %vm6295_vm0, %v4721_v15, %v4670_v20  ;;  %v3787_v20 = vor.u32 %v4003_v32, %v3786_v34  ;;  %v1008_v15 = vsel %vm6295_vm0, %v4725_v22, %v4681_v47  ;;  %v3806_v47 = vld [vmem:[%s6239_s2 + $0x20] sm:$0xf]  ;;  %v4007_v22 = vld [vmem:[%s6239_s2 + $0x28] sm:$0xf0]  ;;  %vm6297_vm0 = vcmask 261120  }
 0x287   : > { %v820_v53 = vpop.permute.xlu0 %819 }
 0x288   : > { %v826_v56 = vsel %vm6247_vm7, %v818_v40, %v820_v53  ;;  %v827_v61 = vsel %vm6247_vm7, %v820_v53, %v822_v37  ;;  %v732_v37 = vpack.c.b16 %v728_v58, %v726_v57  ;;  %v724_v40 = vunpack.c.l.b16 %v569_v6 }
 0x289   : > { %1109 = vmatpush.bf16.msra.mxu0 %v826_v56  ;;  %1166 = vmatpush.bf16.msra.mxu3 %v827_v61  ;;  %v725_v53 = vunpack.c.h.b16 %v569_v6  ;;  %vm6296_vm7 = vcmask 261120  }
 0x28a   : > { %v1048_v62 = vpop.permute.xlu1 %1047  ;;  %v980_v1 = vpop.permute.xlu2 %979  ;;  %v730_v56 = vpack.c.b16 %v724_v40, %v722_v36 }
 0x28b   : > { %v988_v50 = vsel %vm6251_vm13, %v980_v1, %v4741_v51  ;;  %v731_v61 = vpack.c.b16 %v725_v53, %v723_v63  ;;  %v989_v1 = vsel %vm6251_vm13, %v4741_v51, %v4729_v27  ;;  %v3807_v51 = vor.u32 %v4007_v22, %v3806_v47 }
 0x28c   : > { %1128 = vmatpush.bf16.msra.mxu1 %v988_v50  ;;  %v4210_v53 = vmov 1  }
 0x28d   : > { %1110 = vmatpush.bf16.msra.mxu0 %v824_v41  ;;  %1167 = vmatpush.bf16.msra.mxu3 %v825_v54 }
 0x28e   : > { %4086 = vset.pattern.permute.xlu2 %v4210_v53  ;;  %4087 = vset.pattern.permute.xlu0 %v4210_v53 }
 0x28f   : > { %v1050_v60 = vpop.permute.xlu0 %1049  ;;  %4085 = vset.pattern.permute.xlu1 %v4210_v53 }
 0x290   : > { %v1056_v11 = vsel %vm6248_vm5, %v1048_v62, %v1050_v60 }
 0x291   : > { %1111 = vmatpush.bf16.msra.mxu0 %v779_v4  ;;  %1151 = vmatpush.bf16.msra.mxu2 %v1056_v11 }
 0x292   : > { %1168 = vmatpush.bf16.msra.mxu3 %v780_v2  ;;  %v4758_v8 = vpop.permute.xlu1 %930  ;;  %v4760_v21 = vpop.permute.xlu2 %928 }
 0x295   : > { %1112 = vmatpush.bf16.msra.mxu0 %v777_v18 }
 0x296   : > { %1169 = vmatpush.bf16.msra.mxu3 %v778_v48 }
 0x297   : > { %v1042_v29 = vpop.permute.xlu0 %1041 }
 0x298   : > { %v1054_v17 = vsel %vm6248_vm5, %v1042_v29, %v4738_v42 }
 0x299   : > { %1113 = vmatpush.bf16.msra.mxu0 %v732_v37  ;;  %1152 = vmatpush.bf16.msra.mxu2 %v1054_v17  ;;  %v3800_v17 = vld [vmem:[%s6239_s2 + $0x24] sm:$0xf0] }
 0x29a   : > { %1170 = vmatpush.bf16.msra.mxu3 %v733_v0  ;;  %v890_v33 = vpop.permute.xlu1 %889  ;;  %v882_v43 = vpop.permute.xlu2 %881 }
 0x29c   : > { %3808 = vmatmul.msk.bf16.vlgmr.msra.gmra.mxu2 %vm6296_vm7, %v4785_v38  ;;  %vm6249_vm7 = vcmask 900096  }
 0x29d   : > { %1183 = vmatpush.bf16.msrb.mxu2 %v1010_v39  ;;  %1114 = vmatpush.bf16.msra.mxu0 %v730_v56 }
 0x29e   : > { %1171 = vmatpush.bf16.msra.mxu3 %v731_v61 }
 0x29f   : > { %v935_v62 = vpop.permute.xlu0 %934 }
 0x2a0   : > { %1115 = vmatmul.bf16.vlgmr.msra.gmra.mxu0 %v3787_v20  ;;  %v942_v11 = vsel %vm6249_vm7, %v935_v62, %v4719_v10  ;;  %v940_v10 = vsel %vm6249_vm7, %v4760_v21, %v4758_v8  ;;  %v4002_v8 = vld [vmem:[%s6239_s2 + $0x4] sm:$0xf] }
 0x2a1   : > { %1184 = vmatpush.bf16.msrb.mxu2 %v1008_v15  ;;  %1172 = vmatmul.bf16.vlgmr.msra.gmra.mxu3 %v3787_v20  ;;  %v3791_v6 = vor.u32 %v4002_v8, %v3788_v44 }
 0x2a2   : > { %v976_v50 = vpop.permute.xlu1 %975  ;;  %v1052_v41 = vpop.permute.xlu2 %1051 }
 0x2a3   : > { %v1057_v54 = vsel %vm6248_vm5, %v1050_v60, %v1052_v41  ;;  %v987_v4 = vsel %vm6251_vm13, %v976_v50, %v4735_v49  ;;  %v3798_v49 = vld [vmem:[%s6239_s2 + $0x18] sm:$0xf]  ;;  %v4006_v60 = vld [vmem:[%s6239_s2 + $0x20] sm:$0xf0]  ;;  %vm6250_vm5 = vcmask 908288  }
 0x2a4   : > { %1208 = vmatpush.bf16.msrb.mxu0 %v1057_v54  ;;  %v3799_v45 = vor.u32 %v4006_v60, %v3798_v49  ;;  %v895_v59 = vsel %vm6250_vm5, %v4731_v46, %v890_v33 }
 0x2a5   : > { %1185 = vmatpush.bf16.msrb.mxu2 %v989_v1 }
 0x2a7   : > { %v933_v27 = vpop.permute.xlu0 %932 }
 0x2a8   : > { %v941_v18 = vsel %vm6249_vm7, %v933_v27, %v935_v62 }
 0x2a9   : > { %1186 = vmatpush.bf16.msrb.mxu2 %v987_v4 }
 0x2aa   : > { %v974_v19 = vpop.permute.xlu1 %973 }
 0x2ab   : > { %v986_v2 = vsel %vm6251_vm13, %v974_v19, %v976_v50 }
 0x2ac   : > { %3809 = vmatmul.msk.bf16.gmra.mxu2 %vm6297_vm0, %v3807_v51  ;;  %1129 = vmatpush.bf16.msra.mxu1 %v986_v2  ;;  %vm6298_vm0 = vcmask 769024  }
 0x2ad   : > { %1187 = vmatpush.bf16.msrb.mxu2 %v942_v11 }
 0x2af   : > { %v927_v58 = vpop.permute.xlu0 %926 }
 0x2b0   : > { %1120 = vmatmul.bf16.gmra.mxu0 %v3799_v45  ;;  %1130 = vmatpush.bf16.msra.mxu1 %v941_v18  ;;  %v939_v48 = vsel %vm6249_vm7, %v927_v58, %v4760_v21  ;;  %vm6299_vm7 = vcmask 261120  }
 0x2b1   : > { %1188 = vmatpush.bf16.msrb.mxu2 %v940_v10  ;;  %1177 = vmatmul.bf16.gmra.mxu3 %v3799_v45 }
 0x2b2   : > { %v884_v3 = vpop.permute.xlu1 %883 }
 0x2b3   : > { %v893_v57 = vsel %vm6250_vm5, %v882_v43, %v884_v3 }
 0x2b4   : > { %1131 = vmatpush.bf16.msra.mxu1 %v939_v48 }
 0x2b5   : > { %1189 = vmatpush.bf16.msrb.mxu2 %v895_v59 }
 0x2b7   : > { %v886_v25 = vpop.permute.xlu0 %885 }
 0x2b8   : > { %v894_v31 = vsel %vm6250_vm5, %v886_v25, %v4731_v46  ;;  %v4005_v46 = vld [vmem:[%s6239_s2 + $0x1c] sm:$0xf] }
 0x2b9   : > { %1190 = vmatpush.bf16.msrb.mxu2 %v893_v57  ;;  %1132 = vmatpush.bf16.msra.mxu1 %v894_v31  ;;  %v3803_v0 = vor.u32 %v4005_v46, %v3800_v17  ;;  %v4140_v25 = vld [vmem:[%s4262_s21 + $0x18] sm:$0xff]  ;;  %v4141_v31 = vld [vmem:[%s4262_s21 + $0x10] sm:$0xff] }
 0x2ba   : > { %v880_v29 = vpop.permute.xlu1 %879 }
 0x2bb   : > { %v892_v21 = vsel %vm6250_vm5, %v880_v29, %v882_v43  ;;  %vm6300_vm5 = vmmov %vm6299_vm7  ;;  %v4143_v29 = vld [vmem:[%s4262_s21 + $0x50] sm:$0xff] }
 0x2bc   : > { %1191 = vmatmul.bf16.vlgmr.msrb.gmra.mxu2 %v3791_v6 }
 0x2bd   : > { %1133 = vmatpush.bf16.msra.mxu1 %v892_v21 }
 0x2bf   : > { %v1046_v37 = vpop.permute.xlu0 %1045 }
 0x2c0   : > { %1134 = vmatmul.bf16.vlgmr.msra.gmra.mxu1 %v3791_v6  ;;  %v1055_v36 = vsel %vm6298_vm0, %v4738_v42, %v1046_v37  ;;  %v4142_v6 = vld [vmem:[%s4262_s21] sm:$0xff] }
 0x2c1   : > { %1209 = vmatpush.bf16.msrb.mxu0 %v1055_v36 }
 0x2c4   : > { %3810 = vmatmul.msk.bf16.vlgmr.msrb.gmra.mxu0 %vm6299_vm7, %v4785_v38 }
 0x2cc   : > { %1196 = vmatmul.bf16.gmra.mxu2 %v3803_v0 }
 0x2d0   : > { %1139 = vmatmul.bf16.gmra.mxu1 %v3803_v0 }
 0x2d4   : > { %3811 = vmatmul.msk.bf16.gmra.mxu0 %vm6300_vm5, %v3807_v51 }
 0x31d   : > { %v1116_v63 = vpop.f32.mrf.mxu0 }
 0x31f   : > { %v1154_v39 = vpop.f32.mrf.mxu2 }
 0x324   : > { %v1173_v43 = vpop.f32.mrf.mxu3 }
 0x325   : > { %v1118_v42 = vpop.f32.mrf.mxu0 }
 0x327   : > { %v1156_v40 = vpop.f32.mrf.mxu2 }
 0x32c   : > { %v1175_v54 = vpop.f32.mrf.mxu3 }
 0x32d   : > { %v1121_v34 = vpop.f32.mrf.mxu0 }
 0x32f   : > { %v1159_v32 = vpop.f32.mrf.mxu2 }
 0x334   : > { %v1178_v2 = vpop.f32.mrf.mxu3 }
 0x335   : > { %v1123_v33 = vpop.f32.mrf.mxu0 }
 0x337   : > { %v1161_v38 = vpop.f32.mrf.mxu2 }
 0x33c   : > { %v1180_v21 = vpop.f32.mrf.mxu3 }
 0x33d   : > { %v1135_v56 = vpop.f32.mrf.mxu1 }
 0x33e   : > { %v1136_v61 = vadd.f32 %v1135_v56, %v1116_v63  ;;  %v4144_v63 = vld [vmem:[%s4262_s21 + $0x58] sm:$0xff] }
 0x33f   : > { %v1192_v20 = vpop.f32.mrf.mxu2 }
 0x340   : > { %v1193_v15 = vadd.f32 %v1192_v20, %v1173_v43  ;;  %v1155_v1 = vadd.f32 %v1154_v39, %v1136_v61 }
 0x341   : > { %v1211_v62 = vpop.f32.mrf.mxu0 }
 0x342   : > { %v1212_v50 = vadd.f32 %v1211_v62, %v1193_v15 }
 0x344   : > { %v1221_v41 = vadd.f32 %v1212_v50, %v1155_v1 }
 0x345   : > { %v1137_v4 = vpop.f32.mrf.mxu1 }
 0x346   : > { %v1138_v47 = vadd.f32 %v1137_v4, %v1118_v42  ;;  %1222 = vadd.xlane.f32.xlu2 %v1221_v41 }
 0x347   : > { %v1194_v22 = vpop.f32.mrf.mxu2 }
 0x348   : > { %v1195_v27 = vadd.f32 %v1194_v22, %v1175_v54  ;;  %v1157_v11 = vadd.f32 %v1156_v40, %v1138_v47 }
 0x349   : > { %v1213_v51 = vpop.f32.mrf.mxu0 }
 0x34a   : > { %v1214_v49 = vadd.f32 %v1213_v51, %v1195_v27 }
 0x34c   : > { %v1224_v60 = vadd.f32 %v1214_v49, %v1157_v11 }
 0x34d   : > { %v1140_v19 = vpop.f32.mrf.mxu1 }
 0x34e   : > { %v1141_v45 = vadd.f32 %v1140_v19, %v1121_v34  ;;  %1225 = vadd.xlane.f32.xlu1 %v1224_v60 }
 0x34f   : > { %v1197_v10 = vpop.f32.mrf.mxu2 }
 0x350   : > { %v1198_v58 = vadd.f32 %v1197_v10, %v1178_v2  ;;  %v1160_v59 = vadd.f32 %v1159_v32, %v1141_v45 }
 0x351   : > { %v1216_v18 = vpop.f32.mrf.mxu0 }
 0x352   : > { %v1217_v3 = vadd.f32 %v1216_v18, %v1198_v58 }
 0x354   : > { %v1227_v48 = vadd.f32 %v1217_v3, %v1160_v59 }
 0x355   : > { %v1142_v57 = vpop.f32.mrf.mxu1 }
 0x356   : > { %v1143_v8 = vadd.f32 %v1142_v57, %v1123_v33  ;;  %1228 = vadd.xlane.f32.xlu0 %v1227_v48 }
 0x357   : > { %v1199_v37 = vpop.f32.mrf.mxu2 }
 0x358   : > { %v1162_v44 = vadd.f32 %v1161_v38, %v1143_v8  ;;  %v1200_v36 = vadd.f32 %v1199_v37, %v1180_v21 }
 0x359   : > { %v1218_v46 = vpop.f32.mrf.mxu0 }
 0x35a   : > { %v1219_v17 = vadd.f32 %v1218_v46, %v1200_v36 }
 0x35c   : > { %v1230_v0 = vadd.f32 %v1219_v17, %v1162_v44 }
 0x35e   : > { %1409 = vperm.xlu2 %4086, %v4140_v25  }
 0x367   : > { %1405 = vperm.xlu1 %4085, %v4141_v31  }
 0x36a   : > { %1397 = vperm.xlu0 %4087, %v4142_v6  }
 0x36f   : > { %1429 = vperm.xlu1 %4085, %v4143_v29  }
 0x387   : > { %1231 = vadd.xlane.f32.xlu2 %v1230_v0 }
 0x39f   : > { %1433 = vperm.xlu2 %4086, %v4144_v63  }
 0x3b9   : > { %v1223_v39 = vpop.xlane.xlu2 %1222 }
 0x3ba   : > { %v1233_v42 = vmul.f32 %v1223_v39, %v4277_v24 }
 0x3bc   : > { %v4858_v40 = vsub.f32 %v1155_v1, %v1233_v42  ;;  %v4860_v34 = vsub.f32 %v1212_v50, %v1233_v42 }
 0x3be   : > { %v1288_v32 = vmul.f32 %v4858_v40, %v4858_v40  ;;  %v1289_v38 = vmul.f32 %v4860_v34, %v4860_v34 }
 0x3c0   : > { %v1296_v33 = vadd.f32 %v1289_v38, %v1288_v32 }
 0x3c1   : > { %v1226_v43 = vpop.xlane.xlu1 %1225  ;;  %v4884_v27 = vpop.permute.xlu2 %1409 }
 0x3c2   : > { %v1234_v53 = vmul.f32 %v1226_v43, %v4277_v24  ;;  %1297 = vadd.xlane.f32.xlu0 %v1296_v33 }
 0x3c4   : > { %v4867_v56 = vsub.f32 %v1157_v11, %v1234_v53  ;;  %v4869_v61 = vsub.f32 %v1214_v49, %v1234_v53  ;;  %v1237_v51 = vadd.f32 %v1234_v53, %v1233_v42 }
 0x3c6   : > { %v1290_v20 = vmul.f32 %v4867_v56, %v4867_v56  ;;  %v1291_v15 = vmul.f32 %v4869_v61, %v4869_v61 }
 0x3c8   : > { %v1299_v62 = vadd.f32 %v1291_v15, %v1290_v20 }
 0x3c9   : > { %v1229_v1 = vpop.xlane.xlu0 %1228 }
 0x3ca   : > { %v1235_v50 = vmul.f32 %v1229_v1, %v4277_v24  ;;  %1300 = vadd.xlane.f32.xlu1 %v1299_v62 }
 0x3cc   : > { %v4876_v41 = vsub.f32 %v1160_v59, %v1235_v50  ;;  %v4878_v54 = vsub.f32 %v1217_v3, %v1235_v50  ;;  %v1238_v49 = vadd.f32 %v1237_v51, %v1235_v50 }
 0x3ce   : > { %v1292_v4 = vmul.f32 %v4876_v41, %v4876_v41  ;;  %v1293_v47 = vmul.f32 %v4878_v54, %v4878_v54 }
 0x3d0   : > { %v1302_v22 = vadd.f32 %v1293_v47, %v1292_v4 }
 0x3d2   : > { %1303 = vadd.xlane.f32.xlu1 %v1302_v22 }
 0x3fa   : > { %v1232_v11 = vpop.xlane.xlu2 %1231 }
 0x3fb   : > { %v1236_v60 = vmul.f32 %v1232_v11, %v4277_v24 }
 0x3fd   : > { %v1239_v19 = vadd.f32 %v1238_v49, %v1236_v60  ;;  %v4887_v2 = vsub.f32 %v1162_v44, %v1236_v60  ;;  %v4889_v45 = vsub.f32 %v1219_v17, %v1236_v60 }
 0x3ff   : > { %v1240_v10 = vrot.slane %v1239_v19, 4  ;;  %v1294_v58 = vmul.f32 %v4887_v2, %v4887_v2  ;;  %v1295_v18 = vmul.f32 %v4889_v45, %v4889_v45 }
 0x401   : > { %v1241_v59 = vadd.f32 %v1240_v10, %v1239_v19  ;;  %v1305_v3 = vadd.f32 %v1295_v18, %v1294_v58  ;;  %v4145_v19 = vld [vmem:[%s4262_s21 + $0x38] sm:$0xff]  ;;  %v4146_v58 = vld [vmem:[%s4262_s21 + $0x30] sm:$0xff] }
 0x403   : > { %v1242_v48 = vrot.slane %v1241_v59, 2  ;;  %1306 = vadd.xlane.f32.xlu2 %v1305_v3 }
 0x405   : > { %v1243_v57 = vadd.f32 %v1242_v48, %v1241_v59  ;;  %v4147_v59 = vld [vmem:[%s4262_s21 + $0x20] sm:$0xff] }
 0x407   : > { %v1244_v8 = vrot.slane %v1243_v57, 1 }
 0x409   : > { %v1245_v25 = vadd.f32 %v1244_v8, %v1243_v57  ;;  %v4148_v57 = vld [vmem:[%s4262_s21 + $0x28] sm:$0xff] }
 0x40b   : > { %v1246_v31 = vmul.f32 %v1245_v25, %v4315_v5  ;;  %v4149_v25 = vld [vmem:[%s4262_s21 + $0x48] sm:$0xff] }
 0x40d   : > { %v1247_v44 = vsub.f32 %v1233_v42, %v1246_v31  ;;  %v1248_v6 = vsub.f32 %v1234_v53, %v1246_v31  ;;  %v1249_v29 = vsub.f32 %v1235_v50, %v1246_v31  ;;  %v1250_v21 = vsub.f32 %v1236_v60, %v1246_v31  ;;  %v4150_v31 = vld [vmem:[%s4262_s21 + $0x8] sm:$0xff] }
 0x40f   : > { %v1251_v37 = vmul.f32 %v1247_v44, %v1247_v44  ;;  %v1252_v36 = vmul.f32 %v1248_v6, %v1248_v6  ;;  %v1253_v46 = vmul.f32 %v1249_v29, %v1249_v29  ;;  %v1254_v0 = vmul.f32 %v1250_v21, %v1250_v21 }
 0x411   : > { %v1255_v17 = vadd.f32 %v1252_v36, %v1251_v37 }
 0x413   : > { %v1256_v63 = vadd.f32 %v1255_v17, %v1253_v46 }
 0x415   : > { %v1257_v39 = vadd.f32 %v1256_v63, %v1254_v0  ;;  %v4905_v0 = vpop.permute.xlu0 %1397 }
 0x417   : > { %v1258_v32 = vrot.slane %v1257_v39, 4 }
 0x419   : > { %v1259_v38 = vadd.f32 %v1258_v32, %v1257_v39 }
 0x41b   : > { %v1260_v33 = vrot.slane %v1259_v38, 2 }
 0x41d   : > { %v1261_v43 = vadd.f32 %v1260_v33, %v1259_v38 }
 0x41f   : > { %v1262_v20 = vrot.slane %v1261_v43, 1 }
 0x421   : > { %v1263_v15 = vadd.f32 %v1262_v20, %v1261_v43 }
 0x423   : > { %v1264_v62 = vmul.f32 %v1263_v15, %v4318_v26 }
 0x425   : > { %v1265_v42 = vadd.f32 1e-05, %v1264_v62 }
 0x427   : > { %4110 = vrsqrt.f32 %v1265_v42  ;;  %vm1272_vm7 = vweird.f32 %v1265_v42 }
 0x42d   : > { %v4111_v53 = vpop.eup %4110 }
 0x42e   : > { %v1267_v1 = vmul.f32 %v4111_v53, %v1265_v42  ;;  %vm1273_vm5 = vweird.f32 %v4111_v53 }
 0x42f   : > { %vm1274_vm0 = vmor %vm1272_vm7, %vm1273_vm5 }
 0x430   : > { %v1268_v50 = vmul.f32 %v4111_v53, %v1267_v1 }
 0x432   : > { %v1269_v4 = vmul.f32 0.5, %v1268_v50 }
 0x434   : > { %v1270_v47 = vsub.f32 1.5, %v1269_v4 }
 0x435   : > { %v1298_v33 = vpop.xlane.xlu0 %1297 }
 0x436   : > { %v1271_v22 = vmul.f32 %v4111_v53, %v1270_v47  ;;  %v1308_v20 = vmul.f32 %v1298_v33, %v4277_v24 }
 0x438   : > { %v1275_v51 = vsel %vm1274_vm0, %v4111_v53, %v1271_v22  ;;  %v1312_v42 = vadd.f32 1e-05, %v1308_v20 }
 0x439   : > { %v1279_v11 = vmul.f32 %v1275_v51, %v1250_v21  ;;  %v1278_v49 = vmul.f32 %v1275_v51, %v1249_v29  ;;  %v1276_v60 = vmul.f32 %v1275_v51, %v1247_v44  ;;  %v1277_v48 = vmul.f32 %v1275_v51, %v1248_v6  ;;  %v1406_v44 = vpop.permute.xlu1 %1405  ;;  %v4151_v29 = vld [vmem:[%s4262_s21 + $0x40] sm:$0xff]  ;;  %v4907_v6 = vpop.permute.xlu2 %1433 }
 0x43a   : > { %vm1322_vm13 = vweird.f32 %v1312_v42 }
 0x43b   : > { %v1367_v10 = vmul.f32 %v4145_v19, %v1279_v11  ;;  %v1366_v18 = vmul.f32 %v4146_v58, %v1278_v49  ;;  %v1364_v3 = vmul.f32 %v4147_v59, %v1276_v60  ;;  %v1365_v8 = vmul.f32 %v4148_v57, %v1277_v48 }
 0x43d   : > { %1385 = vperm.xlu0 %4087, %v1367_v10   ;;  %1380 = vperm.xlu2 %4086, %v1366_v18  }
 0x43e   : > { %1370 = vperm.xlu1 %4085, %v1364_v3  }
 0x441   : > { %v1430_v21 = vpop.permute.xlu1 %1429 }
 0x445   : > { %1425 = vperm.xlu0 %4087, %v4149_v25   ;;  %1375 = vperm.xlu2 %4086, %v1365_v8  }
 0x446   : > { %1401 = vperm.xlu1 %4085, %v4150_v31  }
 0x449   : > { %v1301_v37 = vpop.xlane.xlu1 %1300 }
 0x44a   : > { %v1309_v1 = vmul.f32 %v1301_v37, %v4277_v24 }
 0x44c   : > { %v1313_v4 = vadd.f32 1e-05, %v1309_v1 }
 0x44d   : > { %1421 = vperm.xlu2 %4086, %v4151_v29  }
 0x44e   : > { %vm1332_vm8 = vweird.f32 %v1313_v4 }
 0x451   : > { %v1304_v36 = vpop.xlane.xlu1 %1303 }
 0x452   : > { %v1310_v46 = vmul.f32 %v1304_v36, %v4277_v24 }
 0x454   : > { %v1314_v17 = vadd.f32 1e-05, %v1310_v46 }
 0x456   : > { %4112 = vrsqrt.f32 %v1314_v17  ;;  %vm1342_vm7 = vweird.f32 %v1314_v17 }
 0x45c   : > { %v4113_v63 = vpop.eup %4112 }
 0x45d   : > { %v1337_v39 = vmul.f32 %v4113_v63, %v1314_v17  ;;  %vm1343_vm5 = vweird.f32 %v4113_v63 }
 0x45e   : > { %vm1344_vm0 = vmor %vm1342_vm7, %vm1343_vm5 }
 0x45f   : > { %v1338_v32 = vmul.f32 %v4113_v63, %v1337_v39 }
 0x461   : > { %v1339_v15 = vmul.f32 0.5, %v1338_v32 }
 0x463   : > { %v1340_v53 = vsub.f32 1.5, %v1339_v15 }
 0x465   : > { %v1341_v50 = vmul.f32 %v4113_v63, %v1340_v53 }
 0x467   : > { %v1345_v47 = vsel %vm1344_vm0, %v4113_v63, %v1341_v50 }
 0x468   : > { %v1360_v11 = vmul.f32 %v1345_v47, %v4876_v41  ;;  %v1361_v49 = vmul.f32 %v1345_v47, %v4878_v54 }
 0x476   : > { %v1307_v38 = vpop.xlane.xlu2 %1306 }
 0x477   : > { %v1311_v43 = vmul.f32 %v1307_v38, %v4277_v24 }
 0x479   : > { %v1315_v62 = vadd.f32 1e-05, %v1311_v43 }
 0x47b   : > { %4114 = vrsqrt.f32 %v1315_v62  ;;  %vm1352_vm0 = vweird.f32 %v1315_v62 }
 0x47c   : > { %4116 = vrsqrt.f32 %v1312_v42 }
 0x47d   : > { %4118 = vrsqrt.f32 %v1313_v4 }
 0x481   : > { %v4115_v22 = vpop.eup %4114 }
 0x482   : > { %v4117_v51 = vpop.eup %4116  ;;  %v1347_v60 = vmul.f32 %v4115_v22, %v1315_v62  ;;  %vm1353_vm5 = vweird.f32 %v4115_v22 }
 0x483   : > { %v1317_v10 = vmul.f32 %v4117_v51, %v1312_v42  ;;  %v4119_v48 = vpop.eup %4118  ;;  %vm1323_vm7 = vweird.f32 %v4117_v51  ;;  %vm1354_vm10 = vmor %vm1352_vm0, %vm1353_vm5 }
 0x484   : > { %v1348_v57 = vmul.f32 %v4115_v22, %v1347_v60  ;;  %v1327_v29 = vmul.f32 %v4119_v48, %v1313_v4  ;;  %vm1324_vm11 = vmor %vm1322_vm13, %vm1323_vm7  ;;  %vm1333_vm12 = vweird.f32 %v4119_v48 }
 0x485   : > { %v1318_v8 = vmul.f32 %v4117_v51, %v1317_v10  ;;  %vm1334_vm5 = vmor %vm1332_vm8, %vm1333_vm12  ;;  %vm6302_vm12 = vcmask 134144  }
 0x486   : > { %v1349_v46 = vmul.f32 0.5, %v1348_v57  ;;  %v1328_v63 = vmul.f32 %v4119_v48, %v1327_v29  ;;  %vm6304_vm8 = vmmov %vm6302_vm12 }
 0x487   : > { %v1319_v17 = vmul.f32 0.5, %v1318_v8  ;;  %vm6306_vm7 = vmmov %vm6304_vm8 }
 0x488   : > { %v1350_v54 = vsub.f32 1.5, %v1349_v46  ;;  %v1329_v32 = vmul.f32 0.5, %v1328_v63 }
 0x489   : > { %v1320_v39 = vsub.f32 1.5, %v1319_v17 }
 0x48a   : > { %v1351_v38 = vmul.f32 %v4115_v22, %v1350_v54  ;;  %v1330_v33 = vsub.f32 1.5, %v1329_v32 }
 0x48c   : > { %v1355_v43 = vsel %vm1354_vm10, %v4115_v22, %v1351_v38  ;;  %v1331_v15 = vmul.f32 %v4119_v48, %v1330_v33  ;;  %vm6301_vm10 = vcmask 138240  }
 0x48d   : > { %v1362_v53 = vmul.f32 %v1355_v43, %v4887_v2  ;;  %v1363_v1 = vmul.f32 %v1355_v43, %v4889_v45  ;;  %vm6303_vm13 = vmmov %vm6301_vm10 }
 0x48e   : > { %v1335_v22 = vsel %vm1334_vm5, %v4119_v48, %v1331_v15  ;;  %vm6307_vm0 = vmmov %vm6301_vm10 }
 0x48f   : > { %v1358_v4 = vmul.f32 %v1335_v22, %v4867_v56  ;;  %vm6308_vm5 = vmmov %vm6306_vm7 }
 0x497   : > { %v1381_v19 = vpop.permute.xlu2 %1380 }
 0x498   : > { %v1392_v58 = vadd.f32 %v1381_v19, %v1360_v11  ;;  %v1393_v18 = vadd.f32 %v1381_v19, %v1361_v49 }
 0x49a   : > { %v1416_v59 = vmul.f32 %v1406_v44, %v1392_v58  ;;  %v1417_v3 = vmul.f32 %v1406_v44, %v1393_v18  ;;  %v1321_v44 = vmul.f32 %v4117_v51, %v1320_v39  ;;  %v1359_v18 = vmul.f32 %v1335_v22, %v4869_v61 }
 0x49c   : > { %v1440_v25 = vadd.f32 %v1430_v21, %v1416_v59  ;;  %v1441_v31 = vadd.f32 %v1430_v21, %v1417_v3  ;;  %v1325_v20 = vsel %vm1324_vm11, %v4117_v51, %v1321_v44  ;;  %vm6305_vm11 = vmmov %vm6301_vm10 }
 0x49d   : > { %v1356_v47 = vmul.f32 %v1325_v20, %v4858_v40  ;;  %v1357_v11 = vmul.f32 %v1325_v20, %v4860_v34 }
 0x49e   : > { %v1448_v37 = vmax.f32 %v1440_v25, 0.0  ;;  %v1449_v36 = vmax.f32 %v1441_v31, 0.0 }
 0x49f   : > { %v1376_v21 = vpop.permute.xlu2 %1375 }
 0x4a0   : > { %v1454_v41 = vpack.c.bf16 %v1449_v36, %v1448_v37  ;;  %v1390_v8 = vadd.f32 %v1376_v21, %v1358_v4  ;;  %v1391_v25 = vadd.f32 %v1376_v21, %v1359_v18 }
 0x4a2   : > { %1464 = vrot.lane.b32.xlu1 %v1454_v41, %s4201_s27 }
 0x4a7   : > { %v1422_v58 = vpop.permute.xlu2 %1421 }
 0x4af   : > { %v1386_v50 = vpop.permute.xlu0 %1385 }
 0x4b0   : > { %v1394_v62 = vadd.f32 %v1386_v50, %v1362_v53  ;;  %v1395_v42 = vadd.f32 %v1386_v50, %v1363_v1  ;;  %v1371_v49 = vpop.permute.xlu1 %1370 }
 0x4b1   : > { %v1388_v60 = vadd.f32 %v1371_v49, %v1356_v47  ;;  %v1389_v19 = vadd.f32 %v1371_v49, %v1357_v11 }
 0x4b2   : > { %v1418_v51 = vmul.f32 %v4884_v27, %v1394_v62  ;;  %v1419_v10 = vmul.f32 %v4884_v27, %v1395_v42 }
 0x4b3   : > { %v1412_v2 = vmul.f32 %v4905_v0, %v1388_v60  ;;  %v1413_v45 = vmul.f32 %v4905_v0, %v1389_v19 }
 0x4b4   : > { %v1442_v40 = vadd.f32 %v4907_v6, %v1418_v51  ;;  %v1443_v34 = vadd.f32 %v4907_v6, %v1419_v10 }
 0x4b5   : > { %v1436_v59 = vadd.f32 %v1422_v58, %v1412_v2  ;;  %v1437_v3 = vadd.f32 %v1422_v58, %v1413_v45 }
 0x4b6   : > { %v1450_v48 = vmax.f32 %v1442_v40, 0.0  ;;  %v1451_v57 = vmax.f32 %v1443_v34, 0.0 }
 0x4b7   : > { %v1444_v27 = vmax.f32 %v1436_v59, 0.0  ;;  %v1445_v31 = vmax.f32 %v1437_v3, 0.0  ;;  %v1426_v17 = vpop.permute.xlu0 %1425 }
 0x4b8   : > { %v1402_v29 = vpop.permute.xlu1 %1401  ;;  %v1455_v37 = vpack.c.bf16 %v1451_v57, %v1450_v48 }
 0x4b9   : > { %v1414_v0 = vmul.f32 %v1402_v29, %v1390_v8  ;;  %v1415_v36 = vmul.f32 %v1402_v29, %v1391_v25  ;;  %v1452_v46 = vpack.c.bf16 %v1445_v31, %v1444_v27 }
 0x4ba   : > { %1466 = vrot.lane.b32.xlu2 %v1455_v37, %s4201_s27 }
 0x4bb   : > { %v1438_v6 = vadd.f32 %v1426_v17, %v1414_v0  ;;  %v1439_v56 = vadd.f32 %v1426_v17, %v1415_v36  ;;  %1460 = vrot.lane.b32.xlu0 %v1452_v46, %s4201_s27 }
 0x4bd   : > { %v1446_v61 = vmax.f32 %v1438_v6, 0.0  ;;  %v1447_v41 = vmax.f32 %v1439_v56, 0.0 }
 0x4bf   : > { %v1453_v63 = vpack.c.bf16 %v1447_v41, %v1446_v61 }
 0x4c1   : > { %1462 = vrot.lane.b32.xlu1 %v1453_v63, %s4201_s27 }
 0x514   : > { %v1465_v54 = vpop.permute.xlu1 %1464  ;;  %v1467_v39 = vpop.permute.xlu2 %1466 }
 0x515   : > { %v1470_v32 = vrot.slane %v1465_v54, 4  ;;  %v1471_v38 = vrot.slane %v1467_v39, 4 }
 0x517   : > { %v1474_v44 = vsel %vm6301_vm10, %v1470_v32, %v1465_v54  ;;  %1489 = vst.msk [vmem:[#allocation2 + $0x20] sm:$0xf] %vm6302_vm12, %v1470_v32  ;;  %v1475_v33 = vsel %vm6303_vm13, %v1471_v38, %v1467_v39  ;;  %vm6309_vm10 = vnez %v6288_v35  ;;  %vm6310_vm12 = vnez %v6274_v30 }
 0x518   : > { %1488 = vst.msk [vmem:[#allocation2 + $0x18] sm:$0xff] %vm4414_vm9, %v1474_v44  ;;  %vm6311_vm13 = vcmask 777216  }
 0x519   : > { %1490 = vst.msk [vmem:[#allocation2 + $0x24] sm:$0xff] %vm4414_vm9, %v1475_v33 }
 0x51a   : > { %1491 = vst.msk [vmem:[#allocation2 + $0x2c] sm:$0xf] %vm6304_vm8, %v1471_v38  ;;  %vm6312_vm8 = vnez %v6294_v12 }
 0x51e   : > { %v3834_v21 = vld [vmem:[#allocation2 + $0x20] sm:$0xf] }
 0x51f   : > { %v3826_v43 = vld [vmem:[#allocation2 + $0x18] sm:$0xf]  ;;  %v4010_v20 = vld [vmem:[#allocation2 + $0x1c] sm:$0xf]  ;;  %v4997_v54 = vld [vmem:[#allocation2 + $0x20] sm:$0xf] }
 0x520   : > { %v4011_v15 = vld [vmem:[#allocation2 + $0x20] sm:$0xf0]  ;;  %v3828_v53 = vld [vmem:[#allocation2 + $0x24] sm:$0xf0]  ;;  %v4970_v57 = vld [vmem:[#allocation2 + $0x18] sm:$0xff] }
 0x521   : > { %v4013_v1 = vld [vmem:[#allocation2 + $0x28] sm:$0xf0]  ;;  %v3827_v50 = vor.u32 %v4011_v15, %v3826_v43  ;;  %v4938_v47 = vor.u32 %v4010_v20, %v3828_v53  ;;  %v4972_v8 = vld [vmem:[#allocation2 + $0x24] sm:$0xff]  ;;  %v1516_v27 = vsel %vm4555_vm14, %v4970_v57, 0  ;;  %v1532_v44 = vsel %vm4404_vm1, %v4970_v57, 0 }
 0x522   : > { %v4940_v11 = vor.u32 %v4013_v1, %v3834_v21  ;;  %v1518_v31 = vsel %vm4555_vm14, %v4972_v8, 0  ;;  %v1671_v29 = vunpack.c.h.b16 %v1516_v27  ;;  %v1670_v61 = vunpack.c.l.b16 %v1516_v27  ;;  %v4999_v39 = vld [vmem:[#allocation2 + $0x2c] sm:$0xf] }
 0x523   : > { %1820 = vrot.lane.b32.xlu2 %v3827_v50, %s4203_s29  ;;  %1822 = vrot.lane.b32.xlu0 %v4938_v47, %s4203_s29  ;;  %v1674_v37 = vunpack.c.h.b16 %v1518_v31  ;;  %v1673_v41 = vunpack.c.l.b16 %v1518_v31  ;;  %v1534_v33 = vsel %vm4404_vm1, %v4972_v8, 0  ;;  %v1517_v21 = vsel %vm4462_vm15, %v4997_v54, 0 }
 0x524   : > { %1824 = vrot.lane.b32.xlu1 %v4940_v11, %s4203_s29  ;;  %v1519_v43 = vsel %vm4462_vm15, %v4999_v39, 0  ;;  %v1783_v20 = vunpack.c.h.b16 %v1532_v44  ;;  %v1786_v15 = vunpack.c.h.b16 %v1534_v33  ;;  %v1782_v53 = vunpack.c.l.b16 %v1532_v44 }
 0x525   : > { %v1680_v36 = vpack.c.b16 %v1674_v37, %v1671_v29  ;;  %v1679_v38 = vpack.c.b16 %v1673_v41, %v1670_v61  ;;  %v1785_v1 = vunpack.c.l.b16 %v1534_v33 }
 0x52b   : > { %1596 = vrot.lane.b32.xlu2 %v3827_v50, %s4202_s28 }
 0x52d   : > { %v1461_v62 = vpop.permute.xlu0 %1460 }
 0x52e   : > { %v1468_v42 = vrot.slane %v1461_v62, 4 }
 0x530   : > { %v1472_v49 = vsel %vm6305_vm11, %v1468_v42, %v1461_v62  ;;  %1485 = vst.msk [vmem:[#allocation2 + $0x8] sm:$0xf] %vm6306_vm7, %v1468_v42  ;;  %v1675_v62 = vunpack.c.l.b16 %v1519_v43  ;;  %v1792_v42 = vpack.c.b16 %v1786_v15, %v1783_v20  ;;  %vm6313_vm11 = vmmov %vm6311_vm13  ;;  %vm6314_vm7 = vcmask 916480  }
 0x531   : > { %1484 = vst.msk [vmem:[#allocation2] sm:$0xff] %vm4414_vm9, %v1472_v49  ;;  %v1791_v49 = vpack.c.b16 %v1785_v1, %v1782_v53 }
 0x533   : > { %v1463_v60 = vpop.permute.xlu1 %1462  ;;  %1708 = vrot.lane.b32.xlu2 %v3827_v50, %s4209_s8  ;;  %v1672_v50 = vunpack.c.l.b16 %v1517_v21 }
 0x534   : > { %v1469_v19 = vrot.slane %v1463_v60, 4 }
 0x536   : > { %v1473_v22 = vsel %vm6307_vm0, %v1469_v19, %v1463_v60  ;;  %1487 = vst.msk [vmem:[#allocation2 + $0x14] sm:$0xf] %vm6308_vm5, %v1469_v19  ;;  %v1681_v60 = vpack.c.b16 %v1675_v62, %v1672_v50  ;;  %vm6315_vm0 = vcmask 785408   ;;  %vm6316_vm5 = vmmov %vm6314_vm7 }
 0x537   : > { %1486 = vst.msk [vmem:[#allocation2 + $0xc] sm:$0xff] %vm4414_vm9, %v1473_v22  ;;  %v4959_v4 = vld [vmem:[#allocation2 + $0x8] sm:$0xf]  ;;  %v1508_v22 = vsel %vm4580_vm6, %v4970_v57, 0 }
 0x538   : > { %v4008_v51 = vld [vmem:[#allocation2 + $0x4] sm:$0xf]  ;;  %v3814_v45 = vld [vmem:[#allocation2] sm:$0xf]  ;;  %v1513_v59 = vsel %vm4462_vm15, %v4959_v4, 0  ;;  %v1624_v37 = vunpack.c.l.b16 %v1508_v22 }
 0x539   : > { %v1666_v48 = vunpack.c.l.b16 %v1513_v59  ;;  %v4986_v46 = vld [vmem:[#allocation2] sm:$0xff] }
 0x53a   : > { %v1512_v6 = vsel %vm4555_vm14, %v4986_v46, 0  ;;  %v1504_v27 = vsel %vm4580_vm6, %v4986_v46, 0  ;;  %v1520_v44 = vsel %vm4410_vm4, %v4986_v46, 0 }
 0x53b   : > { %v1664_v63 = vunpack.c.l.b16 %v1512_v6  ;;  %v1731_v15 = vunpack.c.h.b16 %v1520_v44 }
 0x53d   : > { %v4957_v10 = vld [vmem:[#allocation2 + $0x14] sm:$0xf] }
 0x53e   : > { %v3816_v2 = vld [vmem:[#allocation2 + $0xc] sm:$0xf0]  ;;  %v4009_v58 = vld [vmem:[#allocation2 + $0x8] sm:$0xf0]  ;;  %v1515_v18 = vsel %vm4462_vm15, %v4957_v10, 0 }
 0x53f   : > { %v3819_v40 = vor.u32 %v4008_v51, %v3816_v2  ;;  %v3815_v34 = vor.u32 %v4009_v58, %v3814_v45  ;;  %v1669_v3 = vunpack.c.l.b16 %v1515_v18  ;;  %v4984_v0 = vld [vmem:[#allocation2 + $0xc] sm:$0xff]  ;;  %v1528_v51 = vsel %vm4404_vm1, %v4986_v46, 0 }
 0x540   : > { %v1514_v17 = vsel %vm4555_vm14, %v4984_v0, 0  ;;  %v1530_v19 = vsel %vm4404_vm1, %v4984_v0, 0  ;;  %v1625_v45 = vunpack.c.h.b16 %v1508_v22  ;;  %v1665_v18 = vunpack.c.h.b16 %v1512_v6 }
 0x541   : > { %1816 = vrot.lane.b32.xlu1 %v3819_v40, %s4203_s29  ;;  %1704 = vrot.lane.b32.xlu2 %v3819_v40, %s4209_s8  ;;  %v1678_v25 = vpack.c.b16 %v1669_v3, %v1666_v48  ;;  %v1667_v56 = vunpack.c.l.b16 %v1514_v17  ;;  %v1779_v2 = vunpack.c.l.b16 %v1530_v19  ;;  %v1618_v6 = vunpack.c.l.b16 %v1504_v27 }
 0x542   : > { %1814 = vrot.lane.b32.xlu0 %v3815_v34, %s4203_s29  ;;  %v1780_v20 = vunpack.c.h.b16 %v1530_v19  ;;  %v1777_v53 = vunpack.c.h.b16 %v1528_v51 }
 0x543   : > { %v1676_v32 = vpack.c.b16 %v1667_v56, %v1664_v63  ;;  %v1522_v63 = vsel %vm4410_vm4, %v4984_v0, 0 }
 0x544   : > { %v1734_v33 = vunpack.c.h.b16 %v1522_v63  ;;  %v1789_v62 = vpack.c.b16 %v1780_v20, %v1777_v53  ;;  %v1733_v22 = vunpack.c.l.b16 %v1522_v63  ;;  %v1505_v63 = vsel %vm4488_vm3, %v4959_v4, 0 }
 0x545   : > { %v1543_v53 = vsel %vm6310_vm12, %v4999_v39, 0 }
 0x546   : > { %v1743_v1 = vpack.c.b16 %v1734_v33, %v1731_v15  ;;  %v1620_v33 = vunpack.c.l.b16 %v1505_v63  ;;  %v1541_v15 = vsel %vm6310_vm12, %v4997_v54, 0 }
 0x549   : > { %1592 = vrot.lane.b32.xlu1 %v3819_v40, %s4202_s28  ;;  %1686 = vrot.lane.b32.xlu2 %v1678_v25, %s4204_s30  ;;  %v1668_v40 = vunpack.c.h.b16 %v1514_v17  ;;  %v1506_v25 = vsel %vm4580_vm6, %v4984_v0, 0  ;;  %v1619_v17 = vunpack.c.h.b16 %v1504_v27  ;;  %v3822_v27 = vld [vmem:[#allocation2 + $0x8] sm:$0xf] }
 0x54a   : > { %1598 = vrot.lane.b32.xlu0 %v4938_v47, %s4202_s28  ;;  %v1622_v31 = vunpack.c.h.b16 %v1506_v25  ;;  %v1621_v29 = vunpack.c.l.b16 %v1506_v25 }
 0x54b   : > { %v1677_v48 = vpack.c.b16 %v1668_v40, %v1665_v18  ;;  %v1511_v18 = vsel %vm4488_vm3, %v4999_v39, 0 }
 0x54c   : > { %v1631_v56 = vpack.c.b16 %v1622_v31, %v1619_v17  ;;  %v1630_v61 = vpack.c.b16 %v1621_v29, %v1618_v6  ;;  %v1523_v29 = vsel %vm6309_vm10, %v4957_v10, 0  ;;  %v1507_v17 = vsel %vm4488_vm3, %v4957_v10, 0 }
 0x54d   : > { %v1521_v6 = vsel %vm6309_vm10, %v4959_v4, 0 }
 0x551   : > { %1702 = vrot.lane.b32.xlu1 %v3815_v34, %s4209_s8  ;;  %1690 = vrot.lane.b32.xlu2 %v1680_v36, %s4204_s30 }
 0x552   : > { %1590 = vrot.lane.b32.xlu0 %v3815_v34, %s4202_s28  ;;  %v1776_v34 = vunpack.c.l.b16 %v1528_v51 }
 0x554   : > { %v1788_v59 = vpack.c.b16 %v1779_v2, %v1776_v34  ;;  %v1730_v2 = vunpack.c.l.b16 %v1520_v44  ;;  %v1509_v34 = vsel %vm4488_vm3, %v4997_v54, 0 }
 0x559   : > { %1682 = vrot.lane.b32.xlu2 %v1676_v32, %s4204_s30  ;;  %1688 = vrot.lane.b32.xlu1 %v1679_v38, %s4204_s30  ;;  %v1524_v32 = vsel %vm4410_vm4, %v4970_v57, 0  ;;  %v1526_v38 = vsel %vm4410_vm4, %v4972_v8, 0 }
 0x55a   : > { %1710 = vrot.lane.b32.xlu0 %v4938_v47, %s4209_s8  ;;  %v1510_v47 = vsel %vm4580_vm6, %v4972_v8, 0  ;;  %v1737_v21 = vunpack.c.h.b16 %v1524_v32  ;;  %v1740_v43 = vunpack.c.h.b16 %v1526_v38  ;;  %v1739_v51 = vunpack.c.l.b16 %v1526_v38 }
 0x55b   : > { %v1628_v58 = vunpack.c.h.b16 %v1510_v47  ;;  %v1627_v36 = vunpack.c.l.b16 %v1510_v47  ;;  %v1736_v47 = vunpack.c.l.b16 %v1524_v32  ;;  %v1623_v32 = vunpack.c.l.b16 %v1507_v17 }
 0x55c   : > { %v1746_v50 = vpack.c.b16 %v1740_v43, %v1737_v21  ;;  %v1732_v38 = vunpack.c.l.b16 %v1521_v6 }
 0x55d   : > { %v1634_v3 = vpack.c.b16 %v1628_v58, %v1625_v45  ;;  %v1633_v41 = vpack.c.b16 %v1627_v36, %v1624_v37  ;;  %v1742_v58 = vpack.c.b16 %v1733_v22, %v1730_v2  ;;  %v1745_v40 = vpack.c.b16 %v1739_v51, %v1736_v47 }
 0x55e   : > { %v1531_v37 = vsel %vm4520_vm2, %v4957_v10, 0  ;;  %v1632_v20 = vpack.c.b16 %v1623_v32, %v1620_v33  ;;  %v1540_v2 = vsel %vm6312_vm8, %v4970_v57, 0 }
 0x561   : > { %1802 = vrot.lane.b32.xlu2 %v1792_v42, %s4207_s6  ;;  %1800 = vrot.lane.b32.xlu1 %v1791_v49, %s4207_s6  ;;  %v1533_v42 = vsel %vm4520_vm2, %v4997_v54, 0  ;;  %v1535_v49 = vsel %vm4520_vm2, %v4999_v39, 0 }
 0x562   : > { %1692 = vrot.lane.b32.xlu0 %v1681_v60, %s4204_s30  ;;  %v1784_v60 = vunpack.c.l.b16 %v1533_v42  ;;  %v1787_v19 = vunpack.c.l.b16 %v1535_v49  ;;  %v1850_v42 = vunpack.c.l.b16 %v1541_v15  ;;  %v1853_v49 = vunpack.c.l.b16 %v1543_v53 }
 0x564   : > { %v1793_v45 = vpack.c.b16 %v1787_v19, %v1784_v60  ;;  %v1859_v51 = vpack.c.b16 %v1853_v49, %v1850_v42 }
 0x569   : > { %1794 = vrot.lane.b32.xlu2 %v1788_v59, %s4207_s6  ;;  %1644 = vrot.lane.b32.xlu1 %v1634_v3, %s4205_s4  ;;  %v1626_v59 = vunpack.c.l.b16 %v1509_v34  ;;  %v1629_v3 = vunpack.c.l.b16 %v1511_v18  ;;  %v1849_v34 = vunpack.c.h.b16 %v1540_v2 }
 0x56a   : > { %1684 = vrot.lane.b32.xlu0 %v1677_v48, %s4204_s30  ;;  %v4012_v48 = vld [vmem:[#allocation2 + $0x10] sm:$0xf0] }
 0x56b   : > { %v1635_v25 = vpack.c.b16 %v1629_v3, %v1626_v59  ;;  %v5074_v31 = vor.u32 %v4012_v48, %v3822_v27 }
 0x571   : > { %1638 = vrot.lane.b32.xlu2 %v1631_v56, %s4205_s4  ;;  %1636 = vrot.lane.b32.xlu1 %v1630_v61, %s4205_s4  ;;  %v1529_v56 = vsel %vm4520_vm2, %v4959_v4, 0  ;;  %v1735_v61 = vunpack.c.l.b16 %v1523_v29  ;;  %v1848_v29 = vunpack.c.l.b16 %v1540_v2 }
 0x572   : > { %1642 = vrot.lane.b32.xlu0 %v1633_v41, %s4205_s4  ;;  %v1781_v41 = vunpack.c.l.b16 %v1531_v37  ;;  %v1778_v44 = vunpack.c.l.b16 %v1529_v56 }
 0x573   : > { %v1744_v21 = vpack.c.b16 %v1735_v61, %v1732_v38  ;;  %v1539_v61 = vsel %vm6310_vm12, %v4957_v10, 0 }
 0x574   : > { %v1790_v43 = vpack.c.b16 %v1781_v41, %v1778_v44  ;;  %v1847_v63 = vunpack.c.l.b16 %v1539_v61 }
 0x579   : > { %1750 = vrot.lane.b32.xlu2 %v1743_v1, %s4206_s5  ;;  %1756 = vrot.lane.b32.xlu1 %v1746_v50, %s4206_s5  ;;  %v1525_v1 = vsel %vm6309_vm10, %v4997_v54, 0  ;;  %v1527_v50 = vsel %vm6309_vm10, %v4999_v39, 0  ;;  %v1538_v39 = vsel %vm6312_vm8, %v4984_v0, 0 }
 0x57a   : > { %1796 = vrot.lane.b32.xlu0 %v1789_v62, %s4207_s6  ;;  %v1738_v60 = vunpack.c.l.b16 %v1525_v1  ;;  %v1741_v19 = vunpack.c.l.b16 %v1527_v50  ;;  %v1845_v27 = vunpack.c.l.b16 %v1538_v39 }
 0x57c   : > { %v1747_v54 = vpack.c.b16 %v1741_v19, %v1738_v60 }
 0x57d   : > { %v1821_v36 = vpop.permute.xlu2 %1820 }
 0x581   : > { %1804 = vrot.lane.b32.xlu2 %v1793_v45, %s4207_s6  ;;  %1748 = vrot.lane.b32.xlu1 %v1742_v58, %s4206_s5  ;;  %v1542_v45 = vsel %vm6312_vm8, %v4972_v8, 0  ;;  %v1536_v58 = vsel %vm6312_vm8, %v4986_v46, 0 }
 0x582   : > { %1754 = vrot.lane.b32.xlu0 %v1745_v40, %s4206_s5  ;;  %v1846_v40 = vunpack.c.h.b16 %v1538_v39  ;;  %v1852_v18 = vunpack.c.h.b16 %v1542_v45  ;;  %v1843_v3 = vunpack.c.h.b16 %v1536_v58  ;;  %v1851_v37 = vunpack.c.l.b16 %v1542_v45 }
 0x583   : > { %v1842_v17 = vunpack.c.l.b16 %v1536_v58 }
 0x584   : > { %v1855_v48 = vpack.c.b16 %v1846_v40, %v1843_v3  ;;  %v1857_v56 = vpack.c.b16 %v1851_v37, %v1848_v29 }
 0x585   : > { %v5114_v62 = vpop.permute.xlu2 %1596  ;;  %v1854_v6 = vpack.c.b16 %v1845_v27, %v1842_v17 }
 0x589   : > { %1600 = vrot.lane.b32.xlu2 %v4940_v11, %s4202_s28  ;;  %1646 = vrot.lane.b32.xlu1 %v1635_v25, %s4205_s4  ;;  %v1858_v25 = vpack.c.b16 %v1852_v18, %v1849_v34 }
 0x58a   : > { %1818 = vrot.lane.b32.xlu0 %v5074_v31, %s4203_s29 }
 0x58d   : > { %v5136_v59 = vpop.permute.xlu2 %1708 }
 0x591   : > { %1752 = vrot.lane.b32.xlu2 %v1744_v21, %s4206_s5  ;;  %1798 = vrot.lane.b32.xlu1 %v1790_v43, %s4207_s6 }
 0x592   : > { %1640 = vrot.lane.b32.xlu0 %v1632_v20, %s4205_s4 }
 0x595   : > { %v5116_v22 = vpop.permute.xlu0 %1822 }
 0x596   : > { %v1828_v47 = vsel %vm6311_vm13, %v1821_v36, %v5116_v22  ;;  %v5149_v41 = vpop.permute.xlu1 %1824  ;;  %vm6317_vm13 = vmmov %vm6316_vm5 }
 0x597   : > { %1944 = vmatpush.bf16.msrb.mxu3 %v1828_v47 }
 0x599   : > { %1870 = vrot.lane.b32.xlu2 %v1859_v51, %s4208_s7  ;;  %1594 = vrot.lane.b32.xlu1 %v5074_v31, %s4202_s28 }
 0x59a   : > { %1758 = vrot.lane.b32.xlu0 %v1747_v54, %s4206_s5 }
 0x59b   : > { %v5142_v36 = vpop.permute.xlu2 %1704 }
 0x5a1   : > { %1862 = vrot.lane.b32.xlu2 %v1855_v48, %s4208_s7  ;;  %1868 = vrot.lane.b32.xlu1 %v1858_v25, %s4208_s7 }
 0x5a2   : > { %1712 = vrot.lane.b32.xlu0 %v4940_v11, %s4209_s8  ;;  %v1537_v11 = vsel %vm6310_vm12, %v4959_v4, 0 }
 0x5a3   : > { %v1844_v32 = vunpack.c.l.b16 %v1537_v11  ;;  %v1687_v38 = vpop.permute.xlu2 %1686 }
 0x5a5   : > { %v1856_v44 = vpack.c.b16 %v1847_v63, %v1844_v32 }
 0x5a9   : > { %1860 = vrot.lane.b32.xlu1 %v1854_v6, %s4208_s7 }
 0x5aa   : > { %1866 = vrot.lane.b32.xlu0 %v1857_v56, %s4208_s7 }
 0x5ab   : > { %v1691_v43 = vpop.permute.xlu2 %1690 }
 0x5b1   : > { %1706 = vrot.lane.b32.xlu1 %v5074_v31, %s4209_s8 }
 0x5b2   : > { %1864 = vrot.lane.b32.xlu0 %v1856_v44, %s4208_s7 }
 0x5b3   : > { %v5157_v33 = vpop.permute.xlu1 %1816  ;;  %v1683_v15 = vpop.permute.xlu2 %1682 }
 0x5b4   : > { %v1815_v10 = vpop.permute.xlu0 %1814 }
 0x5b5   : > { %v1826_v21 = vsel %vm6313_vm11, %v1815_v10, %v5157_v33  ;;  %vm6318_vm11 = vmmov %vm6316_vm5 }
 0x5b6   : > { %1945 = vmatpush.bf16.msrb.mxu3 %v1826_v21 }
 0x5bb   : > { %v5161_v20 = vpop.permute.xlu1 %1592  ;;  %v5170_v49 = vpop.permute.xlu2 %1802 }
 0x5bc   : > { %v5163_v4 = vpop.permute.xlu0 %1598 }
 0x5c3   : > { %v5165_v53 = vpop.permute.xlu1 %1702  ;;  %v1795_v54 = vpop.permute.xlu2 %1794 }
 0x5c4   : > { %v1591_v1 = vpop.permute.xlu0 %1590 }
 0x5cb   : > { %v1689_v50 = vpop.permute.xlu1 %1688  ;;  %v1639_v40 = vpop.permute.xlu2 %1638 }
 0x5cc   : > { %v5167_v31 = vpop.permute.xlu0 %1710  ;;  %v1696_v42 = vsel %vm6314_vm7, %v1689_v50, %v1691_v43  ;;  %vm6319_vm7 = vcmask 1031168  }
 0x5cd   : > { %1925 = vmatpush.bf16.msrb.mxu1 %v1696_v42 }
 0x5d3   : > { %v1801_v60 = vpop.permute.xlu1 %1800  ;;  %v5179_v25 = vpop.permute.xlu2 %1750 }
 0x5d4   : > { %v1693_v19 = vpop.permute.xlu0 %1692  ;;  %v1808_v47 = vsel %vm6315_vm0, %v1801_v60, %v5170_v49  ;;  %vm6320_vm0 = vmmov %vm6319_vm7 }
 0x5d5   : > { %v1697_v51 = vsel %vm6316_vm5, %v1691_v43, %v1693_v19  ;;  %1946 = vmatpush.bf16.msrb.mxu3 %v1808_v47  ;;  %vm6321_vm5 = vcmask 1039360   ;;  %v3846_v43 = vld [vmem:[%s6239_s2 + $0x30] sm:$0xf] }
 0x5d6   : > { %1982 = vmatpush.bf16.msra.mxu0 %v1697_v51  ;;  %v1604_v37 = vsel %vm6321_vm5, %v5114_v62, %v5163_v4 }
 0x5db   : > { %v1645_v39 = vpop.permute.xlu1 %1644  ;;  %v1805_v10 = vpop.permute.xlu2 %1804 }
 0x5dc   : > { %v1685_v2 = vpop.permute.xlu0 %1684 }
 0x5dd   : > { %v1694_v45 = vsel %vm6317_vm13, %v1683_v15, %v1685_v2  ;;  %v1695_v58 = vsel %vm6318_vm11, %v1685_v2, %v1687_v38  ;;  %vm6322_vm13 = vcmask 785408   ;;  %vm6323_vm11 = vnez %v6272_v9  ;;  %v4014_v2 = vld [vmem:[%s6239_s2 + $0x34] sm:$0xf] }
 0x5de   : > { %1926 = vmatpush.bf16.msrb.mxu1 %v1694_v45  ;;  %1983 = vmatpush.bf16.msra.mxu0 %v1695_v58  ;;  %v5190_v6 = vsel %vm6323_vm11, %v4970_v57, 0  ;;  %v5195_v56 = vsel %vm6323_vm11, %v4972_v8, 0  ;;  %v5204_v63 = vsel %vm6323_vm11, %v4984_v0, 0  ;;  %v5209_v8 = vsel %vm6323_vm11, %v4986_v46, 0  ;;  %v4015_v46 = vld [vmem:[%s6239_s2 + $0x38] sm:$0xf0] }
 0x5df   : > { %v1552_v61 = vunpack.c.l.b16 %v5190_v6  ;;  %v1554_v11 = vunpack.c.l.b16 %v5195_v56  ;;  %v1550_v44 = vunpack.c.l.b16 %v5204_v63  ;;  %v1548_v0 = vunpack.c.l.b16 %v5209_v8 }
 0x5e0   : > { %v3847_v50 = vor.u32 %v4015_v46, %v3846_v43  ;;  %v3854_v46 = vld [vmem:[%s6239_s2 + $0x38] sm:$0xf] }
 0x5e1   : > { %v1558_v38 = vpack.c.b16 %v1554_v11, %v1552_v61  ;;  %v1556_v15 = vpack.c.b16 %v1550_v44, %v1548_v0 }
 0x5e3   : > { %v1637_v34 = vpop.permute.xlu1 %1636 }
 0x5e4   : > { %v1643_v18 = vpop.permute.xlu0 %1642  ;;  %v1648_v48 = vsel %vm6320_vm0, %v1637_v34, %v1639_v40  ;;  %vm6325_vm0 = vcmask 900096  }
 0x5e5   : > { %v1650_v3 = vsel %vm6319_vm7, %v1643_v18, %v1645_v39  ;;  %vm6324_vm7 = vmmov %vm6321_vm5 }
 0x5e6   : > { %1927 = vmatpush.bf16.msrb.mxu1 %v1650_v3  ;;  %v1602_v62 = vsel %vm6324_vm7, %v1591_v1, %v5161_v20  ;;  %vm6326_vm5 = vmmov %vm6325_vm0  ;;  %vm6328_vm7 = vcmask 1031168   ;;  %v4018_v3 = vld [vmem:[%s6239_s2 + $0x50] sm:$0xf0] }
 0x5ea   : > { %1928 = vmatpush.bf16.msrb.mxu1 %v1648_v48 }
 0x5eb   : > { %v5181_v27 = vpop.permute.xlu1 %1756 }
 0x5ec   : > { %v1797_v29 = vpop.permute.xlu0 %1796 }
 0x5ed   : > { %v1806_v17 = vsel %vm6322_vm13, %v1795_v54, %v1797_v29  ;;  %vm6327_vm13 = vcmask 777216  }
 0x5ee   : > { %1929 = vmatpush.bf16.msrb.mxu1 %v1604_v37  ;;  %1947 = vmatpush.bf16.msrb.mxu3 %v1806_v17  ;;  %v1829_v42 = vsel %vm6327_vm13, %v5116_v22, %v5149_v41  ;;  %vm6330_vm11 = vmmov %vm6327_vm13  ;;  %v3848_v22 = vld [vmem:[%s6239_s2 + $0x3c] sm:$0xf0]  ;;  %v1601_v41 = vpop.permute.xlu2 %1600  ;;  %v1553_v17 = vunpack.c.h.b16 %v5190_v6  ;;  %v3860_v6 = vld [vmem:[%s6239_s2 + $0x54] sm:$0xf0] }
 0x5f2   : > { %1930 = vmatpush.bf16.msrb.mxu1 %v1602_v62 }
 0x5f3   : > { %v1749_v57 = vpop.permute.xlu1 %1748 }
 0x5f4   : > { %v1755_v32 = vpop.permute.xlu0 %1754  ;;  %v1760_v1 = vsel %vm6326_vm5, %v1749_v57, %v5179_v25 }
 0x5f5   : > { %v1762_v21 = vsel %vm6325_vm0, %v1755_v32, %v5181_v27  ;;  %vm6329_vm0 = vcmask 908288  }
 0x5f6   : > { %1931 = vmatpush.bf16.msrb.mxu1 %v1558_v38  ;;  %1948 = vmatpush.bf16.msrb.mxu3 %v1762_v21  ;;  %v1716_v51 = vsel %vm6329_vm0, %v5136_v59, %v5167_v31  ;;  %vm6331_vm5 = vmmov %vm6329_vm0  ;;  %vm6334_vm0 = vcmask 1039360  }
 0x5f7   : > { %v1714_v59 = vsel %vm6331_vm5, %v5165_v53, %v5142_v36  ;;  %v3858_v53 = vld [vmem:[%s6239_s2 + $0x48] sm:$0xf]  ;;  %v1605_v48 = vsel %vm6334_vm0, %v5163_v4, %v1601_v41  ;;  %vm6335_vm5 = vmmov %vm6334_vm0  ;;  %v4017_v4 = vld [vmem:[%s6239_s2 + $0x4c] sm:$0xf]  ;;  %vm6339_vm0 = vcmask 908288  }
 0x5f8   : > { %v3859_v37 = vor.u32 %v4018_v3, %v3858_v53  ;;  %v3863_v32 = vor.u32 %v4017_v4, %v3860_v6 }
 0x5fa   : > { %1932 = vmatpush.bf16.msrb.mxu1 %v1556_v15  ;;  %1949 = vmatpush.bf16.msrb.mxu3 %v1760_v1  ;;  %v4016_v15 = vld [vmem:[%s6239_s2 + $0x40] sm:$0xf0] }
 0x5fb   : > { %v1647_v60 = vpop.permute.xlu1 %1646 }
 0x5fc   : > { %v1819_v19 = vpop.permute.xlu0 %1818  ;;  %v1651_v47 = vsel %vm6328_vm7, %v1645_v39, %v1647_v60  ;;  %v5241_v39 = vor.u32 %v4014_v2, %v3848_v22  ;;  %v4211_v2 = vmov 2   ;;  %v4152_v22 = vld [vmem:[%s4262_s21 + $0x18] sm:$0xff] }
 0x5fd   : > { %1984 = vmatpush.bf16.msra.mxu0 %v1651_v47  ;;  %v1827_v54 = vsel %vm6330_vm11, %v5157_v33, %v1819_v19  ;;  %1933 = vmatmul.bf16.vlgmr.msrb.gmra.mxu1 %v3847_v50  ;;  %vm6332_vm11 = vcmask 785408  }
 0x5fe   : > { %2001 = vmatpush.bf16.msra.mxu1 %v1829_v42  ;;  %1950 = vmatpush.bf16.msrb.mxu3 %v1716_v51  ;;  %v1809_v33 = vsel %vm6332_vm11, %v5170_v49, %v1805_v10  ;;  %vm6333_vm13 = vmmov %vm6332_vm11  ;;  %v1753_v49 = vpop.permute.xlu2 %1752  ;;  %vm6336_vm11 = vcmask 900096   ;;  %v3855_v42 = vor.u32 %v4016_v15, %v3854_v46  ;;  %v3866_v51 = vld [vmem:[%s6239_s2 + $0x50] sm:$0xf] }
 0x5ff   : > { %4089 = vset.pattern.permute.xlu1 %v4211_v2  ;;  %4090 = vset.pattern.permute.xlu2 %v4211_v2 }
 0x600   : > { %2227 = vperm.xlu1 %4089, %v4152_v22   ;;  %4088 = vset.pattern.permute.xlu0 %v4211_v2 }
 0x602   : > { %2002 = vmatpush.bf16.msra.mxu1 %v1827_v54  ;;  %1951 = vmatpush.bf16.msrb.mxu3 %v1714_v59 }
 0x603   : > { %v1799_v45 = vpop.permute.xlu1 %1798 }
 0x604   : > { %v1641_v58 = vpop.permute.xlu0 %1640  ;;  %v1807_v34 = vsel %vm6333_vm13, %v1797_v29, %v1799_v45  ;;  %vm6337_vm13 = vmmov %vm6336_vm11 }
 0x605   : > { %1952 = vmatmul.bf16.vlgmr.msrb.gmra.mxu3 %v5241_v39  ;;  %v1649_v18 = vsel %vm6328_vm7, %v1639_v40, %v1641_v58  ;;  %v1555_v40 = vunpack.c.h.b16 %v5195_v56  ;;  %v1551_v56 = vunpack.c.h.b16 %v5204_v63  ;;  %vm6338_vm7 = vcmask 769024  }
 0x606   : > { %2003 = vmatpush.bf16.msra.mxu1 %v1809_v33  ;;  %1985 = vmatpush.bf16.msra.mxu0 %v1649_v18  ;;  %v1871_v38 = vpop.permute.xlu2 %1870  ;;  %v4153_v18 = vld [vmem:[%s4257_s18 + $0x30] sm:$0xff] }
 0x607   : > { %v1559_v57 = vpack.c.b16 %v1555_v40, %v1553_v17  ;;  %v4155_v40 = vld [vmem:[%s4257_s18] sm:$0xff] }
 0x60a   : > { %2004 = vmatpush.bf16.msra.mxu1 %v1807_v34  ;;  %1986 = vmatpush.bf16.msra.mxu0 %v1605_v48 }
 0x60b   : > { %v1595_v29 = vpop.permute.xlu1 %1594 }
 0x60c   : > { %v1759_v61 = vpop.permute.xlu0 %1758  ;;  %v1603_v11 = vsel %vm6335_vm5, %v5161_v20, %v1595_v29  ;;  %v1761_v20 = vsel %vm6337_vm13, %v5179_v25, %v1753_v49  ;;  %vm6340_vm5 = vmmov %vm6338_vm7 }
 0x60d   : > { %v1763_v62 = vsel %vm6336_vm11, %v5181_v27, %v1759_v61  ;;  %1938 = vmatmul.bf16.gmra.mxu1 %v3859_v37  ;;  %v1549_v27 = vunpack.c.h.b16 %v5209_v8  ;;  %vm6341_vm11 = vmmov %vm6340_vm5 }
 0x60e   : > { %1987 = vmatpush.bf16.msra.mxu0 %v1603_v11  ;;  %2005 = vmatpush.bf16.msra.mxu1 %v1763_v62  ;;  %v1863_v1 = vpop.permute.xlu2 %1862  ;;  %vm6342_vm13 = vmmov %vm6339_vm0 }
 0x60f   : > { %v1557_v21 = vpack.c.b16 %v1551_v56, %v1549_v27 }
 0x612   : > { %1988 = vmatpush.bf16.msra.mxu0 %v1559_v57  ;;  %2006 = vmatpush.bf16.msra.mxu1 %v1761_v20 }
 0x613   : > { %v1869_v44 = vpop.permute.xlu1 %1868 }
 0x614   : > { %v1713_v10 = vpop.permute.xlu0 %1712  ;;  %v1875_v0 = vsel %vm6338_vm7, %v1869_v44, %v1871_v38  ;;  %vm6343_vm7 = vcmask 261120  }
 0x615   : > { %1957 = vmatmul.bf16.gmra.mxu3 %v3863_v32  ;;  %v1717_v43 = vsel %vm6339_vm0, %v5167_v31, %v1713_v10  ;;  %vm6344_vm0 = vmmov %vm6340_vm5 }
 0x616   : > { %1989 = vmatpush.bf16.msra.mxu0 %v1557_v21  ;;  %2007 = vmatpush.bf16.msra.mxu1 %v1717_v43  ;;  %v4157_v21 = vld [vmem:[%s4257_s18 + $0x18] sm:$0xff] }
 0x617   : > { %2026 = vmatpush.bf16.msra.mxu3 %v1875_v0 }
 0x619   : > { %1990 = vmatmul.bf16.vlgmr.msra.gmra.mxu0 %v3847_v50 }
 0x61b   : > { %v1861_v25 = vpop.permute.xlu1 %1860 }
 0x61c   : > { %v1867_v63 = vpop.permute.xlu0 %1866  ;;  %v1872_v31 = vsel %vm6341_vm11, %v1861_v25, %v1863_v1 }
 0x61d   : > { %v1874_v8 = vsel %vm6340_vm5, %v1867_v63, %v1869_v44  ;;  %vm6345_vm5 = vmmov %vm6343_vm7  ;;  %v4156_v44 = vld [vmem:[%s4257_s18 + $0x10] sm:$0xff] }
 0x61e   : > { %1969 = vmatpush.bf16.msra.mxu2 %v1874_v8  ;;  %vm6346_vm11 = vmmov %vm6345_vm5 }
 0x622   : > { %1970 = vmatpush.bf16.msra.mxu2 %v1872_v31 }
 0x623   : > { %v1707_v60 = vpop.permute.xlu1 %1706 }
 0x624   : > { %v1865_v50 = vpop.permute.xlu0 %1864  ;;  %v1715_v19 = vsel %vm6342_vm13, %v5142_v36, %v1707_v60  ;;  %v4019_v36 = vld [vmem:[%s6239_s2 + $0x58] sm:$0xf0]  ;;  %vm6347_vm13 = vmmov %vm6345_vm5  ;;  %v4159_v60 = vld [vmem:[%s4257_s18 + $0x20] sm:$0xff] }
 0x625   : > { %3868 = vmatmul.msk.bf16.vlgmr.msra.gmra.mxu2 %vm6343_vm7, %v3855_v42  ;;  %2008 = vmatpush.bf16.msra.mxu1 %v1715_v19  ;;  %v1873_v47 = vsel %vm6344_vm0, %v1863_v1, %v1865_v50  ;;  %v3867_v54 = vor.u32 %v4019_v36, %v3866_v51  ;;  %v4158_v1 = vld [vmem:[%s4257_s18 + $0x28] sm:$0xff] }
 0x626   : > { %2027 = vmatpush.bf16.msra.mxu3 %v1873_v47 }
 0x628   : > { %2009 = vmatmul.bf16.vlgmr.msra.gmra.mxu1 %v5241_v39 }
 0x629   : > { %3870 = vmatmul.msk.bf16.vlgmr.msra.gmra.mxu3 %vm6345_vm5, %v3855_v42  ;;  %1995 = vmatmul.bf16.gmra.mxu0 %v3859_v37  ;;  %v4154_v37 = vld [vmem:[%s4257_s18 + $0x8] sm:$0xff] }
 0x635   : > { %3869 = vmatmul.msk.bf16.gmra.mxu2 %vm6346_vm11, %v3867_v54 }
 0x638   : > { %2014 = vmatmul.bf16.gmra.mxu1 %v3863_v32 }
 0x639   : > { %3871 = vmatmul.msk.bf16.gmra.mxu3 %vm6347_vm13, %v3867_v54 }
 0x67a   : > { %v1934_v41 = vpop.f32.mrf.mxu1 }
 0x67b   : > { %v1935_v61 = vadd.f32 %v4155_v40, %v1934_v41  ;;  %v4164_v40 = vld [vmem:[%s4262_s21] sm:$0xff] }
 0x682   : > { %v1936_v39 = vpop.f32.mrf.mxu1 }
 0x683   : > { %v1937_v10 = vadd.f32 %v4156_v44, %v1936_v39  ;;  %v4161_v39 = vld [vmem:[%s4262_s21 + $0x10] sm:$0xff] }
 0x688   : > { %v1953_v59 = vpop.f32.mrf.mxu3 }
 0x689   : > { %v1954_v6 = vadd.f32 %v1953_v59, %v1935_v61  ;;  %v4160_v59 = vld [vmem:[%s4262_s21 + $0x50] sm:$0xff] }
 0x68a   : > { %v1939_v45 = vpop.f32.mrf.mxu1 }
 0x68b   : > { %v1940_v50 = vadd.f32 %v4159_v60, %v1939_v45 }
 0x690   : > { %v1955_v33 = vpop.f32.mrf.mxu3 }
 0x691   : > { %v1956_v25 = vadd.f32 %v1955_v33, %v1937_v10  ;;  %v4162_v33 = vld [vmem:[%s4262_s21 + $0x58] sm:$0xff] }
 0x692   : > { %v1941_v34 = vpop.f32.mrf.mxu1 }
 0x693   : > { %v1942_v53 = vadd.f32 %v4153_v18, %v1941_v34  ;;  %v4163_v34 = vld [vmem:[%s4257_s18 + $0x38] sm:$0xff] }
 0x696   : > { %v1991_v49 = vpop.f32.mrf.mxu0 }
 0x697   : > { %v1992_v29 = vadd.f32 %v4154_v37, %v1991_v49 }
 0x698   : > { %v1958_v58 = vpop.f32.mrf.mxu3 }
 0x699   : > { %v1959_v36 = vadd.f32 %v1958_v58, %v1940_v50  ;;  %v4165_v50 = vld [vmem:[%s4262_s21 + $0x8] sm:$0xff] }
 0x69e   : > { %v1993_v4 = vpop.f32.mrf.mxu0 }
 0x69f   : > { %v1994_v0 = vadd.f32 %v4157_v21, %v1993_v4 }
 0x6a0   : > { %v1960_v3 = vpop.f32.mrf.mxu3 }
 0x6a1   : > { %v1961_v48 = vadd.f32 %v1960_v3, %v1942_v53 }
 0x6a5   : > { %v2010_v17 = vpop.f32.mrf.mxu1 }
 0x6a6   : > { %v2011_v62 = vadd.f32 %v2010_v17, %v1992_v29  ;;  %v1996_v43 = vpop.f32.mrf.mxu0 }
 0x6a7   : > { %v1997_v31 = vadd.f32 %v4158_v1, %v1996_v43 }
 0x6a8   : > { %v1972_v11 = vpop.f32.mrf.mxu2 }
 0x6a9   : > { %v5301_v57 = vadd.f32 %v1972_v11, %v1954_v6  ;;  %v5341_v6 = vpop.permute.xlu1 %2227 }
 0x6ac   : > { %v2029_v56 = vpop.f32.mrf.mxu3 }
 0x6ad   : > { %v5303_v20 = vadd.f32 %v2029_v56, %v2011_v62  ;;  %v2012_v32 = vpop.f32.mrf.mxu1 }
 0x6ae   : > { %v2013_v63 = vadd.f32 %v2012_v32, %v1994_v0  ;;  %v1998_v45 = vpop.f32.mrf.mxu0 }
 0x6af   : > { %v2039_v27 = vadd.f32 %v5303_v20, %v5301_v57  ;;  %v1999_v18 = vadd.f32 %v4163_v34, %v1998_v45 }
 0x6b0   : > { %v1974_v38 = vpop.f32.mrf.mxu2 }
 0x6b1   : > { %2040 = vadd.xlane.f32.xlu2 %v2039_v27  ;;  %v5309_v46 = vadd.f32 %v1974_v38, %v1956_v25 }
 0x6b4   : > { %v2031_v8 = vpop.f32.mrf.mxu3 }
 0x6b5   : > { %v5311_v15 = vadd.f32 %v2031_v8, %v2013_v63  ;;  %v2015_v42 = vpop.f32.mrf.mxu1 }
 0x6b6   : > { %v2016_v47 = vadd.f32 %v2015_v42, %v1997_v31 }
 0x6b7   : > { %v2042_v19 = vadd.f32 %v5311_v15, %v5309_v46 }
 0x6b8   : > { %v1977_v51 = vpop.f32.mrf.mxu2 }
 0x6b9   : > { %2043 = vadd.xlane.f32.xlu0 %v2042_v19  ;;  %v5317_v2 = vadd.f32 %v1977_v51, %v1959_v36 }
 0x6bc   : > { %v2034_v54 = vpop.f32.mrf.mxu3 }
 0x6bd   : > { %v5319_v22 = vadd.f32 %v2034_v54, %v2016_v47  ;;  %v2017_v58 = vpop.f32.mrf.mxu1 }
 0x6be   : > { %v2018_v53 = vadd.f32 %v2017_v58, %v1999_v18 }
 0x6bf   : > { %v2045_v41 = vadd.f32 %v5319_v22, %v5317_v2 }
 0x6c0   : > { %v1979_v49 = vpop.f32.mrf.mxu2 }
 0x6c1   : > { %2046 = vadd.xlane.f32.xlu1 %v2045_v41  ;;  %v5329_v29 = vadd.f32 %v1979_v49, %v1961_v48 }
 0x6c4   : > { %v2036_v3 = vpop.f32.mrf.mxu3 }
 0x6c5   : > { %v5327_v37 = vadd.f32 %v2036_v3, %v2018_v53 }
 0x6c7   : > { %v2048_v17 = vadd.f32 %v5327_v37, %v5329_v29 }
 0x6c9   : > { %2247 = vperm.xlu2 %4090, %v4160_v59  }
 0x6cd   : > { %2223 = vperm.xlu0 %4088, %v4161_v39  }
 0x6da   : > { %2251 = vperm.xlu1 %4089, %v4162_v33  }
 0x6f2   : > { %2049 = vadd.xlane.f32.xlu2 %v2048_v17 }
 0x70a   : > { %2215 = vperm.xlu2 %4090, %v4164_v40  }
 0x724   : > { %v2041_v61 = vpop.xlane.xlu2 %2040 }
 0x725   : > { %v2051_v11 = vmul.f32 %v2041_v61, %v4277_v24 }
 0x727   : > { %v5336_v62 = vsub.f32 %v5301_v57, %v2051_v11  ;;  %v5339_v4 = vsub.f32 %v5303_v20, %v2051_v11 }
 0x729   : > { %v2106_v32 = vmul.f32 %v5336_v62, %v5336_v62  ;;  %v2107_v27 = vmul.f32 %v5339_v4, %v5339_v4 }
 0x72b   : > { %v2114_v10 = vadd.f32 %v2107_v27, %v2106_v32 }
 0x72c   : > { %v2044_v56 = vpop.xlane.xlu0 %2043  ;;  %v5370_v19 = vpop.permute.xlu2 %2247 }
 0x72d   : > { %v2052_v48 = vmul.f32 %v2044_v56, %v4277_v24 }
 0x72f   : > { %v5349_v38 = vsub.f32 %v5309_v46, %v2052_v48  ;;  %v5352_v44 = vsub.f32 %v5311_v15, %v2052_v48  ;;  %v2055_v47 = vadd.f32 %v2052_v48, %v2051_v11 }
 0x731   : > { %v2108_v21 = vmul.f32 %v5349_v38, %v5349_v38  ;;  %v2109_v0 = vmul.f32 %v5352_v44, %v5352_v44 }
 0x733   : > { %2115 = vadd.xlane.f32.xlu2 %v2114_v10  ;;  %v2117_v43 = vadd.f32 %v2109_v0, %v2108_v21 }
 0x734   : > { %v2047_v25 = vpop.xlane.xlu1 %2046 }
 0x735   : > { %v2053_v63 = vmul.f32 %v2047_v25, %v4277_v24  ;;  %2118 = vadd.xlane.f32.xlu0 %v2117_v43 }
 0x737   : > { %v5360_v8 = vsub.f32 %v5317_v2, %v2053_v63  ;;  %v5363_v1 = vsub.f32 %v5319_v22, %v2053_v63  ;;  %v2056_v36 = vadd.f32 %v2055_v47, %v2053_v63 }
 0x739   : > { %v2110_v31 = vmul.f32 %v5360_v8, %v5360_v8  ;;  %v2111_v42 = vmul.f32 %v5363_v1, %v5363_v1 }
 0x73b   : > { %v2120_v60 = vadd.f32 %v2111_v42, %v2110_v31 }
 0x73d   : > { %2121 = vadd.xlane.f32.xlu0 %v2120_v60 }
 0x751   : > { %2219 = vperm.xlu0 %4088, %v4165_v50  }
 0x765   : > { %v2050_v51 = vpop.xlane.xlu2 %2049 }
 0x766   : > { %v2054_v54 = vmul.f32 %v2050_v51, %v4277_v24 }
 0x768   : > { %v2057_v41 = vadd.f32 %v2056_v36, %v2054_v54  ;;  %v5374_v59 = vsub.f32 %v5329_v29, %v2054_v54  ;;  %v5377_v39 = vsub.f32 %v5327_v37, %v2054_v54 }
 0x76a   : > { %v2058_v33 = vrot.slane %v2057_v41, 4  ;;  %v2112_v45 = vmul.f32 %v5374_v59, %v5374_v59  ;;  %v2113_v34 = vmul.f32 %v5377_v39, %v5377_v39 }
 0x76c   : > { %v2059_v18 = vadd.f32 %v2058_v33, %v2057_v41  ;;  %v2123_v58 = vadd.f32 %v2113_v34, %v2112_v45 }
 0x76e   : > { %v2060_v53 = vrot.slane %v2059_v18, 2  ;;  %2124 = vadd.xlane.f32.xlu1 %v2123_v58 }
 0x770   : > { %v2061_v3 = vadd.f32 %v2060_v53, %v2059_v18 }
 0x772   : > { %v2062_v49 = vrot.slane %v2061_v3, 1 }
 0x774   : > { %v2063_v17 = vadd.f32 %v2062_v49, %v2061_v3  ;;  %v4166_v49 = vld [vmem:[%s4262_s21 + $0x38] sm:$0xff] }
 0x776   : > { %v2064_v40 = vmul.f32 %v2063_v17, %v4315_v5 }
 0x778   : > { %v2065_v61 = vsub.f32 %v2051_v11, %v2064_v40  ;;  %v2066_v56 = vsub.f32 %v2052_v48, %v2064_v40  ;;  %v2067_v32 = vsub.f32 %v2053_v63, %v2064_v40  ;;  %v2068_v27 = vsub.f32 %v2054_v54, %v2064_v40  ;;  %v4167_v40 = vld [vmem:[%s4262_s21 + $0x30] sm:$0xff] }
 0x77a   : > { %v2069_v10 = vmul.f32 %v2065_v61, %v2065_v61  ;;  %v2070_v21 = vmul.f32 %v2066_v56, %v2066_v56  ;;  %v2071_v0 = vmul.f32 %v2067_v32, %v2067_v32  ;;  %v2072_v25 = vmul.f32 %v2068_v27, %v2068_v27 }
 0x77c   : > { %v2073_v43 = vadd.f32 %v2070_v21, %v2069_v10 }
 0x77e   : > { %v2074_v31 = vadd.f32 %v2073_v43, %v2071_v0  ;;  %v4168_v43 = vld [vmem:[%s4262_s21 + $0x28] sm:$0xff] }
 0x780   : > { %v2075_v42 = vadd.f32 %v2074_v31, %v2072_v25  ;;  %v4169_v31 = vld [vmem:[%s4262_s21 + $0x20] sm:$0xff] }
 0x782   : > { %v2076_v60 = vrot.slane %v2075_v42, 4 }
 0x784   : > { %v2077_v50 = vadd.f32 %v2076_v60, %v2075_v42  ;;  %v4170_v60 = vld [vmem:[%s4262_s21 + $0x40] sm:$0xff] }
 0x786   : > { %v2078_v47 = vrot.slane %v2077_v50, 2 }
 0x788   : > { %v2079_v51 = vadd.f32 %v2078_v47, %v2077_v50  ;;  %v5391_v50 = vpop.permute.xlu0 %2223 }
 0x78a   : > { %v2080_v36 = vrot.slane %v2079_v51, 1 }
 0x78c   : > { %v2081_v41 = vadd.f32 %v2080_v36, %v2079_v51 }
 0x78e   : > { %v2082_v33 = vmul.f32 %v2081_v41, %v4318_v26 }
 0x790   : > { %v2083_v11 = vadd.f32 1e-05, %v2082_v33 }
 0x792   : > { %4120 = vrsqrt.f32 %v2083_v11  ;;  %vm2090_vm0 = vweird.f32 %v2083_v11 }
 0x798   : > { %v4121_v48 = vpop.eup %4120 }
 0x799   : > { %v2085_v63 = vmul.f32 %v4121_v48, %v2083_v11  ;;  %vm2091_vm7 = vweird.f32 %v4121_v48  ;;  %v5394_v11 = vpop.permute.xlu2 %2215 }
 0x79a   : > { %vm2092_vm5 = vmor %vm2090_vm0, %vm2091_vm7 }
 0x79b   : > { %v2086_v54 = vmul.f32 %v4121_v48, %v2085_v63 }
 0x79d   : > { %v2087_v45 = vmul.f32 0.5, %v2086_v54 }
 0x79f   : > { %v2088_v34 = vsub.f32 1.5, %v2087_v45 }
 0x7a1   : > { %v2089_v18 = vmul.f32 %v4121_v48, %v2088_v34 }
 0x7a3   : > { %v2093_v58 = vsel %vm2092_vm5, %v4121_v48, %v2089_v18 }
 0x7a4   : > { %v2097_v53 = vmul.f32 %v2093_v58, %v2068_v27  ;;  %v2096_v3 = vmul.f32 %v2093_v58, %v2067_v32  ;;  %v2095_v21 = vmul.f32 %v2093_v58, %v2066_v56  ;;  %v2094_v0 = vmul.f32 %v2093_v58, %v2065_v61  ;;  %v4171_v27 = vld [vmem:[%s4262_s21 + $0x48] sm:$0xff]  ;;  %v2252_v32 = vpop.permute.xlu1 %2251 }
 0x7a6   : > { %v2185_v17 = vmul.f32 %v4166_v49, %v2097_v53  ;;  %v2184_v10 = vmul.f32 %v4167_v40, %v2096_v3  ;;  %v2183_v25 = vmul.f32 %v4168_v43, %v2095_v21  ;;  %v2182_v42 = vmul.f32 %v4169_v31, %v2094_v0  ;;  %v2116_v18 = vpop.xlane.xlu2 %2115 }
 0x7a7   : > { %v2126_v53 = vmul.f32 %v2116_v18, %v4277_v24 }
 0x7a8   : > { %2203 = vperm.xlu2 %4090, %v2185_v17   ;;  %2198 = vperm.xlu1 %4089, %v2184_v10   ;;  %v2119_v36 = vpop.xlane.xlu0 %2118 }
 0x7a9   : > { %v2127_v58 = vmul.f32 %v2119_v36, %v4277_v24  ;;  %v2130_v17 = vadd.f32 1e-05, %v2126_v53 }
 0x7ab   : > { %v2131_v49 = vadd.f32 1e-05, %v2127_v58  ;;  %vm2140_vm8 = vweird.f32 %v2130_v17 }
 0x7ad   : > { %vm2150_vm12 = vweird.f32 %v2131_v49 }
 0x7b0   : > { %2193 = vperm.xlu1 %4089, %v2183_v25   ;;  %2188 = vperm.xlu2 %4090, %v2182_v42   ;;  %v2122_v33 = vpop.xlane.xlu0 %2121 }
 0x7b1   : > { %v2128_v63 = vmul.f32 %v2122_v33, %v4277_v24 }
 0x7b3   : > { %v2132_v45 = vadd.f32 1e-05, %v2128_v63 }
 0x7b5   : > { %vm2160_vm5 = vweird.f32 %v2132_v45 }
 0x7b8   : > { %2239 = vperm.xlu1 %4089, %v4170_v60   ;;  %2243 = vperm.xlu2 %4090, %v4171_v27  }
 0x7e1   : > { %v2125_v47 = vpop.xlane.xlu1 %2124 }
 0x7e2   : > { %v2129_v51 = vmul.f32 %v2125_v47, %v4277_v24 }
 0x7e4   : > { %v2133_v41 = vadd.f32 1e-05, %v2129_v51 }
 0x7e6   : > { %4122 = vrsqrt.f32 %v2133_v41  ;;  %vm2170_vm13 = vweird.f32 %v2133_v41 }
 0x7e7   : > { %4124 = vrsqrt.f32 %v2132_v45 }
 0x7e8   : > { %4126 = vrsqrt.f32 %v2131_v49 }
 0x7e9   : > { %4128 = vrsqrt.f32 %v2130_v17 }
 0x7ec   : > { %v4123_v61 = vpop.eup %4122 }
 0x7ed   : > { %v2165_v56 = vmul.f32 %v4123_v61, %v2133_v41  ;;  %vm2171_vm11 = vweird.f32 %v4123_v61  ;;  %v4125_v10 = vpop.eup %4124 }
 0x7ee   : > { %vm2172_vm7 = vmor %vm2170_vm13, %vm2171_vm11  ;;  %v2155_v43 = vmul.f32 %v4125_v10, %v2132_v45  ;;  %v4127_v51 = vpop.eup %4126  ;;  %vm2161_vm0 = vweird.f32 %v4125_v10 }
 0x7ef   : > { %v2166_v48 = vmul.f32 %v4123_v61, %v2165_v56  ;;  %vm2162_vm11 = vmor %vm2160_vm5, %vm2161_vm0  ;;  %vm2151_vm13 = vweird.f32 %v4127_v51 }
 0x7f0   : > { %v2156_v47 = vmul.f32 %v4125_v10, %v2155_v43  ;;  %vm2152_vm10 = vmor %vm2150_vm12, %vm2151_vm13  ;;  %vm6349_vm12 = vcmask 134144  }
 0x7f1   : > { %v2167_v54 = vmul.f32 0.5, %v2166_v48  ;;  %v2145_v48 = vmul.f32 %v4127_v51, %v2131_v49  ;;  %vm6351_vm5 = vmmov %vm6349_vm12 }
 0x7f2   : > { %vm6353_vm13 = vmmov %vm6351_vm5 }
 0x7f3   : > { %v2168_v34 = vsub.f32 1.5, %v2167_v54  ;;  %v2146_v54 = vmul.f32 %v4127_v51, %v2145_v48 }
 0x7f5   : > { %v2169_v3 = vmul.f32 %v4123_v61, %v2168_v34  ;;  %v2147_v58 = vmul.f32 0.5, %v2146_v54 }
 0x7f7   : > { %v2173_v40 = vsel %vm2172_vm7, %v4123_v61, %v2169_v3  ;;  %v4129_v61 = vpop.eup %4128  ;;  %v2148_v3 = vsub.f32 1.5, %v2147_v58 }
 0x7f8   : > { %v2180_v21 = vmul.f32 %v2173_v40, %v5374_v59  ;;  %v2181_v0 = vmul.f32 %v2173_v40, %v5377_v39  ;;  %v2157_v59 = vmul.f32 0.5, %v2156_v47  ;;  %v2135_v63 = vmul.f32 %v4129_v61, %v2130_v17 }
 0x7f9   : > { %vm2141_vm7 = vweird.f32 %v4129_v61 }
 0x7fa   : > { %v2158_v34 = vsub.f32 1.5, %v2157_v59  ;;  %v2136_v18 = vmul.f32 %v4129_v61, %v2135_v63  ;;  %vm2142_vm0 = vmor %vm2140_vm8, %vm2141_vm7 }
 0x7fc   : > { %v2159_v53 = vmul.f32 %v4125_v10, %v2158_v34 }
 0x802   : > { %v2204_v25 = vpop.permute.xlu2 %2203 }
 0x803   : > { %v2212_v31 = vadd.f32 %v2204_v25, %v2180_v21  ;;  %v2213_v42 = vadd.f32 %v2204_v25, %v2181_v0  ;;  %v2149_v25 = vmul.f32 %v4127_v51, %v2148_v3 }
 0x805   : > { %v2236_v60 = vmul.f32 %v5341_v6, %v2212_v31  ;;  %v2237_v27 = vmul.f32 %v5341_v6, %v2213_v42  ;;  %v2137_v6 = vmul.f32 0.5, %v2136_v18  ;;  %v2153_v47 = vsel %vm2152_vm10, %v4127_v51, %v2149_v25  ;;  %v2220_v51 = vpop.permute.xlu0 %2219 }
 0x806   : > { %v2177_v49 = vmul.f32 %v2153_v47, %v5352_v44  ;;  %vm6348_vm10 = vcmask 138240  }
 0x807   : > { %v2260_v36 = vadd.f32 %v2252_v32, %v2236_v60  ;;  %v2261_v41 = vadd.f32 %v2252_v32, %v2237_v27  ;;  %v2163_v32 = vsel %vm2162_vm11, %v4125_v10, %v2159_v53  ;;  %v2138_v40 = vsub.f32 1.5, %v2137_v6  ;;  %vm6350_vm8 = vmmov %vm6348_vm10 }
 0x808   : > { %v2178_v21 = vmul.f32 %v2163_v32, %v5360_v8  ;;  %v2179_v0 = vmul.f32 %v2163_v32, %v5363_v1  ;;  %vm6352_vm11 = vmmov %vm6350_vm8 }
 0x809   : > { %v2268_v56 = vmax.f32 %v2260_v36, 0.0  ;;  %v2269_v33 = vmax.f32 %v2261_v41, 0.0  ;;  %v2139_v31 = vmul.f32 %v4129_v61, %v2138_v40  ;;  %vm6354_vm7 = vmmov %vm6350_vm8 }
 0x80a   : > { %v2189_v27 = vpop.permute.xlu2 %2188 }
 0x80b   : > { %v2273_v39 = vpack.c.bf16 %v2269_v33, %v2268_v56  ;;  %v2143_v8 = vsel %vm2142_vm0, %v4129_v61, %v2139_v31  ;;  %v2176_v33 = vmul.f32 %v2153_v47, %v5349_v38  ;;  %vm6355_vm0 = vmmov %vm6351_vm5 }
 0x80c   : > { %v2174_v17 = vmul.f32 %v2143_v8, %v5336_v62  ;;  %v2175_v59 = vmul.f32 %v2143_v8, %v5339_v4 }
 0x80d   : > { %2284 = vrot.lane.b32.xlu1 %v2273_v39, %s4201_s27 }
 0x80e   : > { %v2206_v61 = vadd.f32 %v2189_v27, %v2174_v17  ;;  %v2207_v54 = vadd.f32 %v2189_v27, %v2175_v59 }
 0x810   : > { %v2230_v62 = vmul.f32 %v5394_v11, %v2206_v61  ;;  %v2231_v6 = vmul.f32 %v5394_v11, %v2207_v54 }
 0x81a   : > { %v2199_v43 = vpop.permute.xlu1 %2198 }
 0x81b   : > { %v2210_v42 = vadd.f32 %v2199_v43, %v2178_v21  ;;  %v2211_v60 = vadd.f32 %v2199_v43, %v2179_v0 }
 0x81d   : > { %v2234_v45 = vmul.f32 %v5391_v50, %v2210_v42  ;;  %v2235_v10 = vmul.f32 %v5391_v50, %v2211_v60 }
 0x81f   : > { %v2258_v1 = vadd.f32 %v5370_v19, %v2234_v45  ;;  %v2259_v36 = vadd.f32 %v5370_v19, %v2235_v10  ;;  %v2244_v19 = vpop.permute.xlu2 %2243 }
 0x821   : > { %v2266_v41 = vmax.f32 %v2258_v1, 0.0  ;;  %v2267_v56 = vmax.f32 %v2259_v36, 0.0 }
 0x822   : > { %v2194_v48 = vpop.permute.xlu1 %2193 }
 0x823   : > { %v2208_v63 = vadd.f32 %v2194_v48, %v2176_v33  ;;  %v2209_v50 = vadd.f32 %v2194_v48, %v2177_v49  ;;  %v2272_v39 = vpack.c.bf16 %v2267_v56, %v2266_v41 }
 0x825   : > { %v2232_v34 = vmul.f32 %v2220_v51, %v2208_v63  ;;  %v2233_v18 = vmul.f32 %v2220_v51, %v2209_v50  ;;  %2282 = vrot.lane.b32.xlu0 %v2272_v39, %s4201_s27 }
 0x827   : > { %v2256_v58 = vadd.f32 %v2244_v19, %v2232_v34  ;;  %v2257_v38 = vadd.f32 %v2244_v19, %v2233_v18 }
 0x829   : > { %v2264_v53 = vmax.f32 %v2256_v58, 0.0  ;;  %v2265_v44 = vmax.f32 %v2257_v38, 0.0 }
 0x82a   : > { %v2240_v4 = vpop.permute.xlu1 %2239 }
 0x82b   : > { %v2254_v3 = vadd.f32 %v2240_v4, %v2230_v62  ;;  %v2255_v32 = vadd.f32 %v2240_v4, %v2231_v6  ;;  %v2271_v40 = vpack.c.bf16 %v2265_v44, %v2264_v53 }
 0x82d   : > { %v2262_v21 = vmax.f32 %v2254_v3, 0.0  ;;  %v2263_v0 = vmax.f32 %v2255_v32, 0.0  ;;  %2280 = vrot.lane.b32.xlu0 %v2271_v40, %s4201_s27 }
 0x82f   : > { %v2270_v43 = vpack.c.bf16 %v2263_v0, %v2262_v21 }
 0x831   : > { %2278 = vrot.lane.b32.xlu2 %v2270_v43, %s4201_s27 }
 0x87f   : > { %v2285_v25 = vpop.permute.xlu1 %2284 }
 0x880   : > { %v2289_v31 = vrot.slane %v2285_v25, 4 }
 0x882   : > { %v2293_v42 = vsel %vm6348_vm10, %v2289_v31, %v2285_v25  ;;  %2309 = vst.msk [vmem:[#allocation2 + $0x2c] sm:$0xf] %vm6349_vm12, %v2289_v31  ;;  %vm6356_vm10 = vnez %v6288_v35  ;;  %vm6357_vm12 = vnez %v6294_v12 }
 0x883   : > { %2308 = vst.msk [vmem:[#allocation2 + $0x24] sm:$0xff] %vm4414_vm9, %v2293_v42 }
 0x889   : > { %v4025_v41 = vld [vmem:[#allocation2 + $0x28] sm:$0xf0] }
 0x88a   : > { %v3888_v17 = vld [vmem:[#allocation2 + $0x24] sm:$0xf0]  ;;  %v4023_v63 = vld [vmem:[#allocation2 + $0x20] sm:$0xf0]  ;;  %v5448_v58 = vld [vmem:[#allocation2 + $0x2c] sm:$0xf] }
 0x88b   : > { %v2279_v11 = vpop.permute.xlu2 %2278  ;;  %v2337_v53 = vsel %vm4462_vm15, %v5448_v58, 0  ;;  %v5462_v3 = vld [vmem:[#allocation2 + $0x24] sm:$0xff] }
 0x88c   : > { %v2286_v60 = vrot.slane %v2279_v11, 4  ;;  %v2493_v62 = vunpack.c.l.b16 %v2337_v53  ;;  %v2336_v40 = vsel %vm4555_vm14, %v5462_v3, 0 }
 0x88d   : > { %v2491_v0 = vunpack.c.l.b16 %v2336_v40 }
 0x88e   : > { %v2290_v27 = vsel %vm6350_vm8, %v2286_v60, %v2279_v11  ;;  %2303 = vst.msk [vmem:[#allocation2 + $0x8] sm:$0xf] %vm6351_vm5, %v2286_v60  ;;  %vm6358_vm8 = vnez %v6274_v30  ;;  %vm6359_vm5 = vcmask 777216  }
 0x88f   : > { %2302 = vst.msk [vmem:[#allocation2] sm:$0xff] %vm4414_vm9, %v2290_v27 }
 0x895   : > { %v5482_v60 = vld [vmem:[#allocation2 + $0x8] sm:$0xf] }
 0x896   : > { %v3874_v50 = vld [vmem:[#allocation2] sm:$0xf]  ;;  %v4020_v61 = vld [vmem:[#allocation2 + $0x4] sm:$0xf] }
 0x897   : > { %v2283_v45 = vpop.permute.xlu0 %2282  ;;  %v5477_v42 = vld [vmem:[#allocation2] sm:$0xff] }
 0x898   : > { %v2288_v10 = vrot.slane %v2283_v45, 4 }
 0x89a   : > { %v2292_v47 = vsel %vm6352_vm11, %v2288_v10, %v2283_v45  ;;  %2307 = vst.msk [vmem:[#allocation2 + $0x20] sm:$0xf] %vm6353_vm13, %v2288_v10  ;;  %v2330_v45 = vsel %vm4555_vm14, %v5477_v42, 0  ;;  %vm6360_vm11 = vmmov %vm6359_vm5 }
 0x89b   : > { %2306 = vst.msk [vmem:[#allocation2 + $0x18] sm:$0xff] %vm4414_vm9, %v2292_v47  ;;  %v2331_v47 = vsel %vm4462_vm15, %v5482_v60, 0  ;;  %vm6361_vm13 = vmmov %vm6359_vm5 }
 0x89f   : > { %v2281_v8 = vpop.permute.xlu0 %2280 }
 0x8a0   : > { %v2287_v1 = vrot.slane %v2281_v8, 4 }
 0x8a1   : > { %v3894_v36 = vld [vmem:[#allocation2 + $0x20] sm:$0xf] }
 0x8a2   : > { %v2291_v56 = vsel %vm6354_vm7, %v2287_v1, %v2281_v8  ;;  %2305 = vst.msk [vmem:[#allocation2 + $0x14] sm:$0xf] %vm6355_vm0, %v2287_v1  ;;  %v5433_v33 = vor.u32 %v4025_v41, %v3894_v36  ;;  %v4022_v49 = vld [vmem:[#allocation2 + $0x1c] sm:$0xf]  ;;  %v3886_v59 = vld [vmem:[#allocation2 + $0x18] sm:$0xf]  ;;  %v2483_v36 = vunpack.c.h.b16 %v2330_v45  ;;  %v2484_v41 = vunpack.c.l.b16 %v2331_v47 }
 0x8a3   : > { %2304 = vst.msk [vmem:[#allocation2 + $0xc] sm:$0xff] %vm4414_vm9, %v2291_v56  ;;  %v3891_v48 = vor.u32 %v4022_v49, %v3888_v17  ;;  %v3887_v39 = vor.u32 %v4023_v63, %v3886_v59  ;;  %v5446_v19 = vld [vmem:[#allocation2 + $0x20] sm:$0xf]  ;;  %v5460_v6 = vld [vmem:[#allocation2 + $0x18] sm:$0xff]  ;;  %v2482_v56 = vunpack.c.l.b16 %v2330_v45  ;;  %vm6362_vm7 = vcmask 916480  }
 0x8a4   : > { %2642 = vrot.lane.b32.xlu1 %v5433_v33, %s4203_s29  ;;  %v2335_v38 = vsel %vm4462_vm15, %v5446_v19, 0  ;;  %v2334_v32 = vsel %vm4555_vm14, %v5460_v6, 0  ;;  %v2326_v63 = vsel %vm4580_vm6, %v5460_v6, 0  ;;  %vm6363_vm0 = vcmask 908288  }
 0x8a5   : > { %2640 = vrot.lane.b32.xlu2 %v3891_v48, %s4203_s29  ;;  %v2490_v44 = vunpack.c.l.b16 %v2335_v38  ;;  %v2488_v21 = vunpack.c.l.b16 %v2334_v32  ;;  %v2492_v38 = vunpack.c.h.b16 %v2336_v40  ;;  %v2442_v40 = vunpack.c.l.b16 %v2326_v63 }
 0x8a7   : > { %v2499_v4 = vpack.c.b16 %v2493_v62, %v2490_v44  ;;  %v2497_v31 = vpack.c.b16 %v2491_v0, %v2488_v21  ;;  %v2350_v21 = vsel %vm4404_vm1, %v5460_v6, 0 }
 0x8a8   : > { %v2601_v0 = vunpack.c.h.b16 %v2350_v21 }
 0x8a9   : > { %v5475_v25 = vld [vmem:[#allocation2 + $0x14] sm:$0xf] }
 0x8aa   : > { %v4021_v51 = vld [vmem:[#allocation2 + $0x8] sm:$0xf0]  ;;  %v3876_v54 = vld [vmem:[#allocation2 + $0xc] sm:$0xf0]  ;;  %v2333_v27 = vsel %vm4462_vm15, %v5475_v25, 0 }
 0x8ab   : > { %v3875_v34 = vor.u32 %v4021_v51, %v3874_v50  ;;  %v5440_v18 = vor.u32 %v4020_v61, %v3876_v54  ;;  %v5473_v43 = vld [vmem:[#allocation2 + $0xc] sm:$0xff]  ;;  %v2487_v8 = vunpack.c.l.b16 %v2333_v27  ;;  %v2322_v50 = vsel %vm4580_vm6, %v5477_v42, 0 }
 0x8ac   : > { %2638 = vrot.lane.b32.xlu1 %v3887_v39, %s4203_s29  ;;  %v2332_v11 = vsel %vm4555_vm14, %v5473_v43, 0  ;;  %v2324_v59 = vsel %vm4580_vm6, %v5473_v43, 0  ;;  %v2328_v51 = vsel %vm4580_vm6, %v5462_v3, 0  ;;  %v2489_v61 = vunpack.c.h.b16 %v2334_v32 }
 0x8ad   : > { %2632 = vrot.lane.b32.xlu2 %v3875_v34, %s4203_s29  ;;  %2634 = vrot.lane.b32.xlu0 %v5440_v18, %s4203_s29  ;;  %v2486_v10 = vunpack.c.h.b16 %v2332_v11  ;;  %v2485_v1 = vunpack.c.l.b16 %v2332_v11  ;;  %v2496_v17 = vpack.c.b16 %v2487_v8, %v2484_v41  ;;  %v2443_v54 = vunpack.c.h.b16 %v2326_v63 }
 0x8ae   : > { %v2446_v53 = vunpack.c.h.b16 %v2328_v51  ;;  %v2498_v62 = vpack.c.b16 %v2492_v38, %v2489_v61  ;;  %v2352_v32 = vsel %vm4404_vm1, %v5462_v3, 0  ;;  %v2445_v27 = vunpack.c.l.b16 %v2328_v51 }
 0x8af   : > { %v2495_v49 = vpack.c.b16 %v2486_v10, %v2483_v36  ;;  %v2604_v11 = vunpack.c.h.b16 %v2352_v32  ;;  %v2436_v45 = vunpack.c.l.b16 %v2322_v50  ;;  %v2346_v36 = vsel %vm4404_vm1, %v5477_v42, 0 }
 0x8b0   : > { %v2451_v47 = vpack.c.b16 %v2445_v27, %v2442_v40  ;;  %v2342_v51 = vsel %vm4410_vm4, %v5460_v6, 0  ;;  %v2344_v61 = vsel %vm4410_vm4, %v5462_v3, 0  ;;  %v2327_v40 = vsel %vm4488_vm3, %v5446_v19, 0 }
 0x8b1   : > { %v2610_v10 = vpack.c.b16 %v2604_v11, %v2601_v0  ;;  %v2558_v38 = vunpack.c.h.b16 %v2344_v61  ;;  %v2340_v0 = vsel %vm4410_vm4, %v5473_v43, 0  ;;  %v2329_v11 = vsel %vm4488_vm3, %v5448_v58, 0 }
 0x8b2   : > { %v2551_v27 = vunpack.c.l.b16 %v2340_v0 }
 0x8b4   : > { %2414 = vrot.lane.b32.xlu1 %v3887_v39, %s4202_s28 }
 0x8b5   : > { %2416 = vrot.lane.b32.xlu2 %v3891_v48, %s4202_s28  ;;  %2410 = vrot.lane.b32.xlu0 %v5440_v18, %s4202_s28 }
 0x8bc   : > { %2510 = vrot.lane.b32.xlu1 %v2499_v4, %s4204_s30  ;;  %v2452_v4 = vpack.c.b16 %v2446_v53, %v2443_v54  ;;  %v2555_v54 = vunpack.c.h.b16 %v2342_v51  ;;  %v4024_v53 = vld [vmem:[#allocation2 + $0x10] sm:$0xf0] }
 0x8bd   : > { %2408 = vrot.lane.b32.xlu2 %v3875_v34, %s4202_s28  ;;  %2528 = vrot.lane.b32.xlu0 %v3891_v48, %s4209_s8  ;;  %v2494_v48 = vpack.c.b16 %v2485_v1, %v2482_v56  ;;  %v2348_v1 = vsel %vm4404_vm1, %v5473_v43, 0 }
 0x8be   : > { %v2597_v41 = vunpack.c.l.b16 %v2348_v1  ;;  %v2598_v56 = vunpack.c.h.b16 %v2348_v1 }
 0x8c4   : > { %2506 = vrot.lane.b32.xlu1 %v2497_v31, %s4204_s30  ;;  %v2439_v31 = vunpack.c.l.b16 %v2324_v59 }
 0x8c5   : > { %2526 = vrot.lane.b32.xlu2 %v3887_v39, %s4209_s8  ;;  %2520 = vrot.lane.b32.xlu0 %v3875_v34, %s4209_s8  ;;  %v2440_v39 = vunpack.c.h.b16 %v2324_v59  ;;  %v2437_v34 = vunpack.c.h.b16 %v2322_v50  ;;  %v2603_v59 = vunpack.c.l.b16 %v2352_v32 }
 0x8c6   : > { %v2448_v8 = vpack.c.b16 %v2439_v31, %v2436_v45  ;;  %v2338_v31 = vsel %vm4410_vm4, %v5477_v42, 0  ;;  %v2444_v45 = vunpack.c.l.b16 %v2327_v40 }
 0x8c7   : > { %v2449_v44 = vpack.c.b16 %v2440_v39, %v2437_v34  ;;  %v2554_v34 = vunpack.c.l.b16 %v2342_v51 }
 0x8cc   : > { %2502 = vrot.lane.b32.xlu1 %v2495_v49, %s4204_s30  ;;  %v2600_v49 = vunpack.c.l.b16 %v2350_v21 }
 0x8cd   : > { %2504 = vrot.lane.b32.xlu2 %v2496_v17, %s4204_s30  ;;  %2500 = vrot.lane.b32.xlu0 %v2494_v48, %s4204_s30  ;;  %v2594_v17 = vunpack.c.l.b16 %v2346_v36  ;;  %v2595_v48 = vunpack.c.h.b16 %v2346_v36  ;;  %v2351_v36 = vsel %vm4520_vm2, %v5446_v19, 0 }
 0x8ce   : > { %v2609_v39 = vpack.c.b16 %v2603_v59, %v2600_v49  ;;  %v2602_v49 = vunpack.c.l.b16 %v2351_v36  ;;  %v2552_v59 = vunpack.c.h.b16 %v2340_v0  ;;  %v2360_v36 = vsel %vm6357_vm12, %v5462_v3, 0 }
 0x8cf   : > { %v2606_v63 = vpack.c.b16 %v2597_v41, %v2594_v17  ;;  %v2607_v50 = vpack.c.b16 %v2598_v56, %v2595_v48  ;;  %v2325_v41 = vsel %vm4488_vm3, %v5475_v25, 0  ;;  %v2353_v56 = vsel %vm4520_vm2, %v5448_v58, 0 }
 0x8d0   : > { %v2323_v17 = vsel %vm4488_vm3, %v5482_v60, 0  ;;  %v2441_v48 = vunpack.c.l.b16 %v2325_v41 }
 0x8d4   : > { %2456 = vrot.lane.b32.xlu1 %v2449_v44, %s4205_s4  ;;  %v2557_v44 = vunpack.c.l.b16 %v2344_v61 }
 0x8d5   : > { %2508 = vrot.lane.b32.xlu2 %v2498_v62, %s4204_s30  ;;  %2462 = vrot.lane.b32.xlu0 %v2452_v4, %s4205_s4  ;;  %v2564_v62 = vpack.c.b16 %v2558_v38, %v2555_v54  ;;  %v3882_v4 = vld [vmem:[#allocation2 + $0x8] sm:$0xf]  ;;  %v2343_v54 = vsel %vm6356_vm10, %v5446_v19, 0  ;;  %v2345_v38 = vsel %vm6356_vm10, %v5448_v58, 0 }
 0x8d6   : > { %v5538_v21 = vor.u32 %v4024_v53, %v3882_v4  ;;  %v2563_v32 = vpack.c.b16 %v2557_v44, %v2554_v34  ;;  %v2349_v34 = vsel %vm4520_vm2, %v5475_v25, 0  ;;  %v2347_v53 = vsel %vm4520_vm2, %v5482_v60, 0 }
 0x8d7   : > { %v2599_v4 = vunpack.c.l.b16 %v2349_v34  ;;  %v2596_v0 = vunpack.c.l.b16 %v2347_v53 }
 0x8dc   : > { %2620 = vrot.lane.b32.xlu1 %v2610_v10, %s4207_s6  ;;  %v2548_v10 = vunpack.c.l.b16 %v2338_v31 }
 0x8dd   : > { %2460 = vrot.lane.b32.xlu2 %v2451_v47, %s4205_s4  ;;  %2454 = vrot.lane.b32.xlu0 %v2448_v8, %s4205_s4  ;;  %v2447_v47 = vunpack.c.l.b16 %v2329_v11  ;;  %v2341_v11 = vsel %vm6356_vm10, %v5475_v25, 0 }
 0x8de   : > { %v2560_v8 = vpack.c.b16 %v2551_v27, %v2548_v10  ;;  %v2339_v27 = vsel %vm6356_vm10, %v5482_v60, 0 }
 0x8df   : > { %v2453_v1 = vpack.c.b16 %v2447_v47, %v2444_v45  ;;  %v2553_v45 = vunpack.c.l.b16 %v2341_v11  ;;  %v2550_v47 = vunpack.c.l.b16 %v2339_v27 }
 0x8e4   : > { %2612 = vrot.lane.b32.xlu1 %v2606_v63, %s4207_s6  ;;  %v2438_v63 = vunpack.c.l.b16 %v2323_v17  ;;  %v2669_v17 = vunpack.c.l.b16 %v2360_v36 }
 0x8e5   : > { %2614 = vrot.lane.b32.xlu2 %v2607_v50, %s4207_s6  ;;  %2618 = vrot.lane.b32.xlu0 %v2609_v39, %s4207_s6  ;;  %v2549_v50 = vunpack.c.h.b16 %v2338_v31  ;;  %v2608_v31 = vpack.c.b16 %v2599_v4, %v2596_v0 }
 0x8e6   : > { %v2450_v51 = vpack.c.b16 %v2441_v48, %v2438_v63  ;;  %v2670_v48 = vunpack.c.h.b16 %v2360_v36  ;;  %v2356_v63 = vsel %vm6357_vm12, %v5473_v43, 0 }
 0x8e7   : > { %v2561_v61 = vpack.c.b16 %v2552_v59, %v2549_v50  ;;  %v2354_v50 = vsel %vm6357_vm12, %v5477_v42, 0 }
 0x8e8   : > { %v2660_v53 = vunpack.c.l.b16 %v2354_v50 }
 0x8ec   : > { %2574 = vrot.lane.b32.xlu1 %v2564_v62, %s4206_s5  ;;  %v2556_v62 = vunpack.c.l.b16 %v2343_v54 }
 0x8ed   : > { %2636 = vrot.lane.b32.xlu2 %v5538_v21, %s4203_s29  ;;  %2572 = vrot.lane.b32.xlu0 %v2563_v32, %s4206_s5  ;;  %v2559_v32 = vunpack.c.l.b16 %v2345_v38 }
 0x8ef   : > { %v2565_v40 = vpack.c.b16 %v2559_v32, %v2556_v62  ;;  %v2661_v62 = vunpack.c.h.b16 %v2354_v50 }
 0x8f4   : > { %2522 = vrot.lane.b32.xlu1 %v5440_v18, %s4209_s8  ;;  %v2605_v18 = vunpack.c.l.b16 %v2353_v56 }
 0x8f5   : > { %2566 = vrot.lane.b32.xlu2 %v2560_v8, %s4206_s5  ;;  %2464 = vrot.lane.b32.xlu0 %v2453_v1, %s4205_s4  ;;  %v2562_v8 = vpack.c.b16 %v2553_v45, %v2550_v47  ;;  %v2358_v1 = vsel %vm6357_vm12, %v5460_v6, 0 }
 0x8f6   : > { %v2611_v39 = vpack.c.b16 %v2605_v18, %v2602_v49  ;;  %v2666_v41 = vunpack.c.l.b16 %v2358_v1  ;;  %v2667_v49 = vunpack.c.h.b16 %v2358_v1 }
 0x8f8   : > { %v2675_v59 = vpack.c.b16 %v2669_v17, %v2666_v41  ;;  %v2676_v18 = vpack.c.b16 %v2670_v48, %v2667_v49 }
 0x8fc   : > { %2622 = vrot.lane.b32.xlu1 %v2611_v39, %s4207_s6 }
 0x8fd   : > { %2458 = vrot.lane.b32.xlu2 %v2450_v51, %s4205_s4  ;;  %2568 = vrot.lane.b32.xlu0 %v2561_v61, %s4206_s5  ;;  %v2663_v51 = vunpack.c.l.b16 %v2356_v63  ;;  %v2361_v61 = vsel %vm6358_vm8, %v5448_v58, 0 }
 0x8ff   : > { %v2641_v44 = vpop.permute.xlu2 %2640  ;;  %v2672_v4 = vpack.c.b16 %v2663_v51, %v2660_v53 }
 0x904   : > { %2418 = vrot.lane.b32.xlu1 %v5433_v33, %s4202_s28 }
 0x905   : > { %2576 = vrot.lane.b32.xlu2 %v2565_v40, %s4206_s5  ;;  %2616 = vrot.lane.b32.xlu0 %v2608_v31, %s4207_s6  ;;  %v2357_v40 = vsel %vm6358_vm8, %v5475_v25, 0  ;;  %v2355_v31 = vsel %vm6358_vm8, %v5482_v60, 0 }
 0x906   : > { %v2665_v47 = vunpack.c.l.b16 %v2357_v40 }
 0x907   : > { %v2633_v10 = vpop.permute.xlu2 %2632 }
 0x90c   : > { %2570 = vrot.lane.b32.xlu1 %v2562_v8, %s4206_s5  ;;  %v2662_v8 = vunpack.c.l.b16 %v2355_v31 }
 0x90d   : > { %2530 = vrot.lane.b32.xlu2 %v5433_v33, %s4209_s8  ;;  %2412 = vrot.lane.b32.xlu0 %v5538_v21, %s4202_s28  ;;  %v2359_v33 = vsel %vm6358_vm8, %v5446_v19, 0  ;;  %v2664_v19 = vunpack.c.h.b16 %v2356_v63 }
 0x90e   : > { %v2668_v38 = vunpack.c.l.b16 %v2359_v33  ;;  %v2674_v1 = vpack.c.b16 %v2665_v47, %v2662_v8 }
 0x90f   : > { %v5608_v56 = vpop.permute.xlu2 %2416  ;;  %v2673_v32 = vpack.c.b16 %v2664_v19, %v2661_v62 }
 0x914   : > { %2684 = vrot.lane.b32.xlu1 %v2675_v59, %s4208_s7 }
 0x915   : > { %2686 = vrot.lane.b32.xlu2 %v2676_v18, %s4208_s7  ;;  %2524 = vrot.lane.b32.xlu0 %v5538_v21, %s4209_s8  ;;  %v2671_v21 = vunpack.c.l.b16 %v2361_v61 }
 0x916   : > { %v2643_v39 = vpop.permute.xlu1 %2642 }
 0x917   : > { %v5627_v54 = vsel %vm6359_vm5, %v2641_v44, %v2643_v39  ;;  %v5629_v34 = vpop.permute.xlu2 %2408  ;;  %v2677_v0 = vpack.c.b16 %v2671_v21, %v2668_v38  ;;  %vm6364_vm5 = vmmov %vm6362_vm7 }
 0x91c   : > { %2678 = vrot.lane.b32.xlu1 %v2672_v4, %s4208_s7 }
 0x91d   : > { %2680 = vrot.lane.b32.xlu2 %v2673_v32, %s4208_s7  ;;  %2688 = vrot.lane.b32.xlu0 %v2677_v0, %s4208_s7 }
 0x91e   : > { %v2639_v58 = vpop.permute.xlu1 %2638 }
 0x91f   : > { %v2646_v11 = vsel %vm6360_vm11, %v2639_v58, %v2641_v44  ;;  %v5641_v27 = vpop.permute.xlu0 %2634  ;;  %v2527_v45 = vpop.permute.xlu2 %2526  ;;  %vm6365_vm11 = vmmov %vm6364_vm5 }
 0x920   : > { %2762 = vmatpush.bf16.msrb.mxu0 %v2646_v11  ;;  %v2644_v25 = vsel %vm6361_vm13, %v2633_v10, %v5641_v27  ;;  %vm6366_vm13 = vmmov %vm6364_vm5 }
 0x924   : > { %2763 = vmatpush.bf16.msrb.mxu0 %v2644_v25 }
 0x925   : > { %2682 = vrot.lane.b32.xlu0 %v2674_v1, %s4208_s7 }
 0x926   : > { %v2415_v36 = vpop.permute.xlu1 %2414 }
 0x927   : > { %v5646_v41 = vpop.permute.xlu0 %2410  ;;  %v2505_v49 = vpop.permute.xlu2 %2504 }
 0x92e   : > { %v2511_v60 = vpop.permute.xlu1 %2510 }
 0x92f   : > { %v5648_v17 = vpop.permute.xlu0 %2528  ;;  %v2509_v44 = vpop.permute.xlu2 %2508 }
 0x930   : > { %v2515_v48 = vsel %vm6362_vm7, %v2509_v44, %v2511_v60  ;;  %v5653_v59 = vsel %vm6363_vm0, %v2527_v45, %v5648_v17  ;;  %vm6367_vm7 = vcmask 1031168  }
 0x931   : > { %2800 = vmatpush.bf16.msrb.mxu3 %v2515_v48  ;;  %vm6368_vm0 = vmmov %vm6367_vm7 }
 0x936   : > { %v2507_v10 = vpop.permute.xlu1 %2506 }
 0x937   : > { %v2514_v18 = vsel %vm6364_vm5, %v2507_v10, %v2509_v44  ;;  %v5656_v63 = vpop.permute.xlu0 %2520  ;;  %v2461_v33 = vpop.permute.xlu2 %2460  ;;  %vm6369_vm5 = vcmask 1039360   ;;  %v3906_v44 = vld [vmem:[%s6239_s2 + $0x60] sm:$0xf] }
 0x938   : > { %2743 = vmatpush.bf16.msrb.mxu2 %v2514_v18  ;;  %v2422_v40 = vsel %vm6369_vm5, %v2415_v36, %v5608_v56 }
 0x93e   : > { %v2503_v50 = vpop.permute.xlu1 %2502 }
 0x93f   : > { %v2501_v39 = vpop.permute.xlu0 %2500  ;;  %v2513_v51 = vsel %vm6365_vm11, %v2503_v50, %v2505_v49  ;;  %v5660_v53 = vpop.permute.xlu2 %2614  ;;  %vm6370_vm11 = vnez %v6272_v9 }
 0x940   : > { %2801 = vmatpush.bf16.msrb.mxu3 %v2513_v51  ;;  %v2512_v61 = vsel %vm6366_vm13, %v2501_v39, %v2503_v50  ;;  %v5669_v58 = vsel %vm6370_vm11, %v5460_v6, 0  ;;  %v5674_v11 = vsel %vm6370_vm11, %v5462_v3, 0  ;;  %vm6371_vm13 = vmmov %vm6369_vm5  ;;  %v5684_v6 = vsel %vm6370_vm11, %v5473_v43, 0 }
 0x941   : > { %2744 = vmatpush.bf16.msrb.mxu2 %v2512_v61  ;;  %v2370_v47 = vunpack.c.l.b16 %v5669_v58  ;;  %v2420_v8 = vsel %vm6371_vm13, %v5629_v34, %v5646_v41  ;;  %v2372_v1 = vunpack.c.l.b16 %v5674_v11  ;;  %v5690_v3 = vsel %vm6370_vm11, %v5477_v42, 0  ;;  %v4027_v42 = vld [vmem:[%s6239_s2 + $0x68] sm:$0xf0] }
 0x942   : > { %v2368_v49 = vunpack.c.l.b16 %v5684_v6  ;;  %v2366_v43 = vunpack.c.l.b16 %v5690_v3  ;;  %vm6374_vm5 = vcmask 900096   ;;  %v5703_v50 = vor.u32 %v4027_v42, %v3906_v44 }
 0x943   : > { %v2376_v36 = vpack.c.b16 %v2372_v1, %v2370_v47  ;;  %vm6375_vm13 = vcmask 777216  }
 0x944   : > { %v2374_v18 = vpack.c.b16 %v2368_v49, %v2366_v43 }
 0x946   : > { %v2457_v19 = vpop.permute.xlu1 %2456 }
 0x947   : > { %v2463_v38 = vpop.permute.xlu0 %2462  ;;  %v2637_v0 = vpop.permute.xlu2 %2636 }
 0x948   : > { %v2468_v62 = vsel %vm6367_vm7, %v2461_v33, %v2463_v38  ;;  %vm6372_vm7 = vcmask 785408   ;;  %v2645_v39 = vsel %vm6375_vm13, %v5641_v27, %v2637_v0  ;;  %vm6379_vm13 = vcmask 900096  }
 0x949   : > { %2745 = vmatpush.bf16.msrb.mxu2 %v2468_v62  ;;  %vm6382_vm8 = vmmov %vm6379_vm13 }
 0x94e   : > { %v2621_v21 = vpop.permute.xlu1 %2620 }
 0x94f   : > { %v2455_v4 = vpop.permute.xlu0 %2454  ;;  %v2567_v34 = vpop.permute.xlu2 %2566 }
 0x950   : > { %v2466_v32 = vsel %vm6368_vm0, %v2455_v4, %v2457_v19  ;;  %vm6373_vm0 = vmmov %vm6372_vm7 }
 0x951   : > { %2746 = vmatpush.bf16.msrb.mxu2 %v2466_v32 }
 0x955   : > { %2747 = vmatpush.bf16.msrb.mxu2 %v2422_v40  ;;  %v3918_v40 = vld [vmem:[%s6239_s2 + $0x78] sm:$0xf] }
 0x956   : > { %v2613_v31 = vpop.permute.xlu1 %2612 }
 0x957   : > { %v2619_v45 = vpop.permute.xlu0 %2618  ;;  %v2624_v60 = vsel %vm6373_vm0, %v2613_v31, %v5660_v53  ;;  %v2459_v51 = vpop.permute.xlu2 %2458 }
 0x958   : > { %v2626_v25 = vsel %vm6372_vm7, %v2619_v45, %v2621_v21  ;;  %vm6376_vm7 = vcmask 1031168  }
 0x959   : > { %2748 = vmatpush.bf16.msrb.mxu2 %v2420_v8  ;;  %2764 = vmatpush.bf16.msrb.mxu0 %v2626_v25  ;;  %vm6377_vm0 = vmmov %vm6376_vm7  ;;  %v3908_v8 = vld [vmem:[%s6239_s2 + $0x6c] sm:$0xf0] }
 0x95a   : > { %v2467_v32 = vsel %vm6377_vm0, %v2457_v19, %v2459_v51  ;;  %v4026_v19 = vld [vmem:[%s6239_s2 + $0x64] sm:$0xf]  ;;  %vm6381_vm0 = vcmask 908288  }
 0x95b   : > { %v3911_v49 = vor.u32 %v4026_v19, %v3908_v8  ;;  %v4031_v19 = vld [vmem:[%s6239_s2 + $0x88] sm:$0xf0] }
 0x95d   : > { %2749 = vmatpush.bf16.msrb.mxu2 %v2376_v36  ;;  %2765 = vmatpush.bf16.msrb.mxu0 %v2624_v60 }
 0x95e   : > { %v2575_v48 = vpop.permute.xlu1 %2574 }
 0x95f   : > { %v2573_v10 = vpop.permute.xlu0 %2572  ;;  %v2577_v45 = vpop.permute.xlu2 %2576 }
 0x960   : > { %v2580_v33 = vsel %vm6374_vm5, %v2573_v10, %v2575_v48  ;;  %vm6378_vm5 = vcmask 785408   ;;  %v2581_v60 = vsel %vm6379_vm13, %v2575_v48, %v2577_v45 }
 0x961   : > { %2750 = vmatpush.bf16.msrb.mxu2 %v2374_v18  ;;  %2766 = vmatpush.bf16.msrb.mxu0 %v2580_v33  ;;  %v2369_v18 = vunpack.c.h.b16 %v5684_v6 }
 0x964   : > { %2751 = vmatmul.bf16.vlgmr.msrb.gmra.mxu2 %v5703_v50 }
 0x965   : > { %2819 = vmatpush.bf16.msra.mxu2 %v5627_v54  ;;  %v4030_v54 = vld [vmem:[%s6239_s2 + $0x80] sm:$0xf0] }
 0x966   : > { %v2523_v61 = vpop.permute.xlu1 %2522  ;;  %v5719_v47 = vor.u32 %v4030_v54, %v3918_v40 }
 0x967   : > { %v2465_v62 = vpop.permute.xlu0 %2464  ;;  %v2532_v36 = vsel %vm6381_vm0, %v5656_v63, %v2523_v61 }
 0x968   : > { %v2469_v4 = vsel %vm6376_vm7, %v2463_v38, %v2465_v62  ;;  %vm6380_vm7 = vcmask 1039360  }
 0x969   : > { %2820 = vmatpush.bf16.msra.mxu2 %v2645_v39  ;;  %2802 = vmatpush.bf16.msrb.mxu3 %v2469_v4  ;;  %v2367_v39 = vunpack.c.h.b16 %v5690_v3  ;;  %v3914_v3 = vld [vmem:[%s6239_s2 + $0x68] sm:$0xf] }
 0x96b   : > { %v2375_v62 = vpack.c.b16 %v2369_v18, %v2367_v39 }
 0x96d   : > { %2803 = vmatpush.bf16.msrb.mxu3 %v2467_v32  ;;  %v4028_v32 = vld [vmem:[%s6239_s2 + $0x70] sm:$0xf0] }
 0x96e   : > { %v2623_v31 = vpop.permute.xlu1 %2622 }
 0x96f   : > { %v2569_v27 = vpop.permute.xlu0 %2568  ;;  %v2627_v0 = vsel %vm6378_vm5, %v2621_v21, %v2623_v31 }
 0x970   : > { %2821 = vmatpush.bf16.msra.mxu2 %v2627_v0  ;;  %v2578_v38 = vsel %vm6379_vm13, %v2567_v34, %v2569_v27  ;;  %v2531_v34 = vpop.permute.xlu2 %2530 }
 0x971   : > { %2767 = vmatpush.bf16.msrb.mxu0 %v2578_v38  ;;  %v2535_v48 = vsel %vm6381_vm0, %v5648_v17, %v2531_v34  ;;  %v3926_v38 = vld [vmem:[%s6239_s2 + $0x80] sm:$0xf] }
 0x972   : > { %v3927_v8 = vor.u32 %v4031_v19, %v3926_v38  ;;  %v4173_v38 = vld [vmem:[%s4262_s21 + $0x10] sm:$0xff]  ;;  %v4174_v19 = vld [vmem:[%s4262_s21 + $0x58] sm:$0xff] }
 0x974   : > { %2756 = vmatmul.bf16.gmra.mxu2 %v5719_v47 }
 0x975   : > { %2768 = vmatpush.bf16.msrb.mxu0 %v5653_v59 }
 0x976   : > { %v2419_v21 = vpop.permute.xlu1 %2418 }
 0x977   : > { %v2617_v25 = vpop.permute.xlu0 %2616  ;;  %v2423_v1 = vsel %vm6380_vm7, %v5608_v56, %v2419_v21  ;;  %v2371_v56 = vunpack.c.h.b16 %v5669_v58  ;;  %v4029_v58 = vld [vmem:[%s6239_s2 + $0x7c] sm:$0xf] }
 0x978   : > { %2804 = vmatpush.bf16.msrb.mxu3 %v2423_v1  ;;  %v2625_v59 = vsel %vm6378_vm5, %v5660_v53, %v2617_v25  ;;  %v2373_v53 = vunpack.c.h.b16 %v5674_v11  ;;  %v2687_v33 = vpop.permute.xlu2 %2686  ;;  %vm6384_vm5 = vmmov %vm6381_vm0  ;;  %vm6387_vm0 = vcmask 261120  }
 0x979   : > { %2769 = vmatpush.bf16.msrb.mxu0 %v2532_v36  ;;  %2822 = vmatpush.bf16.msra.mxu2 %v2625_v59 }
 0x97a   : > { %v2377_v10 = vpack.c.b16 %v2373_v53, %v2371_v56 }
 0x97c   : > { %2770 = vmatmul.bf16.vlgmr.msrb.gmra.mxu0 %v3911_v49 }
 0x97d   : > { %2823 = vmatpush.bf16.msra.mxu2 %v2581_v60 }
 0x97e   : > { %v2571_v43 = vpop.permute.xlu1 %2570 }
 0x97f   : > { %v2413_v44 = vpop.permute.xlu0 %2412  ;;  %v2579_v42 = vsel %vm6382_vm8, %v2569_v27, %v2571_v43  ;;  %vm6383_vm8 = vcmask 769024   ;;  %v3915_v27 = vor.u32 %v4028_v32, %v3914_v3 }
 0x980   : > { %v2421_v63 = vsel %vm6380_vm7, %v5646_v41, %v2413_v44  ;;  %v3920_v41 = vld [vmem:[%s6239_s2 + $0x84] sm:$0xf0]  ;;  %v2681_v40 = vpop.permute.xlu2 %2680  ;;  %vm6385_vm13 = vmmov %vm6383_vm8 }
 0x981   : > { %2805 = vmatpush.bf16.msrb.mxu3 %v2421_v63  ;;  %2824 = vmatpush.bf16.msra.mxu2 %v2579_v42  ;;  %v3923_v4 = vor.u32 %v4029_v58, %v3920_v41  ;;  %vm6386_vm7 = vmmov %vm6383_vm8  ;;  %v4212_v63 = vmov 3  }
 0x982   : > { %4092 = vset.pattern.permute.xlu1 %v4212_v63  ;;  %4091 = vset.pattern.permute.xlu2 %v4212_v63 }
 0x983   : > { %4093 = vset.pattern.permute.xlu0 %v4212_v63 }
 0x985   : > { %2806 = vmatpush.bf16.msrb.mxu3 %v2377_v10  ;;  %2825 = vmatpush.bf16.msra.mxu2 %v2535_v48 }
 0x986   : > { %v2685_v11 = vpop.permute.xlu1 %2684 }
 0x987   : > { %v2692_v51 = vsel %vm6383_vm8, %v2685_v11, %v2687_v33  ;;  %v2525_v6 = vpop.permute.xlu0 %2524  ;;  %vm6388_vm8 = vmmov %vm6386_vm7 }
 0x988   : > { %2787 = vmatpush.bf16.msrb.mxu1 %v2692_v51  ;;  %v2533_v17 = vsel %vm6384_vm5, %v2523_v61, %v2525_v6  ;;  %vm6389_vm5 = vmmov %vm6387_vm0 }
 0x989   : > { %2807 = vmatpush.bf16.msrb.mxu3 %v2375_v62  ;;  %2826 = vmatpush.bf16.msra.mxu2 %v2533_v17 }
 0x98c   : > { %2775 = vmatmul.bf16.gmra.mxu0 %v3923_v4  ;;  %2808 = vmatmul.bf16.vlgmr.msrb.gmra.mxu3 %v5703_v50 }
 0x98d   : > { %2827 = vmatmul.bf16.vlgmr.msra.gmra.mxu2 %v3911_v49 }
 0x98e   : > { %v2679_v54 = vpop.permute.xlu1 %2678 }
 0x98f   : > { %v2689_v31 = vpop.permute.xlu0 %2688  ;;  %v2690_v61 = vsel %vm6385_vm13, %v2679_v54, %v2681_v40  ;;  %vm6390_vm13 = vmmov %vm6387_vm0 }
 0x990   : > { %v2693_v0 = vsel %vm6386_vm7, %v2687_v33, %v2689_v31  ;;  %2788 = vmatpush.bf16.msrb.mxu1 %v2690_v61  ;;  %vm6391_vm7 = vmmov %vm6387_vm0 }
 0x991   : > { %2844 = vmatpush.bf16.msra.mxu0 %v2693_v0 }
 0x993   : > { %3928 = vmatmul.msk.bf16.vlgmr.msrb.gmra.mxu1 %vm6387_vm0, %v3915_v27 }
 0x997   : > { %v2683_v50 = vpop.permute.xlu0 %2682 }
 0x998   : > { %v2691_v45 = vsel %vm6388_vm8, %v2681_v40, %v2683_v50 }
 0x999   : > { %2845 = vmatpush.bf16.msra.mxu0 %v2691_v45  ;;  %v4172_v45 = vld [vmem:[%s4262_s21 + $0x18] sm:$0xff] }
 0x99c   : > { %3930 = vmatmul.msk.bf16.vlgmr.msra.gmra.mxu0 %vm6389_vm5, %v3915_v27  ;;  %2813 = vmatmul.bf16.gmra.mxu3 %v5719_v47 }
 0x99d   : > { %2832 = vmatmul.bf16.gmra.mxu2 %v3923_v4 }
 0x9a3   : > { %3929 = vmatmul.msk.bf16.gmra.mxu1 %vm6390_vm13, %v3927_v8 }
 0x9ac   : > { %3931 = vmatmul.msk.bf16.gmra.mxu0 %vm6391_vm7, %v3927_v8  ;;  %v4175_v8 = vld [vmem:[%s4262_s21 + $0x50] sm:$0xff] }
 0x9e7   : > { %v2752_v21 = vpop.f32.mrf.mxu2 }
 0x9ef   : > { %v2754_v25 = vpop.f32.mrf.mxu2 }
 0x9f7   : > { %v2757_v36 = vpop.f32.mrf.mxu2 }
 0x9f9   : > { %v2771_v1 = vpop.f32.mrf.mxu0 }
 0x9fa   : > { %v2772_v53 = vadd.f32 %v2771_v1, %v2752_v21 }
 0x9ff   : > { %v2759_v49 = vpop.f32.mrf.mxu2 }
 0xa01   : > { %v2773_v59 = vpop.f32.mrf.mxu0 }
 0xa02   : > { %v2774_v11 = vadd.f32 %v2773_v59, %v2754_v25 }
 0xa09   : > { %v2776_v34 = vpop.f32.mrf.mxu0 }
 0xa0a   : > { %v2777_v31 = vadd.f32 %v2776_v34, %v2757_v36 }
 0xa0f   : > { %v2809_v60 = vpop.f32.mrf.mxu3 }
 0xa10   : > { %v2828_v43 = vpop.f32.mrf.mxu2  ;;  %v2790_v56 = vpop.f32.mrf.mxu1 }
 0xa11   : > { %v2778_v44 = vpop.f32.mrf.mxu0  ;;  %v2829_v47 = vadd.f32 %v2828_v43, %v2809_v60  ;;  %v2791_v18 = vadd.f32 %v2790_v56, %v2772_v53  ;;  %v4176_v43 = vld [vmem:[%s4262_s21] sm:$0xff] }
 0xa12   : > { %v2779_v42 = vadd.f32 %v2778_v44, %v2759_v49 }
 0xa17   : > { %v2811_v48 = vpop.f32.mrf.mxu3 }
 0xa18   : > { %v2830_v39 = vpop.f32.mrf.mxu2  ;;  %v2792_v41 = vpop.f32.mrf.mxu1 }
 0xa19   : > { %v2847_v10 = vpop.f32.mrf.mxu0  ;;  %v2831_v51 = vadd.f32 %v2830_v39, %v2811_v48  ;;  %v2793_v62 = vadd.f32 %v2792_v41, %v2774_v11 }
 0xa1a   : > { %v2848_v33 = vadd.f32 %v2847_v10, %v2829_v47 }
 0xa1c   : > { %v2857_v58 = vadd.f32 %v2848_v33, %v2791_v18 }
 0xa1e   : > { %2858 = vadd.xlane.f32.xlu1 %v2857_v58 }
 0xa1f   : > { %v2814_v4 = vpop.f32.mrf.mxu3 }
 0xa20   : > { %v2833_v3 = vpop.f32.mrf.mxu2  ;;  %v2795_v54 = vpop.f32.mrf.mxu1 }
 0xa21   : > { %v2849_v6 = vpop.f32.mrf.mxu0  ;;  %v2834_v40 = vadd.f32 %v2833_v3, %v2814_v4  ;;  %v2796_v27 = vadd.f32 %v2795_v54, %v2777_v31 }
 0xa22   : > { %v2850_v17 = vadd.f32 %v2849_v6, %v2831_v51 }
 0xa24   : > { %v2860_v32 = vadd.f32 %v2850_v17, %v2793_v62 }
 0xa26   : > { %2861 = vadd.xlane.f32.xlu2 %v2860_v32 }
 0xa27   : > { %v2816_v21 = vpop.f32.mrf.mxu3 }
 0xa28   : > { %v2835_v25 = vpop.f32.mrf.mxu2  ;;  %v2797_v49 = vpop.f32.mrf.mxu1 }
 0xa29   : > { %v2852_v61 = vpop.f32.mrf.mxu0  ;;  %v2836_v1 = vadd.f32 %v2835_v25, %v2816_v21  ;;  %v2798_v34 = vadd.f32 %v2797_v49, %v2779_v42 }
 0xa2a   : > { %v2853_v0 = vadd.f32 %v2852_v61, %v2834_v40 }
 0xa2c   : > { %v2863_v50 = vadd.f32 %v2853_v0, %v2796_v27 }
 0xa2e   : > { %2864 = vadd.xlane.f32.xlu0 %v2863_v50 }
 0xa31   : > { %v2854_v59 = vpop.f32.mrf.mxu0 }
 0xa32   : > { %v2855_v36 = vadd.f32 %v2854_v59, %v2836_v1 }
 0xa34   : > { %v2866_v60 = vadd.f32 %v2855_v36, %v2798_v34 }
 0xa37   : > { %3045 = vperm.xlu1 %4092, %v4172_v45  }
 0xa3e   : > { %3041 = vperm.xlu2 %4091, %v4173_v38  }
 0xa42   : > { %3069 = vperm.xlu0 %4093, %v4174_v19  }
 0xa46   : > { %3065 = vperm.xlu2 %4091, %v4175_v8  }
 0xa61   : > { %2867 = vadd.xlane.f32.xlu1 %v2866_v60 }
 0xa7a   : > { %3033 = vperm.xlu1 %4092, %v4176_v43  }
 0xa91   : > { %v2859_v44 = vpop.xlane.xlu1 %2858 }
 0xa92   : > { %v2869_v56 = vmul.f32 %v2859_v44, %v4277_v24 }
 0xa94   : > { %v5781_v53 = vsub.f32 %v2791_v18, %v2869_v56  ;;  %v5783_v10 = vsub.f32 %v2848_v33, %v2869_v56 }
 0xa96   : > { %v2924_v41 = vmul.f32 %v5781_v53, %v5781_v53  ;;  %v2925_v11 = vmul.f32 %v5783_v10, %v5783_v10 }
 0xa98   : > { %v2932_v6 = vadd.f32 %v2925_v11, %v2924_v41 }
 0xa99   : > { %v2862_v63 = vpop.xlane.xlu2 %2861 }
 0xa9a   : > { %v2870_v47 = vmul.f32 %v2862_v63, %v4277_v24 }
 0xa9c   : > { %v5785_v48 = vsub.f32 %v2793_v62, %v2870_v47  ;;  %v5787_v39 = vsub.f32 %v2850_v17, %v2870_v47  ;;  %v2873_v54 = vadd.f32 %v2870_v47, %v2869_v56 }
 0xa9e   : > { %v2926_v42 = vmul.f32 %v5785_v48, %v5785_v48  ;;  %v2927_v58 = vmul.f32 %v5787_v39, %v5787_v39 }
 0xaa0   : > { %v2935_v18 = vadd.f32 %v2927_v58, %v2926_v42 }
 0xaa1   : > { %v2865_v51 = vpop.xlane.xlu0 %2864 }
 0xaa2   : > { %v2871_v33 = vmul.f32 %v2865_v51, %v4277_v24  ;;  %2936 = vadd.xlane.f32.xlu2 %v2935_v18 }
 0xaa4   : > { %2933 = vadd.xlane.f32.xlu1 %v2932_v6  ;;  %v5798_v62 = vsub.f32 %v2796_v27, %v2871_v33  ;;  %v5800_v17 = vsub.f32 %v2853_v0, %v2871_v33  ;;  %v2874_v61 = vadd.f32 %v2873_v54, %v2871_v33 }
 0xaa6   : > { %v2928_v4 = vmul.f32 %v5798_v62, %v5798_v62  ;;  %v2929_v3 = vmul.f32 %v5800_v17, %v5800_v17 }
 0xaa8   : > { %v2938_v32 = vadd.f32 %v2929_v3, %v2928_v4 }
 0xaa9   : > { %v5806_v40 = vpop.permute.xlu1 %3045 }
 0xaaa   : > { %2939 = vadd.xlane.f32.xlu2 %v2938_v32 }
 0xad4   : > { %v2868_v31 = vpop.xlane.xlu1 %2867 }
 0xad5   : > { %v2872_v50 = vmul.f32 %v2868_v31, %v4277_v24 }
 0xad7   : > { %v2875_v45 = vadd.f32 %v2874_v61, %v2872_v50  ;;  %v5809_v27 = vsub.f32 %v2798_v34, %v2872_v50  ;;  %v5811_v0 = vsub.f32 %v2855_v36, %v2872_v50 }
 0xad9   : > { %v2876_v38 = vrot.slane %v2875_v45, 4  ;;  %v2930_v19 = vmul.f32 %v5809_v27, %v5809_v27  ;;  %v2931_v8 = vmul.f32 %v5811_v0, %v5811_v0 }
 0xadb   : > { %v2877_v21 = vadd.f32 %v2876_v38, %v2875_v45  ;;  %v2941_v25 = vadd.f32 %v2931_v8, %v2930_v19 }
 0xadd   : > { %v2878_v1 = vrot.slane %v2877_v21, 2  ;;  %2942 = vadd.xlane.f32.xlu0 %v2941_v25 }
 0xadf   : > { %v2879_v59 = vadd.f32 %v2878_v1, %v2877_v21  ;;  %v4177_v1 = vld [vmem:[%s4262_s21 + $0x38] sm:$0xff] }
 0xae1   : > { %v2880_v49 = vrot.slane %v2879_v59, 1 }
 0xae3   : > { %v2881_v60 = vadd.f32 %v2880_v49, %v2879_v59  ;;  %v4178_v49 = vld [vmem:[%s4262_s21 + $0x30] sm:$0xff] }
 0xae5   : > { %v2882_v43 = vmul.f32 %v2881_v60, %v4315_v5 }
 0xae7   : > { %v2883_v34 = vsub.f32 %v2869_v56, %v2882_v43  ;;  %v2884_v44 = vsub.f32 %v2870_v47, %v2882_v43  ;;  %v2885_v36 = vsub.f32 %v2871_v33, %v2882_v43  ;;  %v2886_v63 = vsub.f32 %v2872_v50, %v2882_v43  ;;  %v4179_v43 = vld [vmem:[%s4262_s21 + $0x20] sm:$0xff] }
 0xae9   : > { %v2887_v42 = vmul.f32 %v2883_v34, %v2883_v34  ;;  %v2888_v58 = vmul.f32 %v2884_v44, %v2884_v44  ;;  %v2889_v41 = vmul.f32 %v2885_v36, %v2885_v36  ;;  %v2890_v18 = vmul.f32 %v2886_v63, %v2886_v63 }
 0xaeb   : > { %v2891_v11 = vadd.f32 %v2888_v58, %v2887_v42 }
 0xaed   : > { %v2892_v51 = vadd.f32 %v2891_v11, %v2889_v41  ;;  %v4180_v41 = vld [vmem:[%s4262_s21 + $0x28] sm:$0xff] }
 0xaef   : > { %v2893_v6 = vadd.f32 %v2892_v51, %v2890_v18  ;;  %v4181_v18 = vld [vmem:[%s4262_s21 + $0x40] sm:$0xff] }
 0xaf1   : > { %v2894_v4 = vrot.slane %v2893_v6, 4 }
 0xaf3   : > { %v2895_v3 = vadd.f32 %v2894_v4, %v2893_v6  ;;  %v5830_v4 = vpop.permute.xlu0 %3069 }
 0xaf5   : > { %v2896_v32 = vrot.slane %v2895_v3, 2 }
 0xaf7   : > { %v2897_v54 = vadd.f32 %v2896_v32, %v2895_v3  ;;  %v5832_v3 = vpop.permute.xlu1 %3033 }
 0xaf9   : > { %v2898_v31 = vrot.slane %v2897_v54, 1 }
 0xafb   : > { %v2899_v61 = vadd.f32 %v2898_v31, %v2897_v54 }
 0xafd   : > { %v2900_v45 = vmul.f32 %v2899_v61, %v4318_v26 }
 0xaff   : > { %v2901_v5 = vadd.f32 1e-05, %v2900_v45 }
 0xb01   : > { %4130 = vrsqrt.f32 %v2901_v5  ;;  %vm2908_vm8 = vweird.f32 %v2901_v5 }
 0xb07   : > { %v4131_v56 = vpop.eup %4130 }
 0xb08   : > { %v2903_v47 = vmul.f32 %v4131_v56, %v2901_v5  ;;  %vm2909_vm0 = vweird.f32 %v4131_v56 }
 0xb09   : > { %vm2910_vm5 = vmor %vm2908_vm8, %vm2909_vm0 }
 0xb0a   : > { %v2904_v33 = vmul.f32 %v4131_v56, %v2903_v47 }
 0xb0c   : > { %v2905_v50 = vmul.f32 0.5, %v2904_v33 }
 0xb0e   : > { %v2906_v38 = vsub.f32 1.5, %v2905_v50 }
 0xb10   : > { %v2907_v19 = vmul.f32 %v4131_v56, %v2906_v38 }
 0xb12   : > { %v2911_v8 = vsel %vm2910_vm5, %v4131_v56, %v2907_v19 }
 0xb13   : > { %v2915_v21 = vmul.f32 %v2911_v8, %v2886_v63  ;;  %v2914_v25 = vmul.f32 %v2911_v8, %v2885_v36  ;;  %v2912_v26 = vmul.f32 %v2911_v8, %v2883_v34  ;;  %v2913_v58 = vmul.f32 %v2911_v8, %v2884_v44  ;;  %v4182_v63 = vld [vmem:[%s4262_s21 + $0x8] sm:$0xff]  ;;  %v5826_v36 = vpop.permute.xlu2 %3041 }
 0xb14   : > { %v4183_v34 = vld [vmem:[%s4262_s21 + $0x48] sm:$0xff] }
 0xb15   : > { %v3003_v59 = vmul.f32 %v4177_v1, %v2915_v21  ;;  %v3002_v60 = vmul.f32 %v4178_v49, %v2914_v25  ;;  %v3000_v42 = vmul.f32 %v4179_v43, %v2912_v26  ;;  %v3001_v11 = vmul.f32 %v4180_v41, %v2913_v58 }
 0xb17   : > { %3021 = vperm.xlu1 %4092, %v3003_v59   ;;  %3016 = vperm.xlu0 %4093, %v3002_v60   ;;  %v2934_v54 = vpop.xlane.xlu1 %2933 }
 0xb18   : > { %3006 = vperm.xlu2 %4091, %v3000_v42   ;;  %v2944_v45 = vmul.f32 %v2934_v54, %v4277_v24 }
 0xb1a   : > { %v2948_v47 = vadd.f32 1e-05, %v2944_v45 }
 0xb1b   : > { %v5828_v51 = vpop.permute.xlu2 %3065 }
 0xb1c   : > { %vm2958_vm12 = vweird.f32 %v2948_v47 }
 0xb1f   : > { %3057 = vperm.xlu0 %4093, %v4181_v18   ;;  %3011 = vperm.xlu1 %4092, %v3001_v11  }
 0xb20   : > { %3037 = vperm.xlu2 %4091, %v4182_v63  }
 0xb23   : > { %v2937_v6 = vpop.xlane.xlu2 %2936 }
 0xb24   : > { %v2945_v33 = vmul.f32 %v2937_v6, %v4277_v24 }
 0xb26   : > { %v2949_v19 = vadd.f32 1e-05, %v2945_v33 }
 0xb27   : > { %3061 = vperm.xlu1 %4092, %v4183_v34  }
 0xb2b   : > { %v2940_v32 = vpop.xlane.xlu2 %2939 }
 0xb2c   : > { %v2946_v31 = vmul.f32 %v2940_v32, %v4277_v24 }
 0xb2e   : > { %v2950_v5 = vadd.f32 1e-05, %v2946_v31 }
 0xb30   : > { %4132 = vrsqrt.f32 %v2950_v5  ;;  %vm2978_vm8 = vweird.f32 %v2950_v5 }
 0xb36   : > { %v4133_v50 = vpop.eup %4132 }
 0xb37   : > { %v2973_v21 = vmul.f32 %v4133_v50, %v2950_v5  ;;  %vm2979_vm13 = vweird.f32 %v4133_v50 }
 0xb38   : > { %vm2980_vm5 = vmor %vm2978_vm8, %vm2979_vm13  ;;  %vm6393_vm13 = vcmask 134144  }
 0xb39   : > { %v2974_v1 = vmul.f32 %v4133_v50, %v2973_v21 }
 0xb3b   : > { %v2975_v43 = vmul.f32 0.5, %v2974_v1 }
 0xb3d   : > { %v2976_v11 = vsub.f32 1.5, %v2975_v43 }
 0xb3f   : > { %v2977_v34 = vmul.f32 %v4133_v50, %v2976_v11 }
 0xb41   : > { %v2981_v54 = vsel %vm2980_vm5, %v4133_v50, %v2977_v34 }
 0xb42   : > { %v2996_v21 = vmul.f32 %v2981_v54, %v5798_v62 }
 0xb50   : > { %v2943_v44 = vpop.xlane.xlu0 %2942 }
 0xb51   : > { %v2947_v61 = vmul.f32 %v2943_v44, %v4277_v24 }
 0xb53   : > { %v2951_v56 = vadd.f32 1e-05, %v2947_v61 }
 0xb55   : > { %4134 = vrsqrt.f32 %v2951_v56  ;;  %vm2988_vm10 = vweird.f32 %v2951_v56 }
 0xb56   : > { %4136 = vrsqrt.f32 %v2948_v47 }
 0xb57   : > { %4138 = vrsqrt.f32 %v2949_v19 }
 0xb5b   : > { %v4135_v38 = vpop.eup %4134 }
 0xb5c   : > { %v4137_v8 = vpop.eup %4136  ;;  %v2983_v25 = vmul.f32 %v4135_v38, %v2951_v56  ;;  %vm2989_vm7 = vweird.f32 %v4135_v38 }
 0xb5d   : > { %v2953_v26 = vmul.f32 %v4137_v8, %v2948_v47  ;;  %v4139_v60 = vpop.eup %4138  ;;  %vm2959_vm0 = vweird.f32 %v4137_v8  ;;  %vm2990_vm3 = vmor %vm2988_vm10, %vm2989_vm7 }
 0xb5e   : > { %v2984_v59 = vmul.f32 %v4135_v38, %v2983_v25  ;;  %v2963_v41 = vmul.f32 %v4139_v60, %v2949_v19  ;;  %vm2960_vm15 = vmor %vm2958_vm12, %vm2959_vm0  ;;  %v2997_v25 = vmul.f32 %v2981_v54, %v5800_v17  ;;  %vm6392_vm12 = vcmask 138240  }
 0xb5f   : > { %v2954_v49 = vmul.f32 %v4137_v8, %v2953_v26  ;;  %vm6394_vm7 = vmmov %vm6392_vm12 }
 0xb60   : > { %v2985_v42 = vmul.f32 0.5, %v2984_v59  ;;  %v2964_v24 = vmul.f32 %v4139_v60, %v2963_v41  ;;  %vm6395_vm0 = vmmov %vm6393_vm13 }
 0xb61   : > { %v2955_v58 = vmul.f32 0.5, %v2954_v49  ;;  %vm6396_vm8 = vmmov %vm6394_vm7 }
 0xb62   : > { %v2986_v18 = vsub.f32 1.5, %v2985_v42  ;;  %v2965_v44 = vmul.f32 0.5, %v2964_v24  ;;  %vm6397_vm5 = vmmov %vm6395_vm0 }
 0xb63   : > { %v2956_v63 = vsub.f32 1.5, %v2955_v58 }
 0xb64   : > { %v2987_v6 = vmul.f32 %v4135_v38, %v2986_v18  ;;  %v2966_v45 = vsub.f32 1.5, %v2965_v44 }
 0xb65   : > { %v2957_v32 = vmul.f32 %v4137_v8, %v2956_v63 }
 0xb66   : > { %v2991_v31 = vsel %vm2990_vm3, %v4135_v38, %v2987_v6  ;;  %v2967_v62 = vmul.f32 %v4139_v60, %v2966_v45  ;;  %vm2968_vm3 = vweird.f32 %v2949_v19 }
 0xb67   : > { %v2961_v61 = vsel %vm2960_vm15, %v4137_v8, %v2957_v32  ;;  %v2998_v26 = vmul.f32 %v2991_v31, %v5809_v27  ;;  %v2999_v5 = vmul.f32 %v2991_v31, %v5811_v0  ;;  %vm2969_vm15 = vweird.f32 %v4139_v60 }
 0xb68   : > { %v2992_v1 = vmul.f32 %v2961_v61, %v5781_v53  ;;  %v2993_v56 = vmul.f32 %v2961_v61, %v5783_v10  ;;  %vm2970_vm10 = vmor %vm2968_vm3, %vm2969_vm15 }
 0xb69   : > { %v2971_v24 = vsel %vm2970_vm10, %v4139_v60, %v2967_v62  ;;  %vm6398_vm15 = vmmov %vm6394_vm7 }
 0xb6a   : > { %v2994_v31 = vmul.f32 %v2971_v24, %v5785_v48  ;;  %vm6399_vm3 = vmmov %vm6395_vm0 }
 0xb72   : > { %v3007_v33 = vpop.permute.xlu2 %3006 }
 0xb73   : > { %v3024_v43 = vadd.f32 %v3007_v33, %v2992_v1  ;;  %v3025_v42 = vadd.f32 %v3007_v33, %v2993_v56 }
 0xb75   : > { %v3048_v18 = vmul.f32 %v5832_v3, %v3024_v43  ;;  %v3049_v63 = vmul.f32 %v5832_v3, %v3025_v42 }
 0xb7a   : > { %v3038_v60 = vpop.permute.xlu2 %3037 }
 0xb89   : > { %v3017_v47 = vpop.permute.xlu0 %3016  ;;  %v3022_v59 = vpop.permute.xlu1 %3021 }
 0xb8a   : > { %v3028_v49 = vadd.f32 %v3017_v47, %v2996_v21  ;;  %v3029_v50 = vadd.f32 %v3017_v47, %v2997_v25  ;;  %v3030_v38 = vadd.f32 %v3022_v59, %v2998_v26  ;;  %v3031_v8 = vadd.f32 %v3022_v59, %v2999_v5 }
 0xb8c   : > { %v3052_v17 = vmul.f32 %v5826_v36, %v3028_v49  ;;  %v3053_v27 = vmul.f32 %v5826_v36, %v3029_v50  ;;  %v3054_v0 = vmul.f32 %v5806_v40, %v3030_v38  ;;  %v3055_v53 = vmul.f32 %v5806_v40, %v3031_v8 }
 0xb8e   : > { %v3076_v10 = vadd.f32 %v5828_v51, %v3052_v17  ;;  %v3077_v58 = vadd.f32 %v5828_v51, %v3053_v27  ;;  %v3078_v41 = vadd.f32 %v5830_v4, %v3054_v0  ;;  %v3079_v11 = vadd.f32 %v5830_v4, %v3055_v53 }
 0xb8f   : > { %v2995_v51 = vmul.f32 %v2971_v24, %v5787_v39 }
 0xb90   : > { %v3084_v36 = vmax.f32 %v3076_v10, 0.0  ;;  %v3085_v34 = vmax.f32 %v3077_v58, 0.0  ;;  %v3086_v6 = vmax.f32 %v3078_v41, 0.0  ;;  %v3087_v32 = vmax.f32 %v3079_v11, 0.0 }
 0xb91   : > { %v3058_v40 = vpop.permute.xlu0 %3057  ;;  %v3012_v19 = vpop.permute.xlu1 %3011 }
 0xb92   : > { %v3072_v44 = vadd.f32 %v3058_v40, %v3048_v18  ;;  %v3073_v54 = vadd.f32 %v3058_v40, %v3049_v63  ;;  %v3090_v61 = vpack.c.bf16 %v3085_v34, %v3084_v36  ;;  %v3091_v45 = vpack.c.bf16 %v3087_v32, %v3086_v6 }
 0xb93   : > { %v3026_v21 = vadd.f32 %v3012_v19, %v2994_v31  ;;  %v3027_v25 = vadd.f32 %v3012_v19, %v2995_v51 }
 0xb94   : > { %v3080_v4 = vmax.f32 %v3072_v44, 0.0  ;;  %v3081_v33 = vmax.f32 %v3073_v54, 0.0  ;;  %3100 = vrot.lane.b32.xlu2 %v3090_v61, %s4201_s27  ;;  %3102 = vrot.lane.b32.xlu0 %v3091_v45, %s4201_s27 }
 0xb95   : > { %v3050_v26 = vmul.f32 %v3038_v60, %v3026_v21  ;;  %v3051_v5 = vmul.f32 %v3038_v60, %v3027_v25 }
 0xb96   : > { %v3088_v3 = vpack.c.bf16 %v3081_v33, %v3080_v4 }
 0xb98   : > { %3096 = vrot.lane.b32.xlu1 %v3088_v3, %s4201_s27 }
 0xb99   : > { %v3062_v1 = vpop.permute.xlu1 %3061 }
 0xb9a   : > { %v3074_v48 = vadd.f32 %v3062_v1, %v3050_v26  ;;  %v3075_v56 = vadd.f32 %v3062_v1, %v3051_v5 }
 0xb9c   : > { %v3082_v39 = vmax.f32 %v3074_v48, 0.0  ;;  %v3083_v47 = vmax.f32 %v3075_v56, 0.0 }
 0xb9e   : > { %v3089_v59 = vpack.c.bf16 %v3083_v47, %v3082_v39 }
 0xba0   : > { %3098 = vrot.lane.b32.xlu2 %v3089_v59, %s4201_s27 }
 0xbee   : > { %v3101_v49 = vpop.permute.xlu2 %3100 }
 0xbef   : > { %v3106_v50 = vrot.slane %v3101_v49, 4 }
 0xbf1   : > { %v3110_v38 = vsel %vm6392_vm12, %v3106_v50, %v3101_v49  ;;  %3125 = vst.msk [vmem:[#allocation2 + $0x20] sm:$0xf] %vm6393_vm13, %v3106_v50  ;;  %vm6408_vm12 = vcmask 916480  }
 0xbf2   : > { %3124 = vst.msk [vmem:[#allocation2 + $0x18] sm:$0xff] %vm4414_vm9, %v3110_v38  ;;  %vm6409_vm13 = vmmov %vm6408_vm12 }
 0xbf8   : > { %v3954_v58 = vld [vmem:[#allocation2 + $0x20] sm:$0xf] }
 0xbf9   : > { %v3946_v18 = vld [vmem:[#allocation2 + $0x18] sm:$0xf]  ;;  %v4034_v16 = vld [vmem:[#allocation2 + $0x1c] sm:$0xf] }
 0xbfa   : > { %v3099_v8 = vpop.permute.xlu2 %3098  ;;  %v5885_v31 = vld [vmem:[#allocation2 + $0x18] sm:$0xff] }
 0xbfb   : > { %v3105_v43 = vrot.slane %v3099_v8, 4  ;;  %v3134_v4 = vsel %vm6370_vm11, %v5885_v31, 0  ;;  %v3152_v21 = vsel %vm4555_vm14, %v5885_v31, 0 }
 0xbfc   : > { %v3188_v26 = vunpack.c.l.b16 %v3134_v4  ;;  %v3189_v56 = vunpack.c.h.b16 %v3134_v4  ;;  %v3306_v9 = vunpack.c.l.b16 %v3152_v21 }
 0xbfd   : > { %v3109_v42 = vsel %vm6394_vm7, %v3105_v43, %v3099_v8  ;;  %3123 = vst.msk [vmem:[#allocation2 + $0x14] sm:$0xf] %vm6395_vm0, %v3105_v43  ;;  %vm6410_vm7 = vcmask 785408   ;;  %vm6411_vm0 = vcmask 1031168  }
 0xbfe   : > { %3122 = vst.msk [vmem:[#allocation2 + $0xc] sm:$0xff] %vm4414_vm9, %v3109_v42 }
 0xc05   : > { %v3936_v34 = vld [vmem:[#allocation2 + $0xc] sm:$0xf0]  ;;  %v4033_v44 = vld [vmem:[#allocation2 + $0x8] sm:$0xf0] }
 0xc06   : > { %v3103_v62 = vpop.permute.xlu0 %3102  ;;  %v5887_v51 = vld [vmem:[#allocation2 + $0xc] sm:$0xff] }
 0xc07   : > { %v3107_v17 = vrot.slane %v3103_v62, 4  ;;  %v3133_v33 = vsel %vm6370_vm11, %v5887_v51, 0  ;;  %v3166_v23 = vsel %vm4404_vm1, %v5887_v51, 0 }
 0xc08   : > { %v3186_v48 = vunpack.c.l.b16 %v3133_v33  ;;  %v3187_v59 = vunpack.c.h.b16 %v3133_v33 }
 0xc09   : > { %v3111_v27 = vsel %vm6396_vm8, %v3107_v17, %v3103_v62  ;;  %3127 = vst.msk [vmem:[#allocation2 + $0x2c] sm:$0xf] %vm6397_vm5, %v3107_v17  ;;  %vm6412_vm8 = vmmov %vm6410_vm7 }
 0xc0a   : > { %v3097_v0 = vpop.permute.xlu1 %3096  ;;  %3126 = vst.msk [vmem:[#allocation2 + $0x24] sm:$0xff] %vm4414_vm9, %v3111_v27  ;;  %v3307_v27 = vunpack.c.h.b16 %v3152_v21  ;;  %vm6413_vm5 = vmmov %vm6411_vm0 }
 0xc0b   : > { %v3104_v53 = vrot.slane %v3097_v0, 4 }
 0xc0d   : > { %v3108_v10 = vsel %vm6398_vm15, %v3104_v53, %v3097_v0  ;;  %3121 = vst.msk [vmem:[#allocation2 + $0x8] sm:$0xf] %vm6399_vm3, %v3104_v53  ;;  %v3168_v0 = vsel %vm4404_vm1, %v5885_v31, 0  ;;  %vm6414_vm15 = vcmask 1039360   ;;  %vm6415_vm3 = vcmask 900096  }
 0xc0e   : > { %3120 = vst.msk [vmem:[#allocation2] sm:$0xff] %vm4414_vm9, %v3108_v10  ;;  %v3419_v21 = vunpack.c.h.b16 %v3168_v0  ;;  %vm6401_vm9 = vnez %v6284_v7 }
 0xc10   : > { %v4037_v41 = vld [vmem:[#allocation2 + $0x28] sm:$0xf0] }
 0xc11   : > { %v5876_v11 = vor.u32 %v4037_v41, %v3954_v58  ;;  %v4035_v63 = vld [vmem:[#allocation2 + $0x20] sm:$0xf0]  ;;  %v3948_v32 = vld [vmem:[#allocation2 + $0x24] sm:$0xf0]  ;;  %v3418_v58 = vunpack.c.l.b16 %v3168_v0 }
 0xc12   : > { %v3947_v24 = vor.u32 %v4035_v63, %v3946_v18  ;;  %v3951_v40 = vor.u32 %v4034_v16, %v3948_v32  ;;  %v5890_v61 = vld [vmem:[#allocation2 + $0x24] sm:$0xff]  ;;  %v3150_v63 = vsel %vm4555_vm14, %v5887_v51, 0 }
 0xc13   : > { %3460 = vrot.lane.b32.xlu1 %v5876_v11, %s4203_s29  ;;  %v3154_v25 = vsel %vm4555_vm14, %v5890_v61, 0  ;;  %v3135_v3 = vsel %vm6370_vm11, %v5890_v61, 0  ;;  %v3170_v17 = vsel %vm4404_vm1, %v5890_v61, 0  ;;  %v3304_v33 = vunpack.c.h.b16 %v3150_v63 }
 0xc14   : > { %3456 = vrot.lane.b32.xlu0 %v3947_v24, %s4203_s29  ;;  %v3190_v5 = vunpack.c.l.b16 %v3135_v3  ;;  %v3191_v39 = vunpack.c.h.b16 %v3135_v3  ;;  %v3309_v49 = vunpack.c.l.b16 %v3154_v25  ;;  %v3310_v62 = vunpack.c.h.b16 %v3154_v25 }
 0xc15   : > { %v4032_v36 = vld [vmem:[#allocation2 + $0x4] sm:$0xf]  ;;  %v3934_v19 = vld [vmem:[#allocation2] sm:$0xf]  ;;  %v3421_v53 = vunpack.c.l.b16 %v3170_v17  ;;  %v3142_v25 = vsel %vm4580_vm6, %v5887_v51, 0 }
 0xc16   : > { %v3939_v6 = vor.u32 %v4032_v36, %v3936_v34  ;;  %v3935_v54 = vor.u32 %v4033_v44, %v3934_v19  ;;  %v5892_v45 = vld [vmem:[#allocation2] sm:$0xff]  ;;  %v5914_v50 = vpack.c.b16 %v3190_v5, %v3188_v26  ;;  %v5918_v8 = vpack.c.b16 %v3191_v39, %v3189_v56 }
 0xc17   : > { %v3132_v60 = vsel %vm6370_vm11, %v5892_v45, 0  ;;  %v3315_v42 = vpack.c.b16 %v3309_v49, %v3306_v9  ;;  %v3316_v10 = vpack.c.b16 %v3310_v62, %v3307_v27  ;;  %v3148_v41 = vsel %vm4555_vm14, %v5892_v45, 0  ;;  %v5965_v39 = vld [vmem:[#allocation2 + $0x20] sm:$0xf] }
 0xc18   : > { %3452 = vrot.lane.b32.xlu2 %v3939_v6, %s4203_s29  ;;  %v3184_v1 = vunpack.c.l.b16 %v3132_v60  ;;  %v3185_v47 = vunpack.c.h.b16 %v3132_v60  ;;  %v3427_v18 = vpack.c.b16 %v3421_v53, %v3418_v58  ;;  %v3146_v36 = vsel %vm4580_vm6, %v5890_v61, 0 }
 0xc19   : > { %v3303_v34 = vunpack.c.l.b16 %v3150_v63  ;;  %v3264_v32 = vunpack.c.h.b16 %v3146_v36  ;;  %v3301_v44 = vunpack.c.h.b16 %v3148_v41  ;;  %v3140_v4 = vsel %vm4580_vm6, %v5892_v45, 0 }
 0xc1a   : > { %v5916_v38 = vpack.c.b16 %v3186_v48, %v3184_v1  ;;  %v5920_v43 = vpack.c.b16 %v3187_v59, %v3185_v47  ;;  %v3257_v26 = vunpack.c.l.b16 %v3142_v25  ;;  %v3164_v5 = vsel %vm4404_vm1, %v5892_v45, 0  ;;  %v5959_v1 = vld [vmem:[#allocation2 + $0x2c] sm:$0xf] }
 0xc1b   : > { %3458 = vrot.lane.b32.xlu1 %v3951_v40, %s4203_s29  ;;  %v3313_v3 = vpack.c.b16 %v3304_v33, %v3301_v44  ;;  %v3263_v56 = vunpack.c.l.b16 %v3146_v36  ;;  %v3412_v47 = vunpack.c.l.b16 %v3164_v5  ;;  %v3171_v59 = vsel %vm4520_vm2, %v5959_v1, 0 }
 0xc1c   : > { %3232 = vrot.lane.b32.xlu0 %v3947_v24, %s4202_s28  ;;  %v3415_v9 = vunpack.c.l.b16 %v3166_v23  ;;  %v3413_v53 = vunpack.c.h.b16 %v3164_v5  ;;  %v3162_v58 = vsel %vm4410_vm4, %v5890_v61, 0  ;;  %v3160_v63 = vsel %vm4410_vm4, %v5885_v31, 0 }
 0xc1d   : > { %vm6400_vm1 = vnez %v6282_v52  ;;  %v3375_v44 = vunpack.c.l.b16 %v3162_v58  ;;  %v3156_v33 = vsel %vm4410_vm4, %v5892_v45, 0  ;;  %vm6404_vm14 = vnez %v6274_v30 }
 0xc1e   : > { %v3424_v27 = vpack.c.b16 %v3415_v9, %v3412_v47  ;;  %v3147_v47 = vsel %vm6401_vm9, %v5959_v1, 0 }
 0xc20   : > { %3228 = vrot.lane.b32.xlu2 %v3939_v6, %s4202_s28 }
 0xc23   : > { %3450 = vrot.lane.b32.xlu1 %v3935_v54, %s4203_s29 }
 0xc24   : > { %3344 = vrot.lane.b32.xlu0 %v3947_v24, %s4209_s8  ;;  %v3300_v24 = vunpack.c.l.b16 %v3148_v41  ;;  %v3416_v41 = vunpack.c.h.b16 %v3166_v23  ;;  %v3367_v23 = vunpack.c.h.b16 %v3156_v33 }
 0xc26   : > { %v3312_v16 = vpack.c.b16 %v3303_v34, %v3300_v24  ;;  %v5983_v24 = vld [vmem:[#allocation2 + $0x8] sm:$0xf]  ;;  %v3425_v36 = vpack.c.b16 %v3416_v41, %v3413_v53  ;;  %v3376_v34 = vunpack.c.h.b16 %v3162_v58 }
 0xc27   : > { %v3141_v28 = vsel %vm6401_vm9, %v5983_v24, 0 }
 0xc28   : > { %3338 = vrot.lane.b32.xlu2 %v3935_v54, %s4209_s8 }
 0xc2b   : > { %3234 = vrot.lane.b32.xlu1 %v3951_v40, %s4202_s28 }
 0xc2c   : > { %3340 = vrot.lane.b32.xlu0 %v3939_v6, %s4209_s8  ;;  %v3144_v6 = vsel %vm4580_vm6, %v5885_v31, 0  ;;  %vm6405_vm6 = vcmask 777216  }
 0xc2d   : > { %v3261_v19 = vunpack.c.h.b16 %v3144_v6  ;;  %v3260_v49 = vunpack.c.l.b16 %v3144_v6  ;;  %vm6406_vm11 = vmmov %vm6405_vm6 }
 0xc2e   : > { %vm6407_vm10 = vmmov %vm6405_vm6 }
 0xc2f   : > { %v3270_v55 = vpack.c.b16 %v3264_v32, %v3261_v19  ;;  %v3269_v62 = vpack.c.b16 %v3263_v56, %v3260_v49  ;;  %v5985_v32 = vld [vmem:[#allocation2 + $0x14] sm:$0xf]  ;;  %v3149_v19 = vsel %vm6400_vm1, %v5983_v24, 0  ;;  %v3942_v56 = vld [vmem:[#allocation2 + $0x8] sm:$0xf]  ;;  %v3145_v49 = vsel %vm6401_vm9, %v5965_v39, 0 }
 0xc30   : > { %3324 = vrot.lane.b32.xlu2 %v3315_v42, %s4204_s30  ;;  %v3169_v42 = vsel %vm4520_vm2, %v5965_v39, 0 }
 0xc31   : > { %v3420_v13 = vunpack.c.l.b16 %v3169_v42  ;;  %v3265_v42 = vunpack.c.l.b16 %v3147_v47 }
 0xc33   : > { %3226 = vrot.lane.b32.xlu1 %v3935_v54, %s4202_s28  ;;  %v3422_v54 = vunpack.c.h.b16 %v3170_v17  ;;  %v3423_v17 = vunpack.c.l.b16 %v3171_v59  ;;  %v4036_v59 = vld [vmem:[#allocation2 + $0x10] sm:$0xf0] }
 0xc34   : > { %3326 = vrot.lane.b32.xlu0 %v3316_v10, %s4204_s30  ;;  %v3255_v10 = vunpack.c.h.b16 %v3140_v4  ;;  %v6011_v9 = vor.u32 %v4036_v59, %v3942_v56 }
 0xc35   : > { %v3428_v60 = vpack.c.b16 %v3422_v54, %v3419_v21  ;;  %v3429_v0 = vpack.c.b16 %v3423_v17, %v3420_v13  ;;  %v3151_v54 = vsel %vm6400_vm1, %v5985_v32, 0  ;;  %v3372_v21 = vunpack.c.l.b16 %v3160_v63 }
 0xc36   : > { %v3155_v17 = vsel %vm6400_vm1, %v5959_v1, 0 }
 0xc38   : > { %3436 = vrot.lane.b32.xlu2 %v3427_v18, %s4207_s6  ;;  %v3258_v18 = vunpack.c.h.b16 %v3142_v25  ;;  %v3305_v25 = vunpack.c.l.b16 %v3151_v54 }
 0xc3a   : > { %v3267_v6 = vpack.c.b16 %v3258_v18, %v3255_v10  ;;  %v3311_v10 = vunpack.c.l.b16 %v3155_v17  ;;  %v3179_v17 = vsel %vm6404_vm14, %v5959_v1, 0 }
 0xc3b   : > { %3346 = vrot.lane.b32.xlu1 %v3951_v40, %s4209_s8  ;;  %v3254_v40 = vunpack.c.l.b16 %v3140_v4  ;;  %v3302_v4 = vunpack.c.l.b16 %v3149_v19 }
 0xc3c   : > { %3318 = vrot.lane.b32.xlu0 %v3312_v16, %s4204_s30  ;;  %v3373_v16 = vunpack.c.h.b16 %v3160_v63 }
 0xc3d   : > { %v3266_v48 = vpack.c.b16 %v3257_v26, %v3254_v40  ;;  %v3381_v40 = vpack.c.b16 %v3375_v44, %v3372_v21  ;;  %v3314_v26 = vpack.c.b16 %v3305_v25, %v3302_v4 }
 0xc40   : > { %3280 = vrot.lane.b32.xlu2 %v3270_v55, %s4205_s4  ;;  %v3382_v55 = vpack.c.b16 %v3376_v34, %v3373_v16 }
 0xc43   : > { %3320 = vrot.lane.b32.xlu1 %v3313_v3, %s4204_s30  ;;  %v3158_v3 = vsel %vm4410_vm4, %v5887_v51, 0  ;;  %vm6402_vm4 = vnez %v6294_v12 }
 0xc44   : > { %3438 = vrot.lane.b32.xlu0 %v3428_v60, %s4207_s6  ;;  %v3366_v60 = vunpack.c.l.b16 %v3156_v33  ;;  %v3369_v5 = vunpack.c.l.b16 %v3158_v3  ;;  %v3370_v14 = vunpack.c.h.b16 %v3158_v3  ;;  %v3178_v13 = vsel %vm6402_vm4, %v5890_v61, 0 }
 0xc45   : > { %v3176_v58 = vsel %vm6402_vm4, %v5885_v31, 0  ;;  %v3488_v41 = vunpack.c.h.b16 %v3178_v13  ;;  %v3487_v34 = vunpack.c.l.b16 %v3178_v13  ;;  %v3172_v16 = vsel %vm6402_vm4, %v5892_v45, 0 }
 0xc46   : > { %v3485_v63 = vunpack.c.h.b16 %v3176_v58  ;;  %v3484_v52 = vunpack.c.l.b16 %v3176_v58  ;;  %v3167_v31 = vsel %vm4520_vm2, %v5985_v32, 0  ;;  %v3174_v44 = vsel %vm6402_vm4, %v5887_v51, 0 }
 0xc47   : > { %v3479_v54 = vunpack.c.h.b16 %v3172_v16  ;;  %v3417_v4 = vunpack.c.l.b16 %v3167_v31  ;;  %v3482_v33 = vunpack.c.h.b16 %v3174_v44  ;;  %v3478_v25 = vunpack.c.l.b16 %v3172_v16 }
 0xc48   : > { %3272 = vrot.lane.b32.xlu2 %v3266_v48, %s4205_s4  ;;  %v3378_v48 = vpack.c.b16 %v3369_v5, %v3366_v60  ;;  %v3494_v61 = vpack.c.b16 %v3488_v41, %v3485_v63  ;;  %v3493_v19 = vpack.c.b16 %v3487_v34, %v3484_v52  ;;  %v3143_v51 = vsel %vm6401_vm9, %v5985_v32, 0  ;;  %vm6417_vm9 = vmmov %vm6415_vm3 }
 0xc49   : > { %v3491_v3 = vpack.c.b16 %v3482_v33, %v3479_v54  ;;  %v3489_v13 = vunpack.c.l.b16 %v3179_v17  ;;  %vm6418_vm4 = vcmask 908288  }
 0xc4b   : > { %3278 = vrot.lane.b32.xlu1 %v3269_v62, %s4205_s4  ;;  %v3379_v62 = vpack.c.b16 %v3370_v14, %v3367_v23  ;;  %v3259_v23 = vunpack.c.l.b16 %v3143_v51 }
 0xc4c   : > { %3430 = vrot.lane.b32.xlu0 %v3424_v27, %s4207_s6  ;;  %v3262_v27 = vunpack.c.l.b16 %v3145_v49 }
 0xc4e   : > { %v3271_v53 = vpack.c.b16 %v3265_v42, %v3262_v27 }
 0xc50   : > { %3440 = vrot.lane.b32.xlu2 %v3429_v0, %s4207_s6  ;;  %v3153_v0 = vsel %vm6400_vm1, %v5965_v39, 0  ;;  %vm6416_vm1 = vmmov %vm6414_vm15 }
 0xc51   : > { %v3308_v18 = vunpack.c.l.b16 %v3153_v0 }
 0xc53   : > { %3432 = vrot.lane.b32.xlu1 %v3425_v36, %s4207_s6  ;;  %v3317_v36 = vpack.c.b16 %v3311_v10, %v3308_v18 }
 0xc54   : > { %3274 = vrot.lane.b32.xlu0 %v3267_v6, %s4205_s4  ;;  %v3165_v6 = vsel %vm4520_vm2, %v5983_v24, 0  ;;  %vm6403_vm2 = vnez %v6288_v35  ;;  %v3177_v35 = vsel %vm6404_vm14, %v5965_v39, 0 }
 0xc55   : > { %v3163_v12 = vsel %vm6403_vm2, %v5959_v1, 0  ;;  %v3161_v5 = vsel %vm6403_vm2, %v5965_v39, 0  ;;  %v3157_v56 = vsel %vm6403_vm2, %v5983_v24, 0  ;;  %v3159_v7 = vsel %vm6403_vm2, %v5985_v32, 0  ;;  %vm6419_vm2 = vmmov %vm6405_vm6 }
 0xc56   : > { %v3374_v47 = vunpack.c.l.b16 %v3161_v5  ;;  %v3368_v49 = vunpack.c.l.b16 %v3157_v56  ;;  %v3486_v0 = vunpack.c.l.b16 %v3177_v35  ;;  %v3173_v1 = vsel %vm6404_vm14, %v5983_v24, 0 }
 0xc57   : > { %v3175_v39 = vsel %vm6404_vm14, %v5985_v32, 0  ;;  %v3480_v18 = vunpack.c.l.b16 %v3173_v1  ;;  %vm6420_vm14 = vmmov %vm6408_vm12 }
 0xc58   : > { %3392 = vrot.lane.b32.xlu2 %v3382_v55, %s4206_s5  ;;  %v3414_v55 = vunpack.c.l.b16 %v3165_v6  ;;  %v3495_v10 = vpack.c.b16 %v3489_v13, %v3486_v0  ;;  %v3483_v63 = vunpack.c.l.b16 %v3175_v39  ;;  %v3966_v13 = vld [vmem:[%s6239_s2 + $0x90] sm:$0xf]  ;;  %v4039_v0 = vld [vmem:[%s6239_s2 + $0x98] sm:$0xf0] }
 0xc59   : > { %v6134_v39 = vor.u32 %v4039_v0, %v3966_v13 }
 0xc5a   : > { %v3426_v45 = vpack.c.b16 %v3417_v4, %v3414_v55  ;;  %v3492_v34 = vpack.c.b16 %v3483_v63, %v3480_v18  ;;  %v4038_v63 = vld [vmem:[%s6239_s2 + $0x94] sm:$0xf] }
 0xc5b   : > { %3390 = vrot.lane.b32.xlu1 %v3381_v40, %s4206_s5  ;;  %v3481_v40 = vunpack.c.l.b16 %v3174_v44 }
 0xc5c   : > { %3322 = vrot.lane.b32.xlu0 %v3314_v26, %s4204_s30  ;;  %v3256_v26 = vunpack.c.l.b16 %v3141_v28 }
 0xc5d   : > { %v3490_v60 = vpack.c.b16 %v3481_v40, %v3478_v25 }
 0xc5e   : > { %v3268_v14 = vpack.c.b16 %v3259_v23, %v3256_v26 }
 0xc60   : > { %3384 = vrot.lane.b32.xlu2 %v3378_v48, %s4206_s5  ;;  %v3377_v48 = vunpack.c.l.b16 %v3163_v12 }
 0xc62   : > { %v3383_v42 = vpack.c.b16 %v3377_v48, %v3374_v47 }
 0xc63   : > { %3454 = vrot.lane.b32.xlu1 %v6011_v9, %s4203_s29 }
 0xc64   : > { %3386 = vrot.lane.b32.xlu0 %v3379_v62, %s4206_s5  ;;  %v3371_v62 = vunpack.c.l.b16 %v3159_v7 }
 0xc66   : > { %v3380_v27 = vpack.c.b16 %v3371_v62, %v3368_v49 }
 0xc68   : > { %3282 = vrot.lane.b32.xlu2 %v3271_v53, %s4205_s4 }
 0xc6b   : > { %3328 = vrot.lane.b32.xlu1 %v3317_v36, %s4204_s30 }
 0xc6c   : > { %3504 = vrot.lane.b32.xlu0 %v3494_v61, %s4208_s7 }
 0xc70   : > { %3502 = vrot.lane.b32.xlu2 %v3493_v19, %s4208_s7 }
 0xc72   : > { %v6044_v21 = vpop.permute.xlu2 %3452 }
 0xc73   : > { %3434 = vrot.lane.b32.xlu1 %v3426_v45, %s4207_s6 }
 0xc74   : > { %3498 = vrot.lane.b32.xlu0 %v3491_v3, %s4208_s7 }
 0xc78   : > { %3496 = vrot.lane.b32.xlu2 %v3490_v60, %s4208_s7 }
 0xc7a   : > { %v6067_v59 = vpop.permute.xlu2 %3228 }
 0xc7b   : > { %3276 = vrot.lane.b32.xlu1 %v3268_v14, %s4205_s4 }
 0xc7c   : > { %3394 = vrot.lane.b32.xlu0 %v3383_v42, %s4206_s5 }
 0xc80   : > { %3388 = vrot.lane.b32.xlu2 %v3380_v27, %s4206_s5 }
 0xc82   : > { %v6078_v53 = vpop.permute.xlu2 %3338 }
 0xc83   : > { %3236 = vrot.lane.b32.xlu1 %v5876_v11, %s4202_s28 }
 0xc84   : > { %3506 = vrot.lane.b32.xlu0 %v3495_v10, %s4208_s7 }
 0xc85   : > { %v3461_v58 = vpop.permute.xlu1 %3460 }
 0xc86   : > { %v3457_v41 = vpop.permute.xlu0 %3456 }
 0xc88   : > { %3348 = vrot.lane.b32.xlu2 %v5876_v11, %s4209_s8 }
 0xc8a   : > { %v3325_v36 = vpop.permute.xlu2 %3324 }
 0xc8b   : > { %3230 = vrot.lane.b32.xlu1 %v6011_v9, %s4202_s28  ;;  %s6217_s28 = scalar_lea.vmem %s6240_s3, %s3994_s14 }
 0xc8c   : > { %3500 = vrot.lane.b32.xlu0 %v3492_v34, %s4208_s7 }
 0xc8d   : > { %v3459_v24 = vpop.permute.xlu1 %3458 }
 0xc8e   : > { %v3464_v61 = vsel %vm6405_vm6, %v3457_v41, %v3459_v24  ;;  %v3465_v6 = vsel %vm6406_vm11, %v3459_v24, %v3461_v58  ;;  %v3233_v30 = vpop.permute.xlu0 %3232  ;;  %vm6421_vm6 = vcmask 769024   ;;  %vm6422_vm11 = vmmov %vm6418_vm4 }
 0xc8f   : > { %3580 = vmatpush.bf16.msra.mxu3 %v3464_v61 }
 0xc90   : > { %3342 = vrot.lane.b32.xlu2 %v6011_v9, %s4209_s8 }
 0xc92   : > { %v3437_v32 = vpop.permute.xlu2 %3436 }
 0xc95   : > { %v3451_v11 = vpop.permute.xlu1 %3450 }
 0xc96   : > { %v3345_v52 = vpop.permute.xlu0 %3344  ;;  %v3462_v16 = vsel %vm6407_vm10, %v3451_v11, %v6044_v21  ;;  %vm6423_vm10 = vmmov %vm6410_vm7  ;;  %v3978_v11 = vld [vmem:[%s6239_s2 + $0xa8] sm:$0xf] }
 0xc97   : > { %3581 = vmatpush.bf16.msra.mxu3 %v3462_v16  ;;  %v3974_v16 = vld [vmem:[%s6239_s2 + $0x98] sm:$0xf] }
 0xc9a   : > { %v6100_v31 = vpop.permute.xlu2 %3280 }
 0xc9d   : > { %v6102_v19 = vpop.permute.xlu1 %3234 }
 0xc9e   : > { %v6104_v55 = vpop.permute.xlu0 %3340  ;;  %v3240_v49 = vsel %vm6414_vm15, %v3233_v30, %v6102_v19  ;;  %vm6427_vm15 = vmmov %vm6415_vm3 }
 0xca2   : > { %v3273_v44 = vpop.permute.xlu2 %3272 }
 0xca5   : > { %v3227_v54 = vpop.permute.xlu1 %3226 }
 0xca6   : > { %v3327_v4 = vpop.permute.xlu0 %3326  ;;  %v3238_v27 = vsel %vm6416_vm1, %v3227_v54, %v6067_v59 }
 0xca7   : > { %v3332_v33 = vsel %vm6408_vm12, %v3325_v36, %v3327_v4 }
 0xca8   : > { %3561 = vmatpush.bf16.msra.mxu1 %v3332_v33 }
 0xcaa   : > { %v3441_v9 = vpop.permute.xlu2 %3440 }
 0xcad   : > { %v6107_v45 = vpop.permute.xlu1 %3346 }
 0xcae   : > { %v3319_v25 = vpop.permute.xlu0 %3318 }
 0xcb2   : > { %v6109_v3 = vpop.permute.xlu2 %3392 }
 0xcb5   : > { %v3321_v28 = vpop.permute.xlu1 %3320 }
 0xcb6   : > { %v3439_v40 = vpop.permute.xlu0 %3438  ;;  %v3330_v12 = vsel %vm6409_vm13, %v3319_v25, %v3321_v28  ;;  %vm6424_vm13 = vmmov %vm6411_vm0 }
 0xcb7   : > { %3562 = vmatpush.bf16.msra.mxu1 %v3330_v12  ;;  %v3444_v51 = vsel %vm6410_vm7, %v3437_v32, %v3439_v40  ;;  %v3445_v30 = vsel %vm6423_vm10, %v3439_v40, %v3441_v9  ;;  %v4041_v12 = vld [vmem:[%s6239_s2 + $0xac] sm:$0xf] }
 0xcb8   : > { %3582 = vmatpush.bf16.msra.mxu3 %v3444_v51 }
 0xcba   : > { %v3385_v60 = vpop.permute.xlu2 %3384 }
 0xcbd   : > { %v3279_v26 = vpop.permute.xlu1 %3278 }
 0xcbe   : > { %v3431_v5 = vpop.permute.xlu0 %3430  ;;  %v3286_v48 = vsel %vm6411_vm0, %v3279_v26, %v6100_v31  ;;  %vm6425_vm0 = vmmov %vm6421_vm6 }
 0xcbf   : > { %3563 = vmatpush.bf16.msra.mxu1 %v3286_v48 }
 0xcc2   : > { %v3283_v23 = vpop.permute.xlu2 %3282 }
 0xcc3   : > { %v3287_v33 = vsel %vm6424_vm13, %v6100_v31, %v3283_v23  ;;  %v3980_v31 = vld [vmem:[%s6239_s2 + $0xb4] sm:$0xf0] }
 0xcc5   : > { %v3433_v56 = vpop.permute.xlu1 %3432 }
 0xcc6   : > { %v6115_v47 = vpop.permute.xlu0 %3274  ;;  %v3442_v7 = vsel %vm6412_vm8, %v3431_v5, %v3433_v56  ;;  %vm6426_vm8 = vcmask 261120  }
 0xcc7   : > { %3583 = vmatpush.bf16.msra.mxu3 %v3442_v7  ;;  %v3284_v14 = vsel %vm6413_vm5, %v3273_v44, %v6115_v47  ;;  %v4040_v44 = vld [vmem:[%s6239_s2 + $0xa0] sm:$0xf0]  ;;  %v3986_v7 = vld [vmem:[%s6239_s2 + $0xb0] sm:$0xf] }
 0xcc8   : > { %3564 = vmatpush.bf16.msra.mxu1 %v3284_v14  ;;  %v3975_v40 = vor.u32 %v4040_v44, %v3974_v16  ;;  %v4043_v14 = vld [vmem:[%s6239_s2 + $0xb8] sm:$0xf0] }
 0xcca   : > { %v3503_v35 = vpop.permute.xlu2 %3502 }
 0xccc   : > { %3565 = vmatpush.bf16.msra.mxu1 %v3240_v49 }
 0xccd   : > { %v3391_v42 = vpop.permute.xlu1 %3390 }
 0xcce   : > { %v3323_v62 = vpop.permute.xlu0 %3322  ;;  %v3398_v17 = vsel %vm6415_vm3, %v3391_v42, %v6109_v3 }
 0xccf   : > { %3584 = vmatpush.bf16.msra.mxu3 %v3398_v17  ;;  %v3331_v32 = vsel %vm6408_vm12, %v3321_v28, %v3323_v62  ;;  %v3987_v17 = vor.u32 %v4043_v14, %v3986_v7 }
 0xcd0   : > { %3566 = vmatpush.bf16.msra.mxu1 %v3238_v27 }
 0xcd2   : > { %v3497_v41 = vpop.permute.xlu2 %3496 }
 0xcd4   : > { %3567 = vmatpush.bf16.msra.mxu1 %v5914_v50  ;;  %v3352_v50 = vsel %vm6418_vm4, %v3345_v52, %v6107_v45 }
 0xcd5   : > { %v3455_v10 = vpop.permute.xlu1 %3454 }
 0xcd6   : > { %v3387_v1 = vpop.permute.xlu0 %3386  ;;  %v3463_v18 = vsel %vm6419_vm2, %v6044_v21, %v3455_v10  ;;  %v3350_v21 = vsel %vm6422_vm11, %v6078_v53, %v6104_v55  ;;  %v4042_v53 = vld [vmem:[%s6239_s2 + $0xb0] sm:$0xf0]  ;;  %vm6429_vm2 = vmmov %vm6426_vm8 }
 0xcd7   : > { %v3396_v58 = vsel %vm6417_vm9, %v3385_v60, %v3387_v1  ;;  %v3979_v28 = vor.u32 %v4042_v53, %v3978_v11  ;;  %vm6428_vm9 = vmmov %vm6425_vm0 }
 0xcd8   : > { %3568 = vmatpush.bf16.msra.mxu1 %v5916_v38  ;;  %3585 = vmatpush.bf16.msra.mxu3 %v3396_v58  ;;  %v3968_v38 = vld [vmem:[%s6239_s2 + $0x9c] sm:$0xf0]  ;;  %vm6432_vm11 = vmmov %vm6425_vm0 }
 0xcd9   : > { %vm6433_vm10 = vmmov %vm6429_vm2 }
 0xcda   : > { %v3389_v52 = vpop.permute.xlu2 %3388  ;;  %vm6434_vm12 = vmmov %vm6429_vm2 }
 0xcdb   : > { %3569 = vmatmul.bf16.vlgmr.msra.gmra.mxu1 %v6134_v39  ;;  %v3397_v23 = vsel %vm6415_vm3, %v3387_v1, %v3389_v52 }
 0xcdc   : > { %3637 = vmatpush.bf16.msrb.mxu1 %v3465_v6  ;;  %3586 = vmatpush.bf16.msra.mxu3 %v3352_v50  ;;  %v6153_v6 = vor.u32 %v4038_v63, %v3968_v38 }
 0xcdd   : > { %v3329_v36 = vpop.permute.xlu1 %3328 }
 0xcde   : > { %v3333_v34 = vsel %vm6420_vm14, %v3327_v4, %v3329_v36  ;;  %v3505_v24 = vpop.permute.xlu0 %3504  ;;  %vm6430_vm14 = vmmov %vm6418_vm4 }
 0xcdf   : > { %v3510_v61 = vsel %vm6421_vm6, %v3503_v35, %v3505_v24  ;;  %3618 = vmatpush.bf16.msrb.mxu0 %v3333_v34  ;;  %vm6431_vm6 = vmmov %vm6416_vm1 }
 0xce0   : > { %3638 = vmatpush.bf16.msrb.mxu1 %v3463_v18  ;;  %3587 = vmatpush.bf16.msra.mxu3 %v3350_v21 }
 0xce1   : > { %3605 = vmatpush.bf16.msrb.mxu2 %v3510_v61 }
 0xce2   : > { %v3349_v60 = vpop.permute.xlu2 %3348 }
 0xce3   : > { %3588 = vmatmul.bf16.vlgmr.msra.gmra.mxu3 %v6153_v6  ;;  %3619 = vmatpush.bf16.msrb.mxu0 %v3331_v32  ;;  %v3353_v62 = vsel %vm6418_vm4, %v6107_v45, %v3349_v60 }
 0xce4   : > { %3639 = vmatpush.bf16.msrb.mxu1 %v3445_v30 }
 0xce5   : > { %v3435_v54 = vpop.permute.xlu1 %3434 }
 0xce6   : > { %v3499_v4 = vpop.permute.xlu0 %3498  ;;  %v3443_v9 = vsel %vm6410_vm7, %v3433_v56, %v3435_v54  ;;  %v3983_v56 = vor.u32 %v4041_v12, %v3980_v31 }
 0xce7   : > { %3620 = vmatpush.bf16.msrb.mxu0 %v3287_v33  ;;  %v3508_v25 = vsel %vm6425_vm0, %v3497_v41, %v3499_v4 }
 0xce8   : > { %3640 = vmatpush.bf16.msrb.mxu1 %v3443_v9  ;;  %3606 = vmatpush.bf16.msrb.mxu2 %v3508_v25 }
 0xcea   : > { %v3343_v27 = vpop.permute.xlu2 %3342 }
 0xceb   : > { %3574 = vmatmul.bf16.gmra.mxu1 %v3979_v28  ;;  %3988 = vmatmul.msk.bf16.vlgmr.msrb.gmra.mxu2 %vm6426_vm8, %v3975_v40  ;;  %v3351_v35 = vsel %vm6430_vm14, %v6104_v55, %v3343_v27 }
 0xcec   : > { %4044 = vmatpush.bf16.msra.mxu2 %v3333_v34 }
 0xced   : > { %v3277_v51 = vpop.permute.xlu1 %3276 }
 0xcee   : > { %v3395_v26 = vpop.permute.xlu0 %3394  ;;  %v3285_v5 = vsel %vm6413_vm5, %v6115_v47, %v3277_v51 }
 0xcef   : > { %3621 = vmatpush.bf16.msrb.mxu0 %v3285_v5  ;;  %v3399_v48 = vsel %vm6427_vm15, %v6109_v3, %v3395_v26 }
 0xcf0   : > { %4045 = vmatpush.bf16.msra.mxu2 %v3331_v32  ;;  %3641 = vmatpush.bf16.msrb.mxu1 %v3399_v48 }
 0xcf3   : > { %3593 = vmatmul.bf16.gmra.mxu3 %v3983_v56 }
 0xcf4   : > { %4046 = vmatpush.bf16.msra.mxu2 %v3287_v33  ;;  %3642 = vmatpush.bf16.msrb.mxu1 %v3397_v23 }
 0xcf5   : > { %v3237_v47 = vpop.permute.xlu1 %3236 }
 0xcf6   : > { %v3507_v49 = vpop.permute.xlu0 %3506  ;;  %v3241_v3 = vsel %vm6416_vm1, %v6102_v19, %v3237_v47 }
 0xcf7   : > { %v3511_v42 = vsel %vm6428_vm9, %v3505_v24, %v3507_v49  ;;  %3622 = vmatpush.bf16.msrb.mxu0 %v3241_v3 }
 0xcf8   : > { %4047 = vmatpush.bf16.msra.mxu2 %v3285_v5  ;;  %3643 = vmatpush.bf16.msrb.mxu1 %v3353_v62 }
 0xcf9   : > { %3662 = vmatpush.bf16.msrb.mxu3 %v3511_v42 }
 0xcfb   : > { %3989 = vmatmul.msk.bf16.gmra.mxu2 %vm6429_vm2, %v3987_v17 }
 0xcfc   : > { %4048 = vmatpush.bf16.msra.mxu2 %v3241_v3  ;;  %3644 = vmatpush.bf16.msrb.mxu1 %v3351_v35 }
 0xcfd   : > { %v3231_v13 = vpop.permute.xlu1 %3230 }
 0xcfe   : > { %v3501_v0 = vpop.permute.xlu0 %3500  ;;  %v3239_v19 = vsel %vm6431_vm6, %v6067_v59, %v3231_v13 }
 0xcff   : > { %3623 = vmatpush.bf16.msrb.mxu0 %v3239_v19  ;;  %v3509_v45 = vsel %vm6432_vm11, %v3499_v4, %v3501_v0  ;;  %3645 = vmatmul.bf16.vlgmr.msrb.gmra.mxu1 %v6153_v6 }
 0xd00   : > { %4049 = vmatpush.bf16.msra.mxu2 %v3239_v19  ;;  %3663 = vmatpush.bf16.msrb.mxu3 %v3509_v45 }
 0xd03   : > { %3624 = vmatpush.bf16.msrb.mxu0 %v5918_v8  ;;  %3990 = vmatmul.msk.bf16.vlgmr.msrb.gmra.mxu3 %vm6433_vm10, %v3975_v40 }
 0xd04   : > { %4050 = vmatpush.bf16.msra.mxu2 %v5918_v8 }
 0xd07   : > { %3625 = vmatpush.bf16.msrb.mxu0 %v5920_v43 }
 0xd08   : > { %4051 = vmatpush.bf16.msra.mxu2 %v5920_v43 }
 0xd0a   : > { %3626 = vmatmul.bf16.vlgmr.msrb.gmra.mxu0 %v6134_v39 }
 0xd0b   : > { %3631 = vmatmul.bf16.vlgmr.msra.gmra.mxu2 %v3979_v28 }
 0xd0f   : > { %3650 = vmatmul.bf16.gmra.mxu1 %v3983_v56 }
 0xd13   : > { %3991 = vmatmul.msk.bf16.gmra.mxu3 %vm6434_vm12, %v3987_v17 }
 0xd58   : > { %v3570_v59 = vpop.f32.mrf.mxu1 }
 0xd59   : > { %v3571_v1 = vadd.f32 %v3570_v59, %v5301_v57 }
 0xd60   : > { %v3572_v55 = vpop.f32.mrf.mxu1 }
 0xd61   : > { %v3573_v50 = vadd.f32 %v3572_v55, %v5309_v46 }
 0xd66   : > { %v3589_v10 = vpop.f32.mrf.mxu3 }
 0xd67   : > { %v3590_v58 = vadd.f32 %v3589_v10, %v3571_v1 }
 0xd68   : > { %v3575_v41 = vpop.f32.mrf.mxu1 }
 0xd69   : > { %v3576_v34 = vadd.f32 %v3575_v41, %v5317_v2 }
 0xd6e   : > { %v3591_v8 = vpop.f32.mrf.mxu3  ;;  %v3608_v43 = vpop.f32.mrf.mxu2 }
 0xd6f   : > { %v3609_v39 = vadd.f32 %v3608_v43, %v3590_v58  ;;  %v3592_v18 = vadd.f32 %v3591_v8, %v3573_v50 }
 0xd70   : > { %v3577_v38 = vpop.f32.mrf.mxu1 }
 0xd71   : > { %3675 = vst [vmem:[%s6217_s28] sm:$0xff] %v3609_v39  ;;  %v3578_v32 = vadd.f32 %v3577_v38, %v5329_v29 }
 0xd76   : > { %v3594_v63 = vpop.f32.mrf.mxu3  ;;  %v3610_v57 = vpop.f32.mrf.mxu2 }
 0xd77   : > { %v3611_v36 = vadd.f32 %v3610_v57, %v3592_v18  ;;  %v3595_v24 = vadd.f32 %v3594_v63, %v3576_v34 }
 0xd79   : > { %3677 = vst [vmem:[%s6217_s28 + $0x10] sm:$0xff] %v3611_v36 }
 0xd7c   : > { %v3646_v30 = vpop.f32.mrf.mxu1 }
 0xd7e   : > { %v3596_v61 = vpop.f32.mrf.mxu3  ;;  %v3613_v21 = vpop.f32.mrf.mxu2 }
 0xd7f   : > { %v3614_v6 = vadd.f32 %v3613_v21, %v3595_v24  ;;  %v3597_v11 = vadd.f32 %v3596_v61, %v3578_v32 }
 0xd81   : > { %3679 = vst [vmem:[%s6217_s28 + $0x20] sm:$0xff] %v3614_v6 }
 0xd84   : > { %v3648_v54 = vpop.f32.mrf.mxu1 }
 0xd86   : > { %v3615_v46 = vpop.f32.mrf.mxu2  ;;  %v3665_v53 = vpop.f32.mrf.mxu3 }
 0xd87   : > { %v3616_v52 = vadd.f32 %v3615_v46, %v3597_v11  ;;  %v3627_v16 = vpop.f32.mrf.mxu0 }
 0xd88   : > { %v3628_v44 = vadd.f32 %v3627_v16, %v5303_v20 }
 0xd89   : > { %3681 = vst [vmem:[%s6217_s28 + $0x30] sm:$0xff] %v3616_v52 }
 0xd8a   : > { %v3647_v2 = vadd.f32 %v3646_v30, %v3628_v44 }
 0xd8c   : > { %v3666_v4 = vadd.f32 %v3665_v53, %v3647_v2  ;;  %v3651_v12 = vpop.f32.mrf.mxu1 }
 0xd8e   : > { %3676 = vst [vmem:[%s6217_s28 + $0x8] sm:$0xff] %v3666_v4  ;;  %v3632_v33 = vpop.f32.mrf.mxu2  ;;  %v3667_v9 = vpop.f32.mrf.mxu3 }
 0xd8f   : > { %v3629_v25 = vpop.f32.mrf.mxu0  ;;  %v3633_v29 = vadd.f32 %v3632_v33, %v5319_v22 }
 0xd90   : > { %v3630_v28 = vadd.f32 %v3629_v25, %v5311_v15 }
 0xd91   : > { %v3652_v51 = vadd.f32 %v3651_v12, %v3633_v29 }
 0xd92   : > { %v3649_v40 = vadd.f32 %v3648_v54, %v3630_v28 }
 0xd94   : > { %v3668_v31 = vadd.f32 %v3667_v9, %v3649_v40  ;;  %v3653_v48 = vpop.f32.mrf.mxu1 }
 0xd96   : > { %3678 = vst [vmem:[%s6217_s28 + $0x18] sm:$0xff] %v3668_v31  ;;  %v3634_v20 = vpop.f32.mrf.mxu2  ;;  %v3670_v60 = vpop.f32.mrf.mxu3 }
 0xd97   : > { %v3671_v26 = vadd.f32 %v3670_v60, %v3652_v51  ;;  %v3635_v5 = vadd.f32 %v3634_v20, %v5327_v37 }
 0xd99   : > { %3680 = vst [vmem:[%s6217_s28 + $0x28] sm:$0xff] %v3671_v26  ;;  %v3654_v56 = vadd.f32 %v3653_v48, %v3635_v5 }
 0xd9e   : > { %v3672_v23 = vpop.f32.mrf.mxu3 }
 0xd9f   : > { %v3673_v7 = vadd.f32 %v3672_v23, %v3654_v56 }
 0xda1   : > { %3682 = vst [vmem:[%s6217_s28 + $0x38] sm:$0xff] %v3673_v7 }
 0xda2 PF: > { %s13_s12 = sadd.s32 1, %s4190_s12  }
 0xda3   : > { %p10_p4 = scmp.ge.s32.totalorder %s13_s12, 4  }
 0xda5   :  { %12 = sbr.rel (!%p10_p4) target bundleno = 1 (0x1), region = 68 }

</bundles_post_ra>
